<compile_context>
chip_gen: v7x
topology: tpu7x:2x2x1
jax: 0.10.0
libtpu: 0.0.40
codegen_flags: <defaults>
</compile_context>

<pallas_src>
import jax
import jax.numpy as jnp
import numpy as np
from jax.experimental import pallas as pl
from jax.experimental.pallas import tpu as pltpu

INPUT_DIM = 498
HIDDEN = 512
OUTPUT_DIM = 4

# Padded / tiling constants.
IN_PAD = 512    # fc1 contraction dim padded 498 -> 512 (zero-filled)
OUT_PAD = 128   # fc3 output padded 4 -> 128 lanes (zero-filled)
TILE_B = 256    # multiple of 128 (v5e MXU) and 256 (v6e/v7x MXU)


def dqn_kernel(x_ref, w1_ref, b1_ref, w2_ref, b2_ref, w3_ref, b3_ref,
               o_ref, h1_ref, h2_ref):
    # fc1 + relu: bf16 matmul on the MXU, f32 accumulate, f32 epilogue.
    h1 = jnp.dot(x_ref[...].astype(jnp.bfloat16), w1_ref[...],
                 preferred_element_type=jnp.float32)
    h1_ref[...] = jnp.maximum(h1 + b1_ref[...], 0.0)
    # fc2 + relu
    h2 = jnp.dot(h1_ref[...].astype(jnp.bfloat16), w2_ref[...],
                 preferred_element_type=jnp.float32)
    h2_ref[...] = jnp.maximum(h2 + b2_ref[...], 0.0)
    # fc3 (no activation), lane-dense 128-wide store.
    o_ref[...] = jnp.dot(h2_ref[...].astype(jnp.bfloat16), w3_ref[...],
                         preferred_element_type=jnp.float32) + b3_ref[...]


def init_params(key):
    """Deterministic init mirroring nn.Linear default (uniform +-1/sqrt(fan_in)).

    Weights stored transposed vs. PyTorch, i.e. [in_features, out_features],
    so the forward is y = x @ W + b.
    """
    def linear(key, fan_in, fan_out):
        kw, kb = jax.random.split(key)
        bound = 1.0 / np.sqrt(fan_in)
        w = jax.random.uniform(kw, (fan_in, fan_out), jnp.float32, -bound, bound)
        b = jax.random.uniform(kb, (1, fan_out), jnp.float32, -bound, bound)
        return w, b

    k1, k2, k3 = jax.random.split(key, 3)
    w1, b1 = linear(k1, INPUT_DIM, HIDDEN)
    w2, b2 = linear(k2, HIDDEN, HIDDEN)
    w3, b3 = linear(k3, HIDDEN, OUTPUT_DIM)
    return (w1, b1, w2, b2, w3, b3)


def pack_params(params):
    """Pad + cast f32 params for the kernel.

    fc1 rows zero-padded 498 -> 512, fc3 cols / bias zero-padded 4 -> 128,
    weights cast to bf16, biases kept f32 (f32 epilogue on all chips).
    """
    w1, b1, w2, b2, w3, b3 = params
    w1p = jnp.zeros((IN_PAD, HIDDEN), jnp.float32).at[:INPUT_DIM, :].set(w1)
    w3p = jnp.zeros((HIDDEN, OUT_PAD), jnp.float32).at[:, :OUTPUT_DIM].set(w3)
    b3p = jnp.zeros((1, OUT_PAD), jnp.float32).at[:, :OUTPUT_DIM].set(b3)
    return (w1p.astype(jnp.bfloat16), b1,
            w2.astype(jnp.bfloat16), b2,
            w3p.astype(jnp.bfloat16), b3p)


@jax.jit
def dqn_forward(x, packed):
    w1, b1, w2, b2, w3, b3 = packed
    B = x.shape[0]
    B_pad = ((B + TILE_B - 1) // TILE_B) * TILE_B
    # Zero-pad batch to a multiple of TILE_B and features 498 -> 512.
    xp = jnp.zeros((B_pad, IN_PAD), jnp.float32).at[:B, :INPUT_DIM].set(x)

    resident = lambda i: (0, 0)  # weights / biases stay VMEM-resident across tiles
    cost = pl.CostEstimate(
        flops=2 * B_pad * (IN_PAD * HIDDEN + HIDDEN * HIDDEN + HIDDEN * OUT_PAD),
        transcendentals=0,
        bytes_accessed=(xp.size * 4 + B_pad * OUT_PAD * 4
                        + (w1.size + w2.size + w3.size) * 2
                        + (b1.size + b2.size + b3.size) * 4),
    )

    out = pl.pallas_call(
        dqn_kernel,
        out_shape=jax.ShapeDtypeStruct((B_pad, OUT_PAD), jnp.float32),
        grid_spec=pltpu.PrefetchScalarGridSpec(
            num_scalar_prefetch=0,
            grid=(B_pad // TILE_B,),
            in_specs=[
                pl.BlockSpec((TILE_B, IN_PAD), lambda i: (i, 0)),   # x tile
                pl.BlockSpec((IN_PAD, HIDDEN), resident),           # w1
                pl.BlockSpec((1, HIDDEN), resident),                # b1
                pl.BlockSpec((HIDDEN, HIDDEN), resident),           # w2
                pl.BlockSpec((1, HIDDEN), resident),                # b2
                pl.BlockSpec((HIDDEN, OUT_PAD), resident),          # w3
                pl.BlockSpec((1, OUT_PAD), resident),               # b3
            ],
            out_specs=pl.BlockSpec((TILE_B, OUT_PAD), lambda i: (i, 0)),
            scratch_shapes=[pltpu.VMEM((TILE_B, HIDDEN), jnp.float32),  # h1
                            pltpu.VMEM((TILE_B, HIDDEN), jnp.float32)], # h2
        ),
        compiler_params=pltpu.CompilerParams(
            dimension_semantics=("parallel",)),
        cost_estimate=cost,
    )(xp, w1, b1, w2, b2, w3, b3)

    return out[:B, :OUTPUT_DIM]


def dqn_reference(x, params):
    """Pure-JAX reference with the same bf16-weight / f32-accumulate recipe."""
    w1, b1, w2, b2, w3, b3 = params
    bf = jnp.bfloat16
    h1 = jnp.maximum(
        jnp.dot(x.astype(bf), w1.astype(bf), preferred_element_type=jnp.float32) + b1, 0.0)
    h2 = jnp.maximum(
        jnp.dot(h1.astype(bf), w2.astype(bf), preferred_element_type=jnp.float32) + b2, 0.0)
    return jnp.dot(h2.astype(bf), w3.astype(bf),
                   preferred_element_type=jnp.float32) + b3


if __name__ == "__main__":
    key = jax.random.PRNGKey(0)
    kx, kp = jax.random.split(key)
    batch = 2
    x = jax.random.normal(kx, (batch, INPUT_DIM), dtype=jnp.float32)
    params = init_params(kp)
    packed = pack_params(params)

    out = dqn_forward(x, packed)
    jax.block_until_ready(out)

    ref = dqn_reference(x, params)
    np.testing.assert_allclose(np.asarray(out), np.asarray(ref), rtol=1e-2, atol=1e-2)

    assert out.shape == (batch, OUTPUT_DIM)
    print("KERNEL_OK")
</pallas_src>

<mosaic_0001>
module attributes {stable_mosaic.version = 11 : i64} {
  func.func @dqn_kernel(%arg0: i32, %arg1: memref<256x512xf32, #tpu.memory_space<vmem>>, %arg2: memref<512x512xbf16, #tpu.memory_space<vmem>>, %arg3: memref<1x512xf32, #tpu.memory_space<vmem>>, %arg4: memref<512x512xbf16, #tpu.memory_space<vmem>>, %arg5: memref<1x512xf32, #tpu.memory_space<vmem>>, %arg6: memref<512x128xbf16, #tpu.memory_space<vmem>>, %arg7: memref<1x128xf32, #tpu.memory_space<vmem>>, %arg8: memref<256x128xf32, #tpu.memory_space<vmem>>, %arg9: memref<256x512xf32, #tpu.memory_space<vmem>>, %arg10: memref<256x512xf32, #tpu.memory_space<vmem>>) attributes {dimension_semantics = [#tpu.dimension_semantics<parallel>], iteration_bounds = array<i64: 1>, scalar_prefetch = 0 : i64, scratch_operands = 2 : i64, tpu.core_type = #tpu.core_type<tc>, window_params = [{transform_indices = @transform_0, window_bounds = array<i64: 256, 512>}, {pipeline_mode = #tpu.pipeline_mode<synchronous>, transform_indices = @transform_1, window_bounds = array<i64: 512, 512>}, {pipeline_mode = #tpu.pipeline_mode<synchronous>, transform_indices = @transform_2, window_bounds = array<i64: 1, 512>}, {pipeline_mode = #tpu.pipeline_mode<synchronous>, transform_indices = @transform_3, window_bounds = array<i64: 512, 512>}, {pipeline_mode = #tpu.pipeline_mode<synchronous>, transform_indices = @transform_4, window_bounds = array<i64: 1, 512>}, {pipeline_mode = #tpu.pipeline_mode<synchronous>, transform_indices = @transform_5, window_bounds = array<i64: 512, 128>}, {pipeline_mode = #tpu.pipeline_mode<synchronous>, transform_indices = @transform_6, window_bounds = array<i64: 1, 128>}, {transform_indices = @transform_7, window_bounds = array<i64: 256, 128>}]} {
    %c0 = arith.constant 0 : index
    %c0_0 = arith.constant 0 : index
    %0 = vector.load %arg1[%c0, %c0_0] : memref<256x512xf32, #tpu.memory_space<vmem>>, vector<256x512xf32>
    %1 = arith.truncf %0 : vector<256x512xf32> to vector<256x512xbf16>
    %c0_1 = arith.constant 0 : index
    %c0_2 = arith.constant 0 : index
    %2 = vector.load %arg2[%c0_1, %c0_2] : memref<512x512xbf16, #tpu.memory_space<vmem>>, vector<512x512xbf16>
    %cst = arith.constant dense<0.000000e+00> : vector<256x512xf32>
    %3 = tpu.matmul %1, %2, %cst {dimension_numbers = #tpu.dot_dimension_numbers<[1], [0], [0], [1], [0, 0, 1, 1], [], []>} : vector<256x512xbf16>, vector<512x512xbf16>, vector<256x512xf32> -> vector<256x512xf32>
    %c0_3 = arith.constant 0 : index
    %c0_4 = arith.constant 0 : index
    %4 = vector.load %arg3[%c0_3, %c0_4] : memref<1x512xf32, #tpu.memory_space<vmem>>, vector<1x512xf32>
    %5 = vector.broadcast %4 : vector<1x512xf32> to vector<256x512xf32>
    %6 = arith.addf %3, %5 : vector<256x512xf32>
    %cst_5 = arith.constant 0.000000e+00 : f32
    %7 = vector.broadcast %cst_5 : f32 to vector<256x512xf32>
    %8 = arith.maximumf %6, %7 : vector<256x512xf32>
    %c0_6 = arith.constant 0 : index
    %c0_7 = arith.constant 0 : index
    %9 = vector.load %arg9[%c0_6, %c0_7] : memref<256x512xf32, #tpu.memory_space<vmem>>, vector<256x512xf32>
    tpu.vector_store %arg9[%c0_6, %c0_7], %8 {strides = array<i32>} : memref<256x512xf32, #tpu.memory_space<vmem>>, vector<256x512xf32>,
    %c0_8 = arith.constant 0 : index
    %c0_9 = arith.constant 0 : index
    %10 = vector.load %arg9[%c0_8, %c0_9] : memref<256x512xf32, #tpu.memory_space<vmem>>, vector<256x512xf32>
    %11 = arith.truncf %10 : vector<256x512xf32> to vector<256x512xbf16>
    %c0_10 = arith.constant 0 : index
    %c0_11 = arith.constant 0 : index
    %12 = vector.load %arg4[%c0_10, %c0_11] : memref<512x512xbf16, #tpu.memory_space<vmem>>, vector<512x512xbf16>
    %cst_12 = arith.constant dense<0.000000e+00> : vector<256x512xf32>
    %13 = tpu.matmul %11, %12, %cst_12 {dimension_numbers = #tpu.dot_dimension_numbers<[1], [0], [0], [1], [0, 0, 1, 1], [], []>} : vector<256x512xbf16>, vector<512x512xbf16>, vector<256x512xf32> -> vector<256x512xf32>
    %c0_13 = arith.constant 0 : index
    %c0_14 = arith.constant 0 : index
    %14 = vector.load %arg5[%c0_13, %c0_14] : memref<1x512xf32, #tpu.memory_space<vmem>>, vector<1x512xf32>
    %15 = vector.broadcast %14 : vector<1x512xf32> to vector<256x512xf32>
    %16 = arith.addf %13, %15 : vector<256x512xf32>
    %cst_15 = arith.constant 0.000000e+00 : f32
    %17 = vector.broadcast %cst_15 : f32 to vector<256x512xf32>
    %18 = arith.maximumf %16, %17 : vector<256x512xf32>
    %c0_16 = arith.constant 0 : index
    %c0_17 = arith.constant 0 : index
    %19 = vector.load %arg10[%c0_16, %c0_17] : memref<256x512xf32, #tpu.memory_space<vmem>>, vector<256x512xf32>
    tpu.vector_store %arg10[%c0_16, %c0_17], %18 {strides = array<i32>} : memref<256x512xf32, #tpu.memory_space<vmem>>, vector<256x512xf32>,
    %c0_18 = arith.constant 0 : index
    %c0_19 = arith.constant 0 : index
    %20 = vector.load %arg10[%c0_18, %c0_19] : memref<256x512xf32, #tpu.memory_space<vmem>>, vector<256x512xf32>
    %21 = arith.truncf %20 : vector<256x512xf32> to vector<256x512xbf16>
    %c0_20 = arith.constant 0 : index
    %c0_21 = arith.constant 0 : index
    %22 = vector.load %arg6[%c0_20, %c0_21] : memref<512x128xbf16, #tpu.memory_space<vmem>>, vector<512x128xbf16>
    %cst_22 = arith.constant dense<0.000000e+00> : vector<256x128xf32>
    %23 = tpu.matmul %21, %22, %cst_22 {dimension_numbers = #tpu.dot_dimension_numbers<[1], [0], [0], [1], [0, 0, 1, 1], [], []>} : vector<256x512xbf16>, vector<512x128xbf16>, vector<256x128xf32> -> vector<256x128xf32>
    %c0_23 = arith.constant 0 : index
    %c0_24 = arith.constant 0 : index
    %24 = vector.load %arg7[%c0_23, %c0_24] : memref<1x128xf32, #tpu.memory_space<vmem>>, vector<1x128xf32>
    %25 = vector.broadcast %24 : vector<1x128xf32> to vector<256x128xf32>
    %26 = arith.addf %23, %25 : vector<256x128xf32>
    %c0_25 = arith.constant 0 : index
    %c0_26 = arith.constant 0 : index
    %27 = vector.load %arg8[%c0_25, %c0_26] : memref<256x128xf32, #tpu.memory_space<vmem>>, vector<256x128xf32>
    tpu.vector_store %arg8[%c0_25, %c0_26], %26 {strides = array<i32>} : memref<256x128xf32, #tpu.memory_space<vmem>>, vector<256x128xf32>,
    return
  }
  func.func @transform_0(%arg0: i32) -> (i32, i32) {
    %c0_i32 = arith.constant 0 : i32
    %c0_i32_0 = arith.constant 0 : i32
    return %arg0, %c0_i32 : i32, i32
  }
  func.func @transform_1(%arg0: i32) -> (i32, i32) {
    %c0_i32 = arith.constant 0 : i32
    %c0_i32_0 = arith.constant 0 : i32
    %c0_i32_1 = arith.constant 0 : i32
    return %c0_i32, %c0_i32_0 : i32, i32
  }
  func.func @transform_2(%arg0: i32) -> (i32, i32) {
    %c0_i32 = arith.constant 0 : i32
    %c0_i32_0 = arith.constant 0 : i32
    %c0_i32_1 = arith.constant 0 : i32
    return %c0_i32, %c0_i32_0 : i32, i32
  }
  func.func @transform_3(%arg0: i32) -> (i32, i32) {
    %c0_i32 = arith.constant 0 : i32
    %c0_i32_0 = arith.constant 0 : i32
    %c0_i32_1 = arith.constant 0 : i32
    return %c0_i32, %c0_i32_0 : i32, i32
  }
  func.func @transform_4(%arg0: i32) -> (i32, i32) {
    %c0_i32 = arith.constant 0 : i32
    %c0_i32_0 = arith.constant 0 : i32
    %c0_i32_1 = arith.constant 0 : i32
    return %c0_i32, %c0_i32_0 : i32, i32
  }
  func.func @transform_5(%arg0: i32) -> (i32, i32) {
    %c0_i32 = arith.constant 0 : i32
    %c0_i32_0 = arith.constant 0 : i32
    %c0_i32_1 = arith.constant 0 : i32
    return %c0_i32, %c0_i32_0 : i32, i32
  }
  func.func @transform_6(%arg0: i32) -> (i32, i32) {
    %c0_i32 = arith.constant 0 : i32
    %c0_i32_0 = arith.constant 0 : i32
    %c0_i32_1 = arith.constant 0 : i32
    return %c0_i32, %c0_i32_0 : i32, i32
  }
  func.func @transform_7(%arg0: i32) -> (i32, i32) {
    %c0_i32 = arith.constant 0 : i32
    %c0_i32_0 = arith.constant 0 : i32
    return %arg0, %c0_i32 : i32, i32
  }
}

</mosaic_0001>

<bundles_post_ra>
// kernel: dqn_forward.1
= control target key start
LH: loop header
LB: loop body
LE: loop exit
PB: predicated region body
PF: predicated region fallthrough
CT: control target
= control target key end

     0   :  { %12 = vsyncpa [#allocation5], 0  ;;  %s7784_s0 = inlined_call_operand.vmem [shape: f32[256,512], index: 0, kind: input, shape index: {}]   ;;  %s7785_s1 = inlined_call_operand.vmem [shape: bf16[512,512], index: 1, kind: input, shape index: {}]   ;;  %s7786_s2 = inlined_call_operand.vmem [shape: f32[1,512], index: 2, kind: input, shape index: {}]   ;;  %s7787_s3 = inlined_call_operand.hbm [shape: bf16[512,512], index: 3, kind: input, shape index: {}]   ;;  %s7788_s4 = inlined_call_operand.vmem [shape: f32[1,512], index: 4, kind: input, shape index: {}]   ;;  %s7789_s5 = inlined_call_operand.hbm [shape: bf16[512,128], index: 5, kind: input, shape index: {}]   ;;  %s7790_s6 = inlined_call_operand.vmem [shape: f32[1,128], index: 6, kind: input, shape index: {}]   ;;  %s7791_s7 = inlined_call_operand.vmem [shape: f32[256,128], index: 7, kind: output, shape index: {}]  }
   0x1   :  { %13 = vsyncpa [#allocation7], 0  ;;  %s6385_s24 = smov [#allocation4]   ;;  %s6337_s28 = scalar_lea.hbm %s7787_s3, 16384 }
   0x2   :  { %s25_s25 = sshll.u32 %s6385_s24, 4  ;;  %p6338_p0 = scmp.ne.s32.totalorder %s7787_s3, %s6337_s28  ;;  %s26_s25 = int_to_ptr.vmem [resolvable:$true] %s25_s25 }
   0x3   :  { %p6341_p1 = scmp.lt.u32.totalorder %s6337_s28, %s7787_s3 }
   0x5   :  { %p6343_p2 = pnand %p6341_p1, %p6338_p0 }
   0x7   :  { %6346 = shalt.err (!%p6343_p2)
}
   0x8   :  { %s6347_s10 = scalar_lea.vmem %s26_s25, 16384  ;;  %p6352_p4 = scmp.lt.s32.totalorder %s26_s25, %s26_s25 }
   0x9   :  { %p6348_p3 = scmp.ne.s32.totalorder %s26_s25, %s6347_s10  ;;  %p6353_p5 = scmp.lt.s32.totalorder %s6347_s10, %s6347_s10 }
   0xb   :  { %p6354_p6 = por %p6353_p5, %p6352_p4 }
   0xd   :  { %p6355_p7 = pnand %p6354_p6, %p6348_p3 }
   0xf   :  { %6358 = shalt.err (!%p6355_p7)
}
  0x10   :  { %s6386_s11 = smov 256   ;;  %s6387_s12 = smov 16  }
  0x11   :  { %31 = dma.hbm_to_vmem [thread:$0]  %s7787_s3, 16384, %s26_s25, [#allocation5], %s6386_s11, %s6386_s11, %s6387_s12  }
  0x12   :  { %s6388_s15 = smov [#allocation6]   ;;  %s6359_s19 = scalar_lea.hbm %s7789_s5, 4096 }
  0x13   :  { %s39_s16 = sshll.u32 %s6388_s15, 4  ;;  %p6360_p8 = scmp.ne.s32.totalorder %s7789_s5, %s6359_s19  ;;  %s40_s16 = int_to_ptr.vmem [resolvable:$true] %s39_s16 }
  0x14   :  { %p6363_p9 = scmp.lt.u32.totalorder %s6359_s19, %s7789_s5 }
  0x16   :  { %p6365_p10 = pnand %p6363_p9, %p6360_p8 }
  0x18   :  { %6368 = shalt.err (!%p6365_p10)
}
  0x19   :  { %s6369_s24 = scalar_lea.vmem %s40_s16, 4096  ;;  %p6374_p12 = scmp.lt.s32.totalorder %s40_s16, %s40_s16 }
  0x1a   :  { %p6370_p11 = scmp.ne.s32.totalorder %s40_s16, %s6369_s24  ;;  %p6375_p13 = scmp.lt.s32.totalorder %s6369_s24, %s6369_s24 }
  0x1c   :  { %p6376_p0 = por %p6375_p13, %p6374_p12 }
  0x1e   :  { %p6377_p1 = pnand %p6376_p0, %p6370_p11 }
  0x20   :  { %6380 = shalt.err (!%p6377_p1)
}
  0x21   :  { %s6389_s3 = smov 64   ;;  %s6390_s25 = smov 4  }
  0x22   :  { %45 = dma.hbm_to_vmem [thread:$0]  %s7789_s5, 4096, %s40_s16, [#allocation7], %s6389_s3, %s6389_s3, %s6390_s25  }
  0x23   :  { %6381 = dma.done.wait [#allocation5], 16384  }
  0x24   :  { %6382 = vsyncadd [#allocation5], 4294950912 }
  0x25   :  { %6383 = dma.done.wait [#allocation7], 4096  }
  0x26   :  { %6384 = vsyncadd [#allocation7], 4294963200  ;;  %v5921_v0 = vld [vmem:[%s7785_s1 + $0x4] ss:$16 sps:$4 sm:$0xff]   ;;  %v5923_v1 = vld [vmem:[%s7785_s1 + $0xc] ss:$16 sps:$4 sm:$0xff]  }
  0x27   :  { %1037 = vmatprep.subr.bf16.mxu0 %v5921_v0  ;;  %v5925_v2 = vld [vmem:[%s7785_s1] ss:$16 sps:$4 sm:$0xff]   ;;  %v5926_v3 = vld [vmem:[%s7785_s1 + $0x8] ss:$16 sps:$4 sm:$0xff]   ;;  %1423 = vmatprep.subr.bf16.mxu1 %v5923_v1  ;;  %v5927_v4 = vld [vmem:[%s7785_s1 + $0x24] ss:$16 sps:$4 sm:$0xff]  }
  0x28   :  { %1038 = vmatpush1.bf16.msra.mxu0 %v5925_v2  ;;  %1424 = vmatpush1.bf16.msra.mxu1 %v5926_v3  ;;  %v5929_v5 = vld [vmem:[%s7785_s1 + $0x2c] ss:$16 sps:$4 sm:$0xff]   ;;  %v5931_v6 = vld [vmem:[%s7785_s1 + $0x20] ss:$16 sps:$4 sm:$0xff]   ;;  %v5932_v7 = vld [vmem:[%s7785_s1 + $0x28] ss:$16 sps:$4 sm:$0xff]  }
  0x29   :  { %1039 = vmatprep.subr.bf16.mxu0 %v5927_v4  ;;  %1425 = vmatprep.subr.bf16.mxu1 %v5929_v5  ;;  %v5933_v8 = vld [vmem:[%s7785_s1 + $0x44] ss:$16 sps:$4 sm:$0xff]   ;;  %v5935_v9 = vld [vmem:[%s7785_s1 + $0x4c] ss:$16 sps:$4 sm:$0xff]   ;;  %v5937_v10 = vld [vmem:[%s7785_s1 + $0x40] ss:$16 sps:$4 sm:$0xff]  }
  0x2a   :  { %v5938_v11 = vld [vmem:[%s7785_s1 + $0x48] ss:$16 sps:$4 sm:$0xff]   ;;  %v5939_v12 = vld [vmem:[%s7785_s1 + $0x64] ss:$16 sps:$4 sm:$0xff]   ;;  %v5941_v13 = vld [vmem:[%s7785_s1 + $0x6c] ss:$16 sps:$4 sm:$0xff]  }
  0x2b   :  { %v5943_v14 = vld [vmem:[%s7785_s1 + $0x60] ss:$16 sps:$4 sm:$0xff]   ;;  %v5944_v15 = vld [vmem:[%s7785_s1 + $0x68] ss:$16 sps:$4 sm:$0xff]   ;;  %v5945_v16 = vld [vmem:[%s7785_s1 + $0x84] ss:$16 sps:$4 sm:$0xff]  }
  0x2c   :  { %1040 = vmatpush1.bf16.msra.mxu0 %v5931_v6  ;;  %1426 = vmatpush1.bf16.msra.mxu1 %v5932_v7  ;;  %v5947_v17 = vld [vmem:[%s7785_s1 + $0x8c] ss:$16 sps:$4 sm:$0xff]   ;;  %v5949_v18 = vld [vmem:[%s7785_s1 + $0x80] ss:$16 sps:$4 sm:$0xff]   ;;  %v5950_v19 = vld [vmem:[%s7785_s1 + $0x88] ss:$16 sps:$4 sm:$0xff]  }
  0x2d   :  { %1041 = vmatprep.subr.bf16.mxu0 %v5933_v8  ;;  %1427 = vmatprep.subr.bf16.mxu1 %v5935_v9  ;;  %v5951_v20 = vld [vmem:[%s7785_s1 + $0xa4] ss:$16 sps:$4 sm:$0xff]   ;;  %v5953_v21 = vld [vmem:[%s7785_s1 + $0xac] ss:$16 sps:$4 sm:$0xff]   ;;  %v5955_v22 = vld [vmem:[%s7785_s1 + $0xa0] ss:$16 sps:$4 sm:$0xff]  }
  0x2e   :  { %v5956_v23 = vld [vmem:[%s7785_s1 + $0xa8] ss:$16 sps:$4 sm:$0xff]   ;;  %v5957_v24 = vld [vmem:[%s7785_s1 + $0xc4] ss:$16 sps:$4 sm:$0xff]   ;;  %v5959_v25 = vld [vmem:[%s7785_s1 + $0xcc] ss:$16 sps:$4 sm:$0xff]  }
  0x2f   :  { %v5961_v26 = vld [vmem:[%s7785_s1 + $0xc0] ss:$16 sps:$4 sm:$0xff]   ;;  %v5962_v27 = vld [vmem:[%s7785_s1 + $0xc8] ss:$16 sps:$4 sm:$0xff]   ;;  %v5963_v28 = vld [vmem:[%s7785_s1 + $0xe4] ss:$16 sps:$4 sm:$0xff]  }
  0x30   :  { %1042 = vmatpush1.bf16.msra.mxu0 %v5937_v10  ;;  %1428 = vmatpush1.bf16.msra.mxu1 %v5938_v11  ;;  %v5965_v29 = vld [vmem:[%s7785_s1 + $0xec] ss:$16 sps:$4 sm:$0xff]   ;;  %v5967_v30 = vld [vmem:[%s7785_s1 + $0xe0] ss:$16 sps:$4 sm:$0xff]   ;;  %v5968_v31 = vld [vmem:[%s7785_s1 + $0xe8] ss:$16 sps:$4 sm:$0xff]  }
  0x31   :  { %1043 = vmatprep.subr.bf16.mxu0 %v5939_v12  ;;  %1429 = vmatprep.subr.bf16.mxu1 %v5941_v13  ;;  %v5969_v32 = vld [vmem:[%s7785_s1 + $0x104] ss:$16 sps:$4 sm:$0xff]   ;;  %v5971_v33 = vld [vmem:[%s7785_s1 + $0x10c] ss:$16 sps:$4 sm:$0xff]   ;;  %v5973_v34 = vld [vmem:[%s7785_s1 + $0x100] ss:$16 sps:$4 sm:$0xff]  }
  0x32   :  { %v5974_v35 = vld [vmem:[%s7785_s1 + $0x108] ss:$16 sps:$4 sm:$0xff]   ;;  %v5975_v36 = vld [vmem:[%s7785_s1 + $0x124] ss:$16 sps:$4 sm:$0xff]   ;;  %v5977_v37 = vld [vmem:[%s7785_s1 + $0x12c] ss:$16 sps:$4 sm:$0xff]  }
  0x33   :  { %v5979_v38 = vld [vmem:[%s7785_s1 + $0x120] ss:$16 sps:$4 sm:$0xff]   ;;  %v5980_v39 = vld [vmem:[%s7785_s1 + $0x128] ss:$16 sps:$4 sm:$0xff]   ;;  %v5981_v40 = vld [vmem:[%s7785_s1 + $0x144] ss:$16 sps:$4 sm:$0xff]  }
  0x34   :  { %1044 = vmatpush1.bf16.msra.mxu0 %v5943_v14  ;;  %1430 = vmatpush1.bf16.msra.mxu1 %v5944_v15  ;;  %v5983_v41 = vld [vmem:[%s7785_s1 + $0x14c] ss:$16 sps:$4 sm:$0xff]   ;;  %v5985_v42 = vld [vmem:[%s7785_s1 + $0x140] ss:$16 sps:$4 sm:$0xff]   ;;  %v5986_v43 = vld [vmem:[%s7785_s1 + $0x148] ss:$16 sps:$4 sm:$0xff]  }
  0x35   :  { %1045 = vmatprep.subr.bf16.mxu0 %v5945_v16  ;;  %1431 = vmatprep.subr.bf16.mxu1 %v5947_v17  ;;  %v5987_v44 = vld [vmem:[%s7785_s1 + $0x164] ss:$16 sps:$4 sm:$0xff]   ;;  %v5989_v45 = vld [vmem:[%s7785_s1 + $0x16c] ss:$16 sps:$4 sm:$0xff]   ;;  %v5991_v47 = vld [vmem:[%s7785_s1 + $0x160] ss:$16 sps:$4 sm:$0xff]  }
  0x36   :  { %v56_v46 = vld [vmem:[%s7784_s0 + $0x8] sm:$0xff]  ;;  %v5993_v51 = vld [vmem:[%s7785_s1 + $0x184] ss:$16 sps:$4 sm:$0xff]   ;;  %v5997_v53 = vld [vmem:[%s7785_s1 + $0x180] ss:$16 sps:$4 sm:$0xff]  }
  0x37   :  { %v60_v48 = vld [vmem:[%s7784_s0 + $0x28] sm:$0xff]  ;;  %v5999_v55 = vld [vmem:[%s7785_s1 + $0x1a4] ss:$16 sps:$4 sm:$0xff]   ;;  %v6003_v57 = vld [vmem:[%s7785_s1 + $0x1a0] ss:$16 sps:$4 sm:$0xff]  }
  0x38   :  { %1046 = vmatpush1.bf16.msra.mxu0 %v5949_v18  ;;  %1432 = vmatpush1.bf16.msra.mxu1 %v5950_v19  ;;  %v5992_v49 = vld [vmem:[%s7785_s1 + $0x168] ss:$16 sps:$4 sm:$0xff]   ;;  %v184_v50 = vpack.c.bf16 %v60_v48, %v56_v46  ;;  %v5995_v52 = vld [vmem:[%s7785_s1 + $0x18c] ss:$16 sps:$4 sm:$0xff]   ;;  %v6005_v59 = vld [vmem:[%s7785_s1 + $0x1c4] ss:$16 sps:$4 sm:$0xff]  }
  0x39   :  { %1047 = vmatprep.subr.bf16.mxu0 %v5951_v20  ;;  %1433 = vmatprep.subr.bf16.mxu1 %v5953_v21  ;;  %v5998_v54 = vld [vmem:[%s7785_s1 + $0x188] ss:$16 sps:$4 sm:$0xff]   ;;  %v6001_v56 = vld [vmem:[%s7785_s1 + $0x1ac] ss:$16 sps:$4 sm:$0xff]   ;;  %v6009_v61 = vld [vmem:[%s7785_s1 + $0x1c0] ss:$16 sps:$4 sm:$0xff]  }
  0x3a   :  { %1069 = vmatprep.mubr.bf16.mxu0 %v184_v50  ;;  %1455 = vmatprep.mubr.bf16.mxu1 %v184_v50  ;;  %v6004_v58 = vld [vmem:[%s7785_s1 + $0x1a8] ss:$16 sps:$4 sm:$0xff]   ;;  %v6007_v60 = vld [vmem:[%s7785_s1 + $0x1cc] ss:$16 sps:$4 sm:$0xff]   ;;  %v6011_v63 = vld [vmem:[%s7785_s1 + $0x1e4] ss:$16 sps:$4 sm:$0xff]  }
  0x3b   :  { %v6010_v62 = vld [vmem:[%s7785_s1 + $0x1c8] ss:$16 sps:$4 sm:$0xff]   ;;  %v6013_v0 = vld [vmem:[%s7785_s1 + $0x1ec] ss:$16 sps:$4 sm:$0xff]   ;;  %v6015_v1 = vld [vmem:[%s7785_s1 + $0x1e0] ss:$16 sps:$4 sm:$0xff]  }
  0x3c   :  { %1048 = vmatpush1.bf16.msra.mxu0 %v5955_v22  ;;  %1434 = vmatpush1.bf16.msra.mxu1 %v5956_v23  ;;  %v6016_v2 = vld [vmem:[%s7785_s1 + $0x1e8] ss:$16 sps:$4 sm:$0xff]   ;;  %v55_v3 = vld [vmem:[%s7784_s0] sm:$0xff]  ;;  %v6046_v16 = vld [vmem:[%s7785_s1 + $0x20c] ss:$16 sps:$4 sm:$0xff]  }
  0x3d   :  { %1049 = vmatprep.subr.bf16.mxu0 %v5957_v24  ;;  %1435 = vmatprep.subr.bf16.mxu1 %v5959_v25  ;;  %v59_v4 = vld [vmem:[%s7784_s0 + $0x20] sm:$0xff]  ;;  %v64_v6 = vld [vmem:[%s7784_s0 + $0x48] sm:$0xff] }
  0x3e   :  { %v6019_v5 = vld [vmem:[%s7785_s1 + $0x204] ss:$16 sps:$4 sm:$0xff]   ;;  %v68_v7 = vld [vmem:[%s7784_s0 + $0x68] sm:$0xff]  ;;  %v183_v8 = vpack.c.bf16 %v59_v4, %v55_v3  ;;  %v6017_v9 = vld [vmem:[%s7785_s1 + $0x200] ss:$16 sps:$4 sm:$0xff]  }
  0x3f   :  { %v188_v10 = vpack.c.bf16 %v68_v7, %v64_v6  ;;  %v6022_v11 = vld [vmem:[%s7785_s1 + $0x224] ss:$16 sps:$4 sm:$0xff]   ;;  %v6020_v14 = vld [vmem:[%s7785_s1 + $0x220] ss:$16 sps:$4 sm:$0xff]   ;;  %v6044_v15 = vld [vmem:[%s7785_s1 + $0x208] ss:$16 sps:$4 sm:$0xff]  }
  0x40   :  { %1050 = vmatpush1.bf16.msra.mxu0 %v5961_v26  ;;  %1436 = vmatpush1.bf16.msra.mxu1 %v5962_v27  ;;  %v63_v12 = vld [vmem:[%s7784_s0 + $0x40] sm:$0xff]  ;;  %v72_v17 = vld [vmem:[%s7784_s0 + $0x88] sm:$0xff] }
  0x41   :  { %1051 = vmatprep.subr.bf16.mxu0 %v5963_v28  ;;  %1437 = vmatprep.subr.bf16.mxu1 %v5965_v29  ;;  %v67_v13 = vld [vmem:[%s7784_s0 + $0x60] sm:$0xff]  ;;  %v76_v18 = vld [vmem:[%s7784_s0 + $0xa8] sm:$0xff] }
  0x42   :  { %v6025_v19 = vld [vmem:[%s7785_s1 + $0x244] ss:$16 sps:$4 sm:$0xff]   ;;  %v6049_v20 = vld [vmem:[%s7785_s1 + $0x22c] ss:$16 sps:$4 sm:$0xff]   ;;  %v187_v21 = vpack.c.bf16 %v67_v13, %v63_v12  ;;  %v192_v22 = vpack.c.bf16 %v76_v18, %v72_v17  ;;  %v6023_v23 = vld [vmem:[%s7785_s1 + $0x240] ss:$16 sps:$4 sm:$0xff]  }
  0x43   :  { %v6047_v24 = vld [vmem:[%s7785_s1 + $0x228] ss:$16 sps:$4 sm:$0xff]   ;;  %v71_v25 = vld [vmem:[%s7784_s0 + $0x80] sm:$0xff]  ;;  %v6055_v27 = vld [vmem:[%s7785_s1 + $0x24c] ss:$16 sps:$4 sm:$0xff]  }
  0x44   :  { %1052 = vmatpush1.bf16.msra.mxu0 %v5967_v30  ;;  %1438 = vmatpush1.bf16.msra.mxu1 %v5968_v31  ;;  %v6028_v26 = vld [vmem:[%s7785_s1 + $0x264] ss:$16 sps:$4 sm:$0xff]   ;;  %v80_v29 = vld [vmem:[%s7784_s0 + $0xc8] sm:$0xff]  ;;  %v6026_v31 = vld [vmem:[%s7785_s1 + $0x260] ss:$16 sps:$4 sm:$0xff]  }
  0x45   :  { %1053 = vmatprep.subr.bf16.mxu0 %v5969_v32  ;;  %1439 = vmatprep.subr.bf16.mxu1 %v5971_v33  ;;  %v75_v28 = vld [vmem:[%s7784_s0 + $0xa0] sm:$0xff]  ;;  %v84_v30 = vld [vmem:[%s7784_s0 + $0xe8] sm:$0xff] }
  0x46   :  { %v6053_v32 = vld [vmem:[%s7785_s1 + $0x248] ss:$16 sps:$4 sm:$0xff]   ;;  %v6031_v33 = vld [vmem:[%s7785_s1 + $0x284] ss:$16 sps:$4 sm:$0xff]   ;;  %v6067_v48 = vld [vmem:[%s7785_s1 + $0x2ac] ss:$16 sps:$4 sm:$0xff]  }
  0x47   :  { %v6062_v46 = vld [vmem:[%s7785_s1 + $0x288] ss:$16 sps:$4 sm:$0xff]   ;;  %v6052_v3 = vld [vmem:[%s7785_s1 + $0x324] ss:$16 sps:$4 sm:$0xff]   ;;  %v6082_v4 = vld [vmem:[%s7785_s1 + $0x30c] ss:$16 sps:$4 sm:$0xff]  }
  0x48   :  { %1054 = vmatpush1.bf16.msra.mxu0 %v5973_v34  ;;  %1440 = vmatpush1.bf16.msra.mxu1 %v5974_v35  ;;  %v6058_v34 = vld [vmem:[%s7785_s1 + $0x26c] ss:$16 sps:$4 sm:$0xff]   ;;  %v191_v35 = vpack.c.bf16 %v75_v28, %v71_v25  ;;  %v99_v6 = vld [vmem:[%s7784_s0 + $0x160] sm:$0xff] }
  0x49   :  { %1055 = vmatprep.subr.bf16.mxu0 %v5975_v36  ;;  %1441 = vmatprep.subr.bf16.mxu1 %v5977_v37  ;;  %v196_v36 = vpack.c.bf16 %v84_v30, %v80_v29  ;;  %v6029_v37 = vld [vmem:[%s7785_s1 + $0x280] ss:$16 sps:$4 sm:$0xff]   ;;  %v104_v7 = vld [vmem:[%s7784_s0 + $0x188] sm:$0xff]  ;;  %v6070_v17 = vld [vmem:[%s7785_s1 + $0x364] ss:$16 sps:$4 sm:$0xff]  }
  0x4a   :  { %v6085_v12 = vld [vmem:[%s7785_s1 + $0x32c] ss:$16 sps:$4 sm:$0xff]   ;;  %v6079_v25 = vld [vmem:[%s7785_s1 + $0x384] ss:$16 sps:$4 sm:$0xff]   ;;  %v6077_v29 = vld [vmem:[%s7785_s1 + $0x380] ss:$16 sps:$4 sm:$0xff]  }
  0x4b   :  { %v6091_v18 = vld [vmem:[%s7785_s1 + $0x34c] ss:$16 sps:$4 sm:$0xff]   ;;  %v6092_v30 = vld [vmem:[%s7785_s1 + $0x368] ss:$16 sps:$4 sm:$0xff]  }
  0x4c   :  { %1056 = vmatpush1.bf16.msra.mxu0 %v5979_v38  ;;  %1442 = vmatpush1.bf16.msra.mxu1 %v5980_v39  ;;  %v6056_v38 = vld [vmem:[%s7785_s1 + $0x268] ss:$16 sps:$4 sm:$0xff]   ;;  %v6034_v39 = vld [vmem:[%s7785_s1 + $0x2a4] ss:$16 sps:$4 sm:$0xff]  }
  0x4d   :  { %1057 = vmatprep.subr.bf16.mxu0 %v5981_v40  ;;  %1443 = vmatprep.subr.bf16.mxu1 %v5983_v41  ;;  %v6064_v40 = vld [vmem:[%s7785_s1 + $0x28c] ss:$16 sps:$4 sm:$0xff]   ;;  %v79_v41 = vld [vmem:[%s7784_s0 + $0xc0] sm:$0xff] }
  0x50   :  { %1058 = vmatpush1.bf16.msra.mxu0 %v5985_v42  ;;  %1444 = vmatpush1.bf16.msra.mxu1 %v5986_v43  ;;  %v83_v42 = vld [vmem:[%s7784_s0 + $0xe0] sm:$0xff]  ;;  %v88_v43 = vld [vmem:[%s7784_s0 + $0x108] sm:$0xff] }
  0x51   :  { %1059 = vmatprep.subr.bf16.mxu0 %v5987_v44  ;;  %1445 = vmatprep.subr.bf16.mxu1 %v5989_v45  ;;  %v92_v44 = vld [vmem:[%s7784_s0 + $0x128] sm:$0xff]  ;;  %v6032_v45 = vld [vmem:[%s7785_s1 + $0x2a0] ss:$16 sps:$4 sm:$0xff]  }
  0x52   :  { %v200_v50 = vpack.c.bf16 %v92_v44, %v88_v43  ;;  %v6101_v43 = vld [vmem:[%s7785_s1 + $0x3a8] ss:$16 sps:$4 sm:$0xff]  }
  0x54   :  { %1060 = vmatpush1.bf16.msra.mxu0 %v5991_v47  ;;  %1446 = vmatpush1.bf16.msra.mxu1 %v5992_v49  ;;  %v6037_v47 = vld [vmem:[%s7785_s1 + $0x2c4] ss:$16 sps:$4 sm:$0xff]   ;;  %v195_v49 = vpack.c.bf16 %v83_v42, %v79_v41  ;;  %v6095_v42 = vld [vmem:[%s7785_s1 + $0x3c0] ss:$16 sps:$4 sm:$0xff]  }
  0x55   :  { %1061 = vmatprep.subr.bf16.mxu0 %v5993_v51  ;;  %1447 = vmatprep.subr.bf16.mxu1 %v5995_v52  ;;  %v6035_v51 = vld [vmem:[%s7785_s1 + $0x2c0] ss:$16 sps:$4 sm:$0xff]   ;;  %v6065_v52 = vld [vmem:[%s7785_s1 + $0x2a8] ss:$16 sps:$4 sm:$0xff]  }
  0x58   :  { %1062 = vmatpush1.bf16.msra.mxu0 %v5997_v53  ;;  %1448 = vmatpush1.bf16.msra.mxu1 %v5998_v54  ;;  %v87_v53 = vld [vmem:[%s7784_s0 + $0x100] sm:$0xff] }
  0x59   :  { %1063 = vmatprep.subr.bf16.mxu0 %v5999_v55  ;;  %1449 = vmatprep.subr.bf16.mxu1 %v6001_v56  ;;  %v6040_v54 = vld [vmem:[%s7785_s1 + $0x2e4] ss:$16 sps:$4 sm:$0xff]   ;;  %v6073_v55 = vld [vmem:[%s7785_s1 + $0x2cc] ss:$16 sps:$4 sm:$0xff]  }
  0x5a   :  { %v91_v56 = vld [vmem:[%s7784_s0 + $0x120] sm:$0xff] }
  0x5c   :  { %1064 = vmatpush1.bf16.msra.mxu0 %v6003_v57  ;;  %1450 = vmatpush1.bf16.msra.mxu1 %v6004_v58  ;;  %v96_v57 = vld [vmem:[%s7784_s0 + $0x148] sm:$0xff] }
  0x5d   :  { %1065 = vmatprep.subr.bf16.mxu0 %v6005_v59  ;;  %1451 = vmatprep.subr.bf16.mxu1 %v6007_v60  ;;  %v100_v58 = vld [vmem:[%s7784_s0 + $0x168] sm:$0xff]  ;;  %v6038_v59 = vld [vmem:[%s7785_s1 + $0x2e0] ss:$16 sps:$4 sm:$0xff]  }
  0x5e   :  { %v6071_v60 = vld [vmem:[%s7785_s1 + $0x2c8] ss:$16 sps:$4 sm:$0xff]  }
  0x60   :  { %1066 = vmatpush1.bf16.msra.mxu0 %v6009_v61  ;;  %1452 = vmatpush1.bf16.msra.mxu1 %v6010_v62  ;;  %v6043_v61 = vld [vmem:[%s7785_s1 + $0x304] ss:$16 sps:$4 sm:$0xff]   ;;  %v6076_v62 = vld [vmem:[%s7785_s1 + $0x2ec] ss:$16 sps:$4 sm:$0xff]  }
  0x61   :  { %1067 = vmatprep.subr.bf16.mxu0 %v6011_v63  ;;  %1453 = vmatprep.subr.bf16.mxu1 %v6013_v0  ;;  %v199_v63 = vpack.c.bf16 %v91_v56, %v87_v53  ;;  %v204_v0 = vpack.c.bf16 %v100_v58, %v96_v57  ;;  %v6112_v53 = vld [vmem:[%s7785_s1 + $0x3ec] ss:$16 sps:$4 sm:$0xff]   ;;  %v127_v57 = vld [vmem:[%s7784_s0 + $0x240] sm:$0xff] }
  0x62   :  { %v131_v58 = vld [vmem:[%s7784_s0 + $0x260] sm:$0xff] }
  0x64   :  { %1068 = vmatpush1.bf16.msra.mxu0 %v6015_v1  ;;  %1454 = vmatpush1.bf16.msra.mxu1 %v6016_v2  ;;  %v6041_v1 = vld [vmem:[%s7785_s1 + $0x300] ss:$16 sps:$4 sm:$0xff]   ;;  %v6074_v2 = vld [vmem:[%s7785_s1 + $0x2e8] ss:$16 sps:$4 sm:$0xff]  }
  0x65   :  { %1230 = vmatprep.subr.bf16.mxu0 %v6019_v5  ;;  %1616 = vmatprep.subr.bf16.mxu1 %v6046_v16  ;;  %v95_v5 = vld [vmem:[%s7784_s0 + $0x140] sm:$0xff]  ;;  %v6083_v16 = vld [vmem:[%s7785_s1 + $0x328] ss:$16 sps:$4 sm:$0xff]  }
  0x66   :  { %v203_v13 = vpack.c.bf16 %v99_v6, %v95_v5  ;;  %v143_v5 = vld [vmem:[%s7784_s0 + $0x2c0] sm:$0xff] }
  0x67   :  { %1070 = vmatmul.mubr.bf16.vlgmr.msra.gmra.mrb[0].mxu0 %v183_v8  ;;  %1456 = vmatmul.mubr.bf16.vlgmr.msra.gmra.mrb[0].mxu1 %v183_v8  ;;  %v108_v8 = vld [vmem:[%s7784_s0 + $0x1a8] sm:$0xff]  ;;  %v147_v6 = vld [vmem:[%s7784_s0 + $0x2e0] sm:$0xff] }
  0x68   :  { %1231 = vmatpush1.bf16.msra.mxu0 %v6017_v9  ;;  %1079 = vmatprep.mubr.bf16.mxu0 %v188_v10  ;;  %v6050_v9 = vld [vmem:[%s7785_s1 + $0x320] ss:$16 sps:$4 sm:$0xff]  }
  0x69   :  { %1465 = vmatprep.mubr.bf16.mxu1 %v188_v10  ;;  %1232 = vmatprep.subr.bf16.mxu0 %v6022_v11  ;;  %v6080_v10 = vld [vmem:[%s7785_s1 + $0x308] ss:$16 sps:$4 sm:$0xff]   ;;  %v6061_v11 = vld [vmem:[%s7785_s1 + $0x344] ss:$16 sps:$4 sm:$0xff]  }
  0x6a   :  { %1617 = vmatpush1.bf16.msra.mxu1 %v6044_v15  ;;  %v6059_v15 = vld [vmem:[%s7785_s1 + $0x340] ss:$16 sps:$4 sm:$0xff]  }
  0x6b   :  { %1618 = vmatprep.subr.bf16.mxu1 %v6049_v20  ;;  %v107_v20 = vld [vmem:[%s7784_s0 + $0x1a0] sm:$0xff] }
  0x6c   :  { %1233 = vmatpush1.bf16.msra.mxu0 %v6020_v14  ;;  %v208_v14 = vpack.c.bf16 %v108_v8, %v104_v7  ;;  %v152_v7 = vld [vmem:[%s7784_s0 + $0x308] sm:$0xff] }
  0x6d   :  { %1234 = vmatprep.subr.bf16.mxu0 %v6025_v19  ;;  %v103_v19 = vld [vmem:[%s7784_s0 + $0x180] sm:$0xff]  ;;  %v156_v8 = vld [vmem:[%s7784_s0 + $0x328] sm:$0xff] }
  0x6e   :  { %1619 = vmatpush1.bf16.msra.mxu1 %v6047_v24  ;;  %v6089_v24 = vld [vmem:[%s7785_s1 + $0x348] ss:$16 sps:$4 sm:$0xff]  }
  0x6f   :  { %1080 = vmatmul.mubr.bf16.gmra.mrb[4].mxu0 %v187_v21  ;;  %1466 = vmatmul.mubr.bf16.gmra.mrb[4].mxu1 %v187_v21  ;;  %v112_v21 = vld [vmem:[%s7784_s0 + $0x1c8] sm:$0xff] }
  0x70   :  { %1089 = vmatprep.mubr.bf16.mxu0 %v192_v22  ;;  %1475 = vmatprep.mubr.bf16.mxu1 %v192_v22  ;;  %v116_v22 = vld [vmem:[%s7784_s0 + $0x1e8] sm:$0xff] }
  0x71   :  { %1235 = vmatpush1.bf16.msra.mxu0 %v6023_v23  ;;  %1620 = vmatprep.subr.bf16.mxu1 %v6055_v27  ;;  %v6068_v23 = vld [vmem:[%s7785_s1 + $0x360] ss:$16 sps:$4 sm:$0xff]   ;;  %v207_v27 = vpack.c.bf16 %v107_v20, %v103_v19  ;;  %v212_v28 = vpack.c.bf16 %v116_v22, %v112_v21  ;;  %v168_v21 = vld [vmem:[%s7784_s0 + $0x388] sm:$0xff] }
  0x72   :  { %1236 = vmatprep.subr.bf16.mxu0 %v6028_v26  ;;  %1621 = vmatpush1.bf16.msra.mxu1 %v6053_v32  ;;  %v6094_v26 = vld [vmem:[%s7785_s1 + $0x36c] ss:$16 sps:$4 sm:$0xff]   ;;  %v6088_v32 = vld [vmem:[%s7785_s1 + $0x3a4] ss:$16 sps:$4 sm:$0xff]  }
  0x73   :  { %1622 = vmatprep.subr.bf16.mxu1 %v6058_v34  ;;  %v115_v34 = vld [vmem:[%s7784_s0 + $0x1e0] sm:$0xff]  ;;  %v172_v22 = vld [vmem:[%s7784_s0 + $0x3a8] sm:$0xff] }
  0x74   :  { %v159_v19 = vld [vmem:[%s7784_s0 + $0x340] sm:$0xff] }
  0x75   :  { %1237 = vmatpush1.bf16.msra.mxu0 %v6026_v31  ;;  %v111_v31 = vld [vmem:[%s7784_s0 + $0x1c0] sm:$0xff] }
  0x76   :  { %1238 = vmatprep.subr.bf16.mxu0 %v6031_v33  ;;  %1623 = vmatpush1.bf16.msra.mxu1 %v6056_v38  ;;  %v6100_v33 = vld [vmem:[%s7785_s1 + $0x38c] ss:$16 sps:$4 sm:$0xff]   ;;  %v6097_v38 = vld [vmem:[%s7785_s1 + $0x3c4] ss:$16 sps:$4 sm:$0xff]   ;;  %v211_v41 = vpack.c.bf16 %v115_v34, %v111_v31 }
  0x77   :  { %1090 = vmatmul.mubr.bf16.gmra.mrb[8].mxu0 %v191_v35  ;;  %1476 = vmatmul.mubr.bf16.gmra.mrb[8].mxu1 %v191_v35  ;;  %v120_v35 = vld [vmem:[%s7784_s0 + $0x208] sm:$0xff]  ;;  %v163_v20 = vld [vmem:[%s7784_s0 + $0x360] sm:$0xff]  ;;  %v62_v34 = vld [vmem:[%s7784_s0 + $0x38] sm:$0xff] }
  0x78   :  { %1099 = vmatprep.mubr.bf16.mxu0 %v196_v36  ;;  %1485 = vmatprep.mubr.bf16.mxu1 %v196_v36  ;;  %v124_v36 = vld [vmem:[%s7784_s0 + $0x228] sm:$0xff]  ;;  %v175_v31 = vld [vmem:[%s7784_s0 + $0x3c0] sm:$0xff] }
  0x79   :  { %1239 = vmatpush1.bf16.msra.mxu0 %v6029_v37  ;;  %1624 = vmatprep.subr.bf16.mxu1 %v6064_v40  ;;  %v6086_v37 = vld [vmem:[%s7785_s1 + $0x3a0] ss:$16 sps:$4 sm:$0xff]   ;;  %v6103_v40 = vld [vmem:[%s7785_s1 + $0x3ac] ss:$16 sps:$4 sm:$0xff]   ;;  %v216_v44 = vpack.c.bf16 %v124_v36, %v120_v35 }
  0x7a   :  { %1240 = vmatprep.subr.bf16.mxu0 %v6034_v39  ;;  %1625 = vmatpush1.bf16.msra.mxu1 %v6062_v46  ;;  %v6098_v39 = vld [vmem:[%s7785_s1 + $0x388] ss:$16 sps:$4 sm:$0xff]   ;;  %v6109_v46 = vld [vmem:[%s7785_s1 + $0x3cc] ss:$16 sps:$4 sm:$0xff]  }
  0x7b   :  { %1626 = vmatprep.subr.bf16.mxu1 %v6067_v48  ;;  %v123_v48 = vld [vmem:[%s7784_s0 + $0x220] sm:$0xff] }
  0x7d   :  { %1241 = vmatpush1.bf16.msra.mxu0 %v6032_v45  ;;  %v6106_v45 = vld [vmem:[%s7785_s1 + $0x3e4] ss:$16 sps:$4 sm:$0xff]  }
  0x7e   :  { %1242 = vmatprep.subr.bf16.mxu0 %v6037_v47  ;;  %1627 = vmatpush1.bf16.msra.mxu1 %v6065_v52  ;;  %v119_v47 = vld [vmem:[%s7784_s0 + $0x200] sm:$0xff]  ;;  %v6107_v52 = vld [vmem:[%s7785_s1 + $0x3c8] ss:$16 sps:$4 sm:$0xff]  }
  0x7f   :  { %1100 = vmatmul.mubr.bf16.gmra.mrb[12].mxu0 %v195_v49  ;;  %1486 = vmatmul.mubr.bf16.gmra.mrb[12].mxu1 %v195_v49  ;;  %v128_v49 = vld [vmem:[%s7784_s0 + $0x248] sm:$0xff] }
  0x80   :  { %1109 = vmatprep.mubr.bf16.mxu0 %v200_v50  ;;  %1495 = vmatprep.mubr.bf16.mxu1 %v200_v50  ;;  %v132_v50 = vld [vmem:[%s7784_s0 + $0x268] sm:$0xff] }
  0x81   :  { %1243 = vmatpush1.bf16.msra.mxu0 %v6035_v51  ;;  %1628 = vmatprep.subr.bf16.mxu1 %v6073_v55  ;;  %v6104_v51 = vld [vmem:[%s7785_s1 + $0x3e0] ss:$16 sps:$4 sm:$0xff]   ;;  %v6110_v55 = vld [vmem:[%s7785_s1 + $0x3e8] ss:$16 sps:$4 sm:$0xff]   ;;  %v220_v56 = vpack.c.bf16 %v132_v50, %v128_v49 }
  0x82   :  { %1244 = vmatprep.subr.bf16.mxu0 %v6040_v54  ;;  %1629 = vmatpush1.bf16.msra.mxu1 %v6071_v60  ;;  %v215_v54 = vpack.c.bf16 %v123_v48, %v119_v47  ;;  %v140_v60 = vld [vmem:[%s7784_s0 + $0x2a8] sm:$0xff]  ;;  %v65_v47 = vld [vmem:[%s7784_s0 + $0x50] sm:$0xff]  ;;  %v74_v49 = vld [vmem:[%s7784_s0 + $0x98] sm:$0xff] }
  0x83   :  { %1630 = vmatprep.subr.bf16.mxu1 %v6076_v62  ;;  %v69_v48 = vld [vmem:[%s7784_s0 + $0x70] sm:$0xff]  ;;  %v78_v50 = vld [vmem:[%s7784_s0 + $0xb8] sm:$0xff] }
  0x85   :  { %1245 = vmatpush1.bf16.msra.mxu0 %v6038_v59  ;;  %v136_v59 = vld [vmem:[%s7784_s0 + $0x288] sm:$0xff] }
  0x86   :  { %1246 = vmatprep.subr.bf16.mxu0 %v6043_v61  ;;  %1631 = vmatpush1.bf16.msra.mxu1 %v6074_v2  ;;  %v219_v61 = vpack.c.bf16 %v131_v58, %v127_v57  ;;  %v224_v62 = vpack.c.bf16 %v140_v60, %v136_v59  ;;  %v148_v2 = vld [vmem:[%s7784_s0 + $0x2e8] sm:$0xff]  ;;  %v6125_v57 = vld [vmem:[#allocation4 + $0x40] ss:$16 sps:$4 sm:$0xff]  }
  0x87   :  { %1110 = vmatmul.mubr.bf16.gmra.mrb[16].mxu0 %v199_v63  ;;  %1496 = vmatmul.mubr.bf16.gmra.mrb[16].mxu1 %v199_v63  ;;  %v135_v63 = vld [vmem:[%s7784_s0 + $0x280] sm:$0xff]  ;;  %v6128_v58 = vld [vmem:[#allocation4 + $0x48] ss:$16 sps:$4 sm:$0xff]   ;;  %v73_v59 = vld [vmem:[%s7784_s0 + $0x90] sm:$0xff] }
  0x88   :  { %1119 = vmatprep.mubr.bf16.mxu0 %v204_v0  ;;  %1505 = vmatprep.mubr.bf16.mxu1 %v204_v0  ;;  %v139_v0 = vld [vmem:[%s7784_s0 + $0x2a0] sm:$0xff]  ;;  %v77_v60 = vld [vmem:[%s7784_s0 + $0xb0] sm:$0xff] }
  0x89   :  { %1247 = vmatpush1.bf16.msra.mxu0 %v6041_v1  ;;  %1632 = vmatprep.subr.bf16.mxu1 %v6082_v4  ;;  %v144_v1 = vld [vmem:[%s7784_s0 + $0x2c8] sm:$0xff] }
  0x8a   :  { %1248 = vmatprep.subr.bf16.mxu0 %v6052_v3  ;;  %1633 = vmatpush1.bf16.msra.mxu1 %v6080_v10  ;;  %v223_v3 = vpack.c.bf16 %v139_v0, %v135_v63  ;;  %v228_v4 = vpack.c.bf16 %v148_v2, %v144_v1  ;;  %v232_v10 = vpack.c.bf16 %v156_v8, %v152_v7  ;;  %v82_v63 = vld [vmem:[%s7784_s0 + $0xd8] sm:$0xff]  ;;  %v6131_v1 = vld [vmem:[#allocation4 + $0x60] ss:$16 sps:$4 sm:$0xff]  }
  0x8b   :  { %1634 = vmatprep.subr.bf16.mxu1 %v6085_v12  ;;  %v6115_v12 = vld [vmem:[#allocation4 + $0x4] ss:$16 sps:$4 sm:$0xff]   ;;  %v86_v0 = vld [vmem:[%s7784_s0 + $0xf8] sm:$0xff] }
  0x8c   :  { %v6134_v2 = vld [vmem:[#allocation4 + $0x68] ss:$16 sps:$4 sm:$0xff]   ;;  %v198_v8 = vpack.c.bf16 %v86_v0, %v82_v63  ;;  %v6185_v63 = vld [vmem:[#allocation4 + $0x180] ss:$16 sps:$4 sm:$0xff]  }
  0x8d   :  { %1249 = vmatpush1.bf16.msra.mxu0 %v6050_v9  ;;  %v227_v9 = vpack.c.bf16 %v147_v6, %v143_v5  ;;  %v193_v5 = vpack.c.bf16 %v77_v60, %v73_v59  ;;  %v6137_v6 = vld [vmem:[#allocation4 + $0x80] ss:$16 sps:$4 sm:$0xff]   ;;  %v6140_v7 = vld [vmem:[#allocation4 + $0x88] ss:$16 sps:$4 sm:$0xff]   ;;  %v6187_v59 = vld [vmem:[#allocation4 + $0x184] ss:$16 sps:$4 sm:$0xff]  }
  0x8e   :  { %1250 = vmatprep.subr.bf16.mxu0 %v6061_v11  ;;  %1635 = vmatpush1.bf16.msra.mxu1 %v6083_v16  ;;  %v151_v11 = vld [vmem:[%s7784_s0 + $0x300] sm:$0xff]  ;;  %v6190_v60 = vld [vmem:[#allocation4 + $0x18c] ss:$16 sps:$4 sm:$0xff]   ;;  %v6188_v0 = vld [vmem:[#allocation4 + $0x188] ss:$16 sps:$4 sm:$0xff]  }
  0x8f   :  { %1120 = vmatmul.mubr.bf16.gmra.mrb[20].mxu0 %v203_v13  ;;  %1506 = vmatmul.mubr.bf16.gmra.mrb[20].mxu1 %v203_v13  ;;  %v155_v13 = vld [vmem:[%s7784_s0 + $0x320] sm:$0xff] }
  0x90   :  { %1129 = vmatprep.mubr.bf16.mxu0 %v208_v14  ;;  %1515 = vmatprep.mubr.bf16.mxu1 %v208_v14  ;;  %v160_v14 = vld [vmem:[%s7784_s0 + $0x348] sm:$0xff]  ;;  %v231_v16 = vpack.c.bf16 %v155_v13, %v151_v11  ;;  %v81_v11 = vld [vmem:[%s7784_s0 + $0xd0] sm:$0xff]  ;;  %v90_v13 = vld [vmem:[%s7784_s0 + $0x118] sm:$0xff] }
  0x91   :  { %1251 = vmatpush1.bf16.msra.mxu0 %v6059_v15  ;;  %1636 = vmatprep.subr.bf16.mxu1 %v6091_v18  ;;  %v164_v15 = vld [vmem:[%s7784_s0 + $0x368] sm:$0xff] }
  0x92   :  { %1252 = vmatprep.subr.bf16.mxu0 %v6070_v17  ;;  %1637 = vmatpush1.bf16.msra.mxu1 %v6089_v24  ;;  %v236_v17 = vpack.c.bf16 %v164_v15, %v160_v14  ;;  %v6118_v18 = vld [vmem:[#allocation4 + $0xc] ss:$16 sps:$4 sm:$0xff]   ;;  %v240_v24 = vpack.c.bf16 %v172_v22, %v168_v21  ;;  %v6143_v15 = vld [vmem:[#allocation4 + $0xa0] ss:$16 sps:$4 sm:$0xff]   ;;  %v6152_v22 = vld [vmem:[#allocation4 + $0xc8] ss:$16 sps:$4 sm:$0xff]  }
  0x93   :  { %1638 = vmatprep.subr.bf16.mxu1 %v6094_v26  ;;  %v171_v26 = vld [vmem:[%s7784_s0 + $0x3a0] sm:$0xff]  ;;  %v94_v14 = vld [vmem:[%s7784_s0 + $0x138] sm:$0xff] }
  0x94   :  { %v6149_v21 = vld [vmem:[#allocation4 + $0xc0] ss:$16 sps:$4 sm:$0xff]  }
  0x95   :  { %1253 = vmatpush1.bf16.msra.mxu0 %v6068_v23  ;;  %v235_v23 = vpack.c.bf16 %v163_v20, %v159_v19  ;;  %v202_v20 = vpack.c.bf16 %v94_v14, %v90_v13  ;;  %v6197_v13 = vld [vmem:[#allocation4 + $0x1c0] ss:$16 sps:$4 sm:$0xff]   ;;  %v6200_v14 = vld [vmem:[#allocation4 + $0x1c8] ss:$16 sps:$4 sm:$0xff]  }
  0x96   :  { %1254 = vmatprep.subr.bf16.mxu0 %v6079_v25  ;;  %1639 = vmatpush1.bf16.msra.mxu1 %v6092_v30  ;;  %v167_v25 = vld [vmem:[%s7784_s0 + $0x380] sm:$0xff] }
  0x97   :  { %1130 = vmatmul.mubr.bf16.gmra.mrb[24].mxu0 %v207_v27  ;;  %1516 = vmatmul.mubr.bf16.gmra.mrb[24].mxu1 %v207_v27  ;;  %v176_v27 = vld [vmem:[%s7784_s0 + $0x3c8] sm:$0xff] }
  0x98   :  { %1139 = vmatprep.mubr.bf16.mxu0 %v212_v28  ;;  %1525 = vmatprep.mubr.bf16.mxu1 %v212_v28  ;;  %v180_v28 = vld [vmem:[%s7784_s0 + $0x3e8] sm:$0xff] }
  0x99   :  { %1255 = vmatpush1.bf16.msra.mxu0 %v6077_v29  ;;  %1640 = vmatprep.subr.bf16.mxu1 %v6100_v33  ;;  %v239_v29 = vpack.c.bf16 %v171_v26, %v167_v25  ;;  %v244_v30 = vpack.c.bf16 %v180_v28, %v176_v27  ;;  %v58_v33 = vld [vmem:[%s7784_s0 + $0x18] sm:$0xff]  ;;  %v89_v25 = vld [vmem:[%s7784_s0 + $0x110] sm:$0xff] }
  0x9a   :  { %1256 = vmatprep.subr.bf16.mxu0 %v6088_v32  ;;  %1641 = vmatpush1.bf16.msra.mxu1 %v6098_v39  ;;  %v179_v32 = vld [vmem:[%s7784_s0 + $0x3e0] sm:$0xff]  ;;  %v186_v36 = vpack.c.bf16 %v62_v34, %v58_v33  ;;  %v66_v39 = vld [vmem:[%s7784_s0 + $0x58] sm:$0xff]  ;;  %v93_v26 = vld [vmem:[%s7784_s0 + $0x130] sm:$0xff] }
  0x9b   :  { %1642 = vmatprep.subr.bf16.mxu1 %v6103_v40  ;;  %v243_v35 = vpack.c.bf16 %v179_v32, %v175_v31  ;;  %v70_v40 = vld [vmem:[%s7784_s0 + $0x78] sm:$0xff]  ;;  %v6163_v31 = vld [vmem:[#allocation4 + $0x104] ss:$16 sps:$4 sm:$0xff]   ;;  %v201_v33 = vpack.c.bf16 %v93_v26, %v89_v25 }
  0x9c   :  { %v98_v27 = vld [vmem:[%s7784_s0 + $0x158] sm:$0xff] }
  0x9d   :  { %1257 = vmatpush1.bf16.msra.mxu0 %v6086_v37  ;;  %v57_v37 = vld [vmem:[%s7784_s0 + $0x10] sm:$0xff]  ;;  %v102_v28 = vld [vmem:[%s7784_s0 + $0x178] sm:$0xff] }
  0x9e   :  { %1258 = vmatprep.subr.bf16.mxu0 %v6097_v38  ;;  %1643 = vmatpush1.bf16.msra.mxu1 %v6101_v43  ;;  %v61_v38 = vld [vmem:[%s7784_s0 + $0x30] sm:$0xff]  ;;  %v6166_v32 = vld [vmem:[#allocation4 + $0x10c] ss:$16 sps:$4 sm:$0xff]   ;;  %v206_v34 = vpack.c.bf16 %v102_v28, %v98_v27 }
  0x9f   :  { %1140 = vmatmul.mubr.bf16.gmra.mrb[28].mxu0 %v211_v41  ;;  %1526 = vmatmul.mubr.bf16.gmra.mrb[28].mxu1 %v211_v41  ;;  %v185_v41 = vpack.c.bf16 %v61_v38, %v57_v37  ;;  %v6113_v43 = vld [vmem:[#allocation4] ss:$16 sps:$4 sm:$0xff]   ;;  %v6169_v37 = vld [vmem:[#allocation4 + $0x124] ss:$16 sps:$4 sm:$0xff]   ;;  %v6172_v38 = vld [vmem:[#allocation4 + $0x12c] ss:$16 sps:$4 sm:$0xff]  }
  0xa0   :  { %1149 = vmatprep.mubr.bf16.mxu0 %v216_v44  ;;  %1535 = vmatprep.mubr.bf16.mxu1 %v216_v44  ;;  %v6116_v44 = vld [vmem:[#allocation4 + $0x8] ss:$16 sps:$4 sm:$0xff]   ;;  %v137_v27 = vld [vmem:[%s7784_s0 + $0x290] sm:$0xff] }
  0xa1   :  { %1259 = vmatpush1.bf16.msra.mxu0 %v6095_v42  ;;  %1644 = vmatprep.subr.bf16.mxu1 %v6109_v46  ;;  %v190_v42 = vpack.c.bf16 %v70_v40, %v66_v39  ;;  %v6124_v46 = vld [vmem:[#allocation4 + $0x2c] ss:$16 sps:$4 sm:$0xff]   ;;  %v97_v39 = vld [vmem:[%s7784_s0 + $0x150] sm:$0xff] }
  0xa2   :  { %1260 = vmatprep.subr.bf16.mxu0 %v6106_v45  ;;  %1645 = vmatpush1.bf16.msra.mxu1 %v6107_v52  ;;  %v6121_v45 = vld [vmem:[#allocation4 + $0x24] ss:$16 sps:$4 sm:$0xff]   ;;  %v6122_v52 = vld [vmem:[#allocation4 + $0x28] ss:$16 sps:$4 sm:$0xff]  }
  0xa3   :  { %1646 = vmatprep.subr.bf16.mxu1 %v6112_v53  ;;  %v6127_v53 = vld [vmem:[#allocation4 + $0x44] ss:$16 sps:$4 sm:$0xff]  }
  0xa4   :  { %v101_v40 = vld [vmem:[%s7784_s0 + $0x170] sm:$0xff] }
  0xa5   :  { %1261 = vmatpush1.bf16.msra.mxu0 %v6104_v51  ;;  %v6119_v51 = vld [vmem:[#allocation4 + $0x20] ss:$16 sps:$4 sm:$0xff]  }
  0xa6   :  { %1647 = vmatpush1.bf16.msra.mxu1 %v6110_v55  ;;  %3047 = vmatprep.subr.bf16.mxu0 %v6115_v12  ;;  %v189_v55 = vpack.c.bf16 %v69_v48, %v65_v47  ;;  %v85_v12 = vld [vmem:[%s7784_s0 + $0xf0] sm:$0xff]  ;;  %v205_v47 = vpack.c.bf16 %v101_v40, %v97_v39 }
  0xa7   :  { %1150 = vmatmul.mubr.bf16.gmra.mrb[32].mxu0 %v215_v54  ;;  %1536 = vmatmul.mubr.bf16.gmra.mrb[32].mxu1 %v215_v54  ;;  %v6130_v54 = vld [vmem:[#allocation4 + $0x4c] ss:$16 sps:$4 sm:$0xff]   ;;  %v197_v19 = vpack.c.bf16 %v85_v12, %v81_v11  ;;  %v141_v28 = vld [vmem:[%s7784_s0 + $0x2b0] sm:$0xff] }
  0xa8   :  { %1159 = vmatprep.mubr.bf16.mxu0 %v220_v56  ;;  %1545 = vmatprep.mubr.bf16.mxu1 %v220_v56  ;;  %v194_v56 = vpack.c.bf16 %v78_v50, %v74_v49  ;;  %v6173_v49 = vld [vmem:[#allocation4 + $0x140] ss:$16 sps:$4 sm:$0xff]   ;;  %v6176_v50 = vld [vmem:[#allocation4 + $0x148] ss:$16 sps:$4 sm:$0xff]   ;;  %v6205_v40 = vld [vmem:[#allocation4 + $0x1e4] ss:$16 sps:$4 sm:$0xff]  }
  0xa9   :  { %3433 = vmatprep.subr.bf16.mxu1 %v6118_v18  ;;  %v6154_v18 = vld [vmem:[#allocation4 + $0xcc] ss:$16 sps:$4 sm:$0xff]   ;;  %v153_v39 = vld [vmem:[%s7784_s0 + $0x310] sm:$0xff] }
  0xaf   :  { %1160 = vmatmul.mubr.bf16.gmra.mrb[36].mxu0 %v219_v61  ;;  %1546 = vmatmul.mubr.bf16.gmra.mrb[36].mxu1 %v219_v61  ;;  %v6133_v61 = vld [vmem:[#allocation4 + $0x64] ss:$16 sps:$4 sm:$0xff]  }
  0xb0   :  { %1169 = vmatprep.mubr.bf16.mxu0 %v224_v62  ;;  %1555 = vmatprep.mubr.bf16.mxu1 %v224_v62  ;;  %v6136_v62 = vld [vmem:[#allocation4 + $0x6c] ss:$16 sps:$4 sm:$0xff]  }
  0xb7   :  { %1170 = vmatmul.mubr.bf16.gmra.mrb[40].mxu0 %v223_v3  ;;  %1556 = vmatmul.mubr.bf16.gmra.mrb[40].mxu1 %v223_v3  ;;  %v6139_v3 = vld [vmem:[#allocation4 + $0x84] ss:$16 sps:$4 sm:$0xff]  }
  0xb8   :  { %1179 = vmatprep.mubr.bf16.mxu0 %v228_v4  ;;  %1565 = vmatprep.mubr.bf16.mxu1 %v228_v4  ;;  %v6142_v4 = vld [vmem:[#allocation4 + $0x8c] ss:$16 sps:$4 sm:$0xff]  }
  0xbf   :  { %1180 = vmatmul.mubr.bf16.gmra.mrb[44].mxu0 %v227_v9  ;;  %1566 = vmatmul.mubr.bf16.gmra.mrb[44].mxu1 %v227_v9  ;;  %v6145_v9 = vld [vmem:[#allocation4 + $0xa4] ss:$16 sps:$4 sm:$0xff]  }
  0xc0   :  { %1189 = vmatprep.mubr.bf16.mxu0 %v232_v10  ;;  %1575 = vmatprep.mubr.bf16.mxu1 %v232_v10  ;;  %v6148_v10 = vld [vmem:[#allocation4 + $0xac] ss:$16 sps:$4 sm:$0xff]  }
  0xc7   :  { %1190 = vmatmul.mubr.bf16.gmra.mrb[48].mxu0 %v231_v16  ;;  %1576 = vmatmul.mubr.bf16.gmra.mrb[48].mxu1 %v231_v16  ;;  %v6146_v16 = vld [vmem:[#allocation4 + $0xa8] ss:$16 sps:$4 sm:$0xff]  }
  0xc8   :  { %1199 = vmatprep.mubr.bf16.mxu0 %v236_v17  ;;  %1585 = vmatprep.mubr.bf16.mxu1 %v236_v17  ;;  %v6151_v17 = vld [vmem:[#allocation4 + $0xc4] ss:$16 sps:$4 sm:$0xff]  }
  0xcf   :  { %1200 = vmatmul.mubr.bf16.gmra.mrb[52].mxu0 %v235_v23  ;;  %1586 = vmatmul.mubr.bf16.gmra.mrb[52].mxu1 %v235_v23  ;;  %v6157_v23 = vld [vmem:[#allocation4 + $0xe4] ss:$16 sps:$4 sm:$0xff]  }
  0xd0   :  { %1209 = vmatprep.mubr.bf16.mxu0 %v240_v24  ;;  %1595 = vmatprep.mubr.bf16.mxu1 %v240_v24  ;;  %v6160_v24 = vld [vmem:[#allocation4 + $0xec] ss:$16 sps:$4 sm:$0xff]  }
  0xd7   :  { %1210 = vmatmul.mubr.bf16.gmra.mrb[56].mxu0 %v239_v29  ;;  %1596 = vmatmul.mubr.bf16.gmra.mrb[56].mxu1 %v239_v29  ;;  %v6155_v29 = vld [vmem:[#allocation4 + $0xe0] ss:$16 sps:$4 sm:$0xff]  }
  0xd8   :  { %1219 = vmatprep.mubr.bf16.mxu0 %v244_v30  ;;  %1605 = vmatprep.mubr.bf16.mxu1 %v244_v30  ;;  %v6158_v30 = vld [vmem:[#allocation4 + $0xe8] ss:$16 sps:$4 sm:$0xff]  }
  0xdf   :  { %1220 = vmatmul.mubr.bf16.gmra.mrb[60].mxu0 %v243_v35  ;;  %1606 = vmatmul.mubr.bf16.gmra.mrb[60].mxu1 %v243_v35  ;;  %v6161_v35 = vld [vmem:[#allocation4 + $0x100] ss:$16 sps:$4 sm:$0xff]  }
  0xe0   :  { %1262 = vmatprep.mubr.bf16.mxu0 %v186_v36  ;;  %1648 = vmatprep.mubr.bf16.mxu1 %v186_v36  ;;  %v6164_v36 = vld [vmem:[#allocation4 + $0x108] ss:$16 sps:$4 sm:$0xff]  }
  0xe7   :  { %1263 = vmatmul.mubr.bf16.vlgmr.msra.gmra.mrb[0].mxu0 %v185_v41  ;;  %1649 = vmatmul.mubr.bf16.vlgmr.msra.gmra.mrb[0].mxu1 %v185_v41  ;;  %v106_v41 = vld [vmem:[%s7784_s0 + $0x198] sm:$0xff] }
  0xe8   :  { %1272 = vmatprep.mubr.bf16.mxu0 %v190_v42  ;;  %1658 = vmatprep.mubr.bf16.mxu1 %v190_v42  ;;  %v110_v42 = vld [vmem:[%s7784_s0 + $0x1b8] sm:$0xff] }
  0xe9   :  { %3048 = vmatpush1.bf16.msra.mxu0 %v6113_v43  ;;  %3434 = vmatpush1.bf16.msra.mxu1 %v6116_v44  ;;  %v6167_v43 = vld [vmem:[#allocation4 + $0x120] ss:$16 sps:$4 sm:$0xff]   ;;  %v6170_v44 = vld [vmem:[#allocation4 + $0x128] ss:$16 sps:$4 sm:$0xff]   ;;  %v210_v48 = vpack.c.bf16 %v110_v42, %v106_v41  ;;  %v6208_v41 = vld [vmem:[#allocation4 + $0x1ec] ss:$16 sps:$4 sm:$0xff]  }
  0xea   :  { %3049 = vmatprep.subr.bf16.mxu0 %v6121_v45  ;;  %3435 = vmatprep.subr.bf16.mxu1 %v6124_v46  ;;  %v6175_v45 = vld [vmem:[#allocation4 + $0x144] ss:$16 sps:$4 sm:$0xff]   ;;  %v6178_v46 = vld [vmem:[#allocation4 + $0x14c] ss:$16 sps:$4 sm:$0xff]  }
  0xeb   :  { %v157_v42 = vld [vmem:[%s7784_s0 + $0x330] sm:$0xff] }
  0xed   :  { %3050 = vmatpush1.bf16.msra.mxu0 %v6119_v51  ;;  %3436 = vmatpush1.bf16.msra.mxu1 %v6122_v52  ;;  %v6181_v51 = vld [vmem:[#allocation4 + $0x164] ss:$16 sps:$4 sm:$0xff]   ;;  %v6184_v52 = vld [vmem:[#allocation4 + $0x16c] ss:$16 sps:$4 sm:$0xff]  }
  0xee   :  { %3051 = vmatprep.subr.bf16.mxu0 %v6127_v53  ;;  %3437 = vmatprep.subr.bf16.mxu1 %v6130_v54  ;;  %v105_v53 = vld [vmem:[%s7784_s0 + $0x190] sm:$0xff] }
  0xef   :  { %1273 = vmatmul.mubr.bf16.gmra.mrb[4].mxu0 %v189_v55  ;;  %1659 = vmatmul.mubr.bf16.gmra.mrb[4].mxu1 %v189_v55  ;;  %v109_v54 = vld [vmem:[%s7784_s0 + $0x1b0] sm:$0xff]  ;;  %v114_v55 = vld [vmem:[%s7784_s0 + $0x1d8] sm:$0xff] }
  0xf0   :  { %1282 = vmatprep.mubr.bf16.mxu0 %v194_v56  ;;  %1668 = vmatprep.mubr.bf16.mxu1 %v194_v56  ;;  %v118_v56 = vld [vmem:[%s7784_s0 + $0x1f8] sm:$0xff] }
  0xf1   :  { %3052 = vmatpush1.bf16.msra.mxu0 %v6125_v57  ;;  %3438 = vmatpush1.bf16.msra.mxu1 %v6128_v58  ;;  %v6179_v57 = vld [vmem:[#allocation4 + $0x160] ss:$16 sps:$4 sm:$0xff]   ;;  %v6182_v58 = vld [vmem:[#allocation4 + $0x168] ss:$16 sps:$4 sm:$0xff]  }
  0xf2   :  { %3053 = vmatprep.subr.bf16.mxu0 %v6133_v61  ;;  %3439 = vmatprep.subr.bf16.mxu1 %v6136_v62  ;;  %v209_v61 = vpack.c.bf16 %v109_v54, %v105_v53  ;;  %v214_v62 = vpack.c.bf16 %v118_v56, %v114_v55  ;;  %v6211_v53 = vld [vmem:[#allocation4 + $0x204] ss:$16 sps:$4 sm:$0xff]   ;;  %v6214_v55 = vld [vmem:[#allocation4 + $0x20c] ss:$16 sps:$4 sm:$0xff]  }
  0xf5   :  { %3054 = vmatpush1.bf16.msra.mxu0 %v6131_v1  ;;  %3440 = vmatpush1.bf16.msra.mxu1 %v6134_v2  ;;  %v6193_v1 = vld [vmem:[#allocation4 + $0x1a4] ss:$16 sps:$4 sm:$0xff]   ;;  %v6196_v2 = vld [vmem:[#allocation4 + $0x1ac] ss:$16 sps:$4 sm:$0xff]  }
  0xf6   :  { %3055 = vmatprep.subr.bf16.mxu0 %v6139_v3  ;;  %3441 = vmatprep.subr.bf16.mxu1 %v6142_v4  ;;  %v113_v3 = vld [vmem:[%s7784_s0 + $0x1d0] sm:$0xff] }
  0xf7   :  { %1283 = vmatmul.mubr.bf16.gmra.mrb[8].mxu0 %v193_v5  ;;  %1669 = vmatmul.mubr.bf16.gmra.mrb[8].mxu1 %v193_v5  ;;  %v117_v4 = vld [vmem:[%s7784_s0 + $0x1f0] sm:$0xff]  ;;  %v122_v5 = vld [vmem:[%s7784_s0 + $0x218] sm:$0xff] }
  0xf8   :  { %1292 = vmatprep.mubr.bf16.mxu0 %v198_v8  ;;  %1678 = vmatprep.mubr.bf16.mxu1 %v198_v8  ;;  %v6194_v8 = vld [vmem:[#allocation4 + $0x1a8] ss:$16 sps:$4 sm:$0xff]   ;;  %v213_v11 = vpack.c.bf16 %v117_v4, %v113_v3 }
  0xf9   :  { %3056 = vmatpush1.bf16.msra.mxu0 %v6137_v6  ;;  %3442 = vmatpush1.bf16.msra.mxu1 %v6140_v7  ;;  %v126_v6 = vld [vmem:[%s7784_s0 + $0x238] sm:$0xff]  ;;  %v6191_v7 = vld [vmem:[#allocation4 + $0x1a0] ss:$16 sps:$4 sm:$0xff]  }
  0xfa   :  { %3057 = vmatprep.subr.bf16.mxu0 %v6145_v9  ;;  %3443 = vmatprep.subr.bf16.mxu1 %v6148_v10  ;;  %v6199_v9 = vld [vmem:[#allocation4 + $0x1c4] ss:$16 sps:$4 sm:$0xff]   ;;  %v6202_v10 = vld [vmem:[#allocation4 + $0x1cc] ss:$16 sps:$4 sm:$0xff]   ;;  %v218_v12 = vpack.c.bf16 %v126_v6, %v122_v5  ;;  %v375_v6 = vld [vmem:[%s7786_s2] sm:$0xf] }
  0xfd   :  { %3058 = vmatpush1.bf16.msra.mxu0 %v6143_v15  ;;  %3444 = vmatpush1.bf16.msra.mxu1 %v6146_v16  ;;  %v121_v15 = vld [vmem:[%s7784_s0 + $0x210] sm:$0xff] }
  0xfe   :  { %3059 = vmatprep.subr.bf16.mxu0 %v6151_v17  ;;  %3445 = vmatprep.subr.bf16.mxu1 %v6154_v18  ;;  %v125_v16 = vld [vmem:[%s7784_s0 + $0x230] sm:$0xff]  ;;  %v130_v17 = vld [vmem:[%s7784_s0 + $0x258] sm:$0xff] }
  0xff   :  { %1293 = vmatmul.mubr.bf16.gmra.mrb[12].mxu0 %v197_v19  ;;  %1679 = vmatmul.mubr.bf16.gmra.mrb[12].mxu1 %v197_v19  ;;  %v134_v18 = vld [vmem:[%s7784_s0 + $0x278] sm:$0xff]  ;;  %v217_v19 = vpack.c.bf16 %v125_v16, %v121_v15 }
 0x100   :  { %1302 = vmatprep.mubr.bf16.mxu0 %v202_v20  ;;  %1688 = vmatprep.mubr.bf16.mxu1 %v202_v20  ;;  %v222_v20 = vpack.c.bf16 %v134_v18, %v130_v17 }
 0x101   :  { %3060 = vmatpush1.bf16.msra.mxu0 %v6149_v21  ;;  %3446 = vmatpush1.bf16.msra.mxu1 %v6152_v22  ;;  %v129_v21 = vld [vmem:[%s7784_s0 + $0x250] sm:$0xff] }
 0x102   :  { %3061 = vmatprep.subr.bf16.mxu0 %v6157_v23  ;;  %3447 = vmatprep.subr.bf16.mxu1 %v6160_v24  ;;  %v133_v22 = vld [vmem:[%s7784_s0 + $0x270] sm:$0xff]  ;;  %v138_v23 = vld [vmem:[%s7784_s0 + $0x298] sm:$0xff] }
 0x103   :  { %v142_v24 = vld [vmem:[%s7784_s0 + $0x2b8] sm:$0xff]  ;;  %v221_v25 = vpack.c.bf16 %v133_v22, %v129_v21 }
 0x104   :  { %v226_v26 = vpack.c.bf16 %v142_v24, %v138_v23 }
 0x105   :  { %3062 = vmatpush1.bf16.msra.mxu0 %v6155_v29  ;;  %3448 = vmatpush1.bf16.msra.mxu1 %v6158_v30  ;;  %v146_v29 = vld [vmem:[%s7784_s0 + $0x2d8] sm:$0xff] }
 0x106   :  { %3063 = vmatprep.subr.bf16.mxu0 %v6163_v31  ;;  %3449 = vmatprep.subr.bf16.mxu1 %v6166_v32  ;;  %v150_v30 = vld [vmem:[%s7784_s0 + $0x2f8] sm:$0xff]  ;;  %v225_v31 = vpack.c.bf16 %v141_v28, %v137_v27 }
 0x107   :  { %1303 = vmatmul.mubr.bf16.gmra.mrb[16].mxu0 %v201_v33  ;;  %1689 = vmatmul.mubr.bf16.gmra.mrb[16].mxu1 %v201_v33  ;;  %v230_v32 = vpack.c.bf16 %v150_v30, %v146_v29  ;;  %v145_v33 = vld [vmem:[%s7784_s0 + $0x2d0] sm:$0xff] }
 0x108   :  { %1312 = vmatprep.mubr.bf16.mxu0 %v206_v34  ;;  %1698 = vmatprep.mubr.bf16.mxu1 %v206_v34  ;;  %v149_v34 = vld [vmem:[%s7784_s0 + $0x2f0] sm:$0xff] }
 0x109   :  { %3064 = vmatpush1.bf16.msra.mxu0 %v6161_v35  ;;  %3450 = vmatpush1.bf16.msra.mxu1 %v6164_v36  ;;  %v154_v35 = vld [vmem:[%s7784_s0 + $0x318] sm:$0xff] }
 0x10a   :  { %3065 = vmatprep.subr.bf16.mxu0 %v6169_v37  ;;  %3451 = vmatprep.subr.bf16.mxu1 %v6172_v38  ;;  %v158_v36 = vld [vmem:[%s7784_s0 + $0x338] sm:$0xff]  ;;  %v229_v37 = vpack.c.bf16 %v149_v34, %v145_v33 }
 0x10b   :  { %v234_v38 = vpack.c.bf16 %v158_v36, %v154_v35 }
 0x10d   :  { %3066 = vmatpush1.bf16.msra.mxu0 %v6167_v43  ;;  %3452 = vmatpush1.bf16.msra.mxu1 %v6170_v44  ;;  %v6203_v43 = vld [vmem:[#allocation4 + $0x1e0] ss:$16 sps:$4 sm:$0xff]   ;;  %v6206_v44 = vld [vmem:[#allocation4 + $0x1e8] ss:$16 sps:$4 sm:$0xff]  }
 0x10e   :  { %3067 = vmatprep.subr.bf16.mxu0 %v6175_v45  ;;  %3453 = vmatprep.subr.bf16.mxu1 %v6178_v46  ;;  %v162_v45 = vld [vmem:[%s7784_s0 + $0x358] sm:$0xff] }
 0x10f   :  { %1313 = vmatmul.mubr.bf16.gmra.mrb[20].mxu0 %v205_v47  ;;  %1699 = vmatmul.mubr.bf16.gmra.mrb[20].mxu1 %v205_v47  ;;  %v166_v46 = vld [vmem:[%s7784_s0 + $0x378] sm:$0xff]  ;;  %v233_v47 = vpack.c.bf16 %v157_v42, %v153_v39 }
 0x110   :  { %1322 = vmatprep.mubr.bf16.mxu0 %v210_v48  ;;  %1708 = vmatprep.mubr.bf16.mxu1 %v210_v48  ;;  %v238_v48 = vpack.c.bf16 %v166_v46, %v162_v45 }
 0x111   :  { %3068 = vmatpush1.bf16.msra.mxu0 %v6173_v49  ;;  %3454 = vmatpush1.bf16.msra.mxu1 %v6176_v50  ;;  %v161_v49 = vld [vmem:[%s7784_s0 + $0x350] sm:$0xff] }
 0x112   :  { %3069 = vmatprep.subr.bf16.mxu0 %v6181_v51  ;;  %3455 = vmatprep.subr.bf16.mxu1 %v6184_v52  ;;  %v165_v50 = vld [vmem:[%s7784_s0 + $0x370] sm:$0xff]  ;;  %v170_v51 = vld [vmem:[%s7784_s0 + $0x398] sm:$0xff] }
 0x113   :  { %v174_v52 = vld [vmem:[%s7784_s0 + $0x3b8] sm:$0xff]  ;;  %v237_v54 = vpack.c.bf16 %v165_v50, %v161_v49  ;;  %v6217_v49 = vld [vmem:[#allocation4 + $0x224] ss:$16 sps:$4 sm:$0xff]  }
 0x114   :  { %v242_v56 = vpack.c.bf16 %v174_v52, %v170_v51  ;;  %v6220_v50 = vld [vmem:[#allocation4 + $0x22c] ss:$16 sps:$4 sm:$0xff]  }
 0x115   :  { %3070 = vmatpush1.bf16.msra.mxu0 %v6179_v57  ;;  %3456 = vmatpush1.bf16.msra.mxu1 %v6182_v58  ;;  %v169_v57 = vld [vmem:[%s7784_s0 + $0x390] sm:$0xff] }
 0x116   :  { %3071 = vmatprep.subr.bf16.mxu0 %v6187_v59  ;;  %3457 = vmatprep.subr.bf16.mxu1 %v6190_v60  ;;  %v173_v58 = vld [vmem:[%s7784_s0 + $0x3b0] sm:$0xff]  ;;  %v178_v59 = vld [vmem:[%s7784_s0 + $0x3d8] sm:$0xff] }
 0x117   :  { %1323 = vmatmul.mubr.bf16.gmra.mrb[24].mxu0 %v209_v61  ;;  %1709 = vmatmul.mubr.bf16.gmra.mrb[24].mxu1 %v209_v61  ;;  %v182_v60 = vld [vmem:[%s7784_s0 + $0x3f8] sm:$0xff]  ;;  %v241_v61 = vpack.c.bf16 %v173_v58, %v169_v57 }
 0x118   :  { %1332 = vmatprep.mubr.bf16.mxu0 %v214_v62  ;;  %1718 = vmatprep.mubr.bf16.mxu1 %v214_v62  ;;  %v246_v62 = vpack.c.bf16 %v182_v60, %v178_v59 }
 0x119   :  { %3072 = vmatpush1.bf16.msra.mxu0 %v6185_v63  ;;  %3458 = vmatpush1.bf16.msra.mxu1 %v6188_v0  ;;  %v177_v63 = vld [vmem:[%s7784_s0 + $0x3d0] sm:$0xff] }
 0x11a   :  { %3073 = vmatprep.subr.bf16.mxu0 %v6193_v1  ;;  %3459 = vmatprep.subr.bf16.mxu1 %v6196_v2  ;;  %v181_v0 = vld [vmem:[%s7784_s0 + $0x3f0] sm:$0xff]  ;;  %v377_v2 = vlaneseq }
 0x11b   :  { %v245_v1 = vpack.c.bf16 %v181_v0, %v177_v63  ;;  %v6223_v63 = vld [vmem:[#allocation4 + $0x244] ss:$16 sps:$4 sm:$0xff]  }
 0x11c   :  { %v7223_v3 = vshrl.u32 %v377_v2, 7 }
 0x11d   :  { %3074 = vmatpush1.bf16.msra.mxu0 %v6191_v7  ;;  %3460 = vmatpush1.bf16.msra.mxu1 %v6194_v8 }
 0x11e   :  { %3075 = vmatprep.subr.bf16.mxu0 %v6199_v9  ;;  %3461 = vmatprep.subr.bf16.mxu1 %v6202_v10  ;;  %v379_v4 = vsub.s32 0, %v7223_v3  ;;  %v387_v5 = vsub.s32 2, %v7223_v3  ;;  %v383_v7 = vsub.s32 1, %v7223_v3  ;;  %v391_v8 = vsub.s32 3, %v7223_v3 }
 0x11f   :  { %1333 = vmatmul.mubr.bf16.gmra.mrb[28].mxu0 %v213_v11  ;;  %1719 = vmatmul.mubr.bf16.gmra.mrb[28].mxu1 %v213_v11 }
 0x120   :  { %1342 = vmatprep.mubr.bf16.mxu0 %v218_v12  ;;  %1728 = vmatprep.mubr.bf16.mxu1 %v218_v12  ;;  %v7234_v9 = vrot.slane %v375_v6, %v379_v4  ;;  %v7238_v10 = vrot.slane %v375_v6, %v387_v5  ;;  %v7242_v11 = vrot.slane %v375_v6, %v383_v7 }
 0x121   :  { %3076 = vmatpush1.bf16.msra.mxu0 %v6197_v13  ;;  %3462 = vmatpush1.bf16.msra.mxu1 %v6200_v14  ;;  %v7246_v12 = vrot.slane %v375_v6, %v391_v8 }
 0x122   :  { %3077 = vmatprep.subr.bf16.mxu0 %v6205_v40  ;;  %3463 = vmatprep.subr.bf16.mxu1 %v6208_v41 }
 0x125   :  { %3078 = vmatpush1.bf16.msra.mxu0 %v6203_v43  ;;  %3464 = vmatpush1.bf16.msra.mxu1 %v6206_v44  ;;  %v6209_v43 = vld [vmem:[#allocation4 + $0x200] ss:$16 sps:$4 sm:$0xff]   ;;  %v6212_v44 = vld [vmem:[#allocation4 + $0x208] ss:$16 sps:$4 sm:$0xff]  }
 0x126   :  { %3240 = vmatprep.subr.bf16.mxu0 %v6211_v53  ;;  %3626 = vmatprep.subr.bf16.mxu1 %v6214_v55 }
 0x127   :  { %1343 = vmatmul.mubr.bf16.gmra.mrb[32].mxu0 %v217_v19  ;;  %1729 = vmatmul.mubr.bf16.gmra.mrb[32].mxu1 %v217_v19 }
 0x128   :  { %1352 = vmatprep.mubr.bf16.mxu0 %v222_v20  ;;  %1738 = vmatprep.mubr.bf16.mxu1 %v222_v20 }
 0x12f   :  { %1353 = vmatmul.mubr.bf16.gmra.mrb[36].mxu0 %v221_v25  ;;  %1739 = vmatmul.mubr.bf16.gmra.mrb[36].mxu1 %v221_v25 }
 0x130   :  { %1362 = vmatprep.mubr.bf16.mxu0 %v226_v26  ;;  %1748 = vmatprep.mubr.bf16.mxu1 %v226_v26 }
 0x137   :  { %1363 = vmatmul.mubr.bf16.gmra.mrb[40].mxu0 %v225_v31  ;;  %1749 = vmatmul.mubr.bf16.gmra.mrb[40].mxu1 %v225_v31 }
 0x138   :  { %1372 = vmatprep.mubr.bf16.mxu0 %v230_v32  ;;  %1758 = vmatprep.mubr.bf16.mxu1 %v230_v32 }
 0x13f   :  { %1373 = vmatmul.mubr.bf16.gmra.mrb[44].mxu0 %v229_v37  ;;  %1759 = vmatmul.mubr.bf16.gmra.mrb[44].mxu1 %v229_v37 }
 0x140   :  { %1382 = vmatprep.mubr.bf16.mxu0 %v234_v38  ;;  %1768 = vmatprep.mubr.bf16.mxu1 %v234_v38 }
 0x147   :  { %1383 = vmatmul.mubr.bf16.gmra.mrb[48].mxu0 %v233_v47  ;;  %1769 = vmatmul.mubr.bf16.gmra.mrb[48].mxu1 %v233_v47 }
 0x148   :  { %1392 = vmatprep.mubr.bf16.mxu0 %v238_v48  ;;  %1778 = vmatprep.mubr.bf16.mxu1 %v238_v48 }
 0x14f   :  { %1393 = vmatmul.mubr.bf16.gmra.mrb[52].mxu0 %v237_v54  ;;  %1779 = vmatmul.mubr.bf16.gmra.mrb[52].mxu1 %v237_v54 }
 0x150   :  { %1402 = vmatprep.mubr.bf16.mxu0 %v242_v56  ;;  %1788 = vmatprep.mubr.bf16.mxu1 %v242_v56 }
 0x157   :  { %1403 = vmatmul.mubr.bf16.gmra.mrb[56].mxu0 %v241_v61  ;;  %1789 = vmatmul.mubr.bf16.gmra.mrb[56].mxu1 %v241_v61  ;;  %v6215_v61 = vld [vmem:[#allocation4 + $0x220] ss:$16 sps:$4 sm:$0xff]  }
 0x158   :  { %1412 = vmatprep.mubr.bf16.mxu0 %v246_v62  ;;  %1798 = vmatprep.mubr.bf16.mxu1 %v246_v62  ;;  %v6218_v62 = vld [vmem:[#allocation4 + $0x228] ss:$16 sps:$4 sm:$0xff]  }
 0x15f   :  { %1413 = vmatmul.mubr.bf16.gmra.mrb[60].mxu0 %v245_v1  ;;  %1799 = vmatmul.mubr.bf16.gmra.mrb[60].mxu1 %v245_v1 }
 0x1ba   :  { %v1264_v13 = vpop.f32.mrb[0].mxu0  ;;  %v1650_v14 = vpop.f32.mrb[0].mxu1 }
 0x1bb   :  { %v5403_v15 = vadd.f32 %v1264_v13, %v7234_v9  ;;  %v5467_v16 = vadd.f32 %v1650_v14, %v7238_v10  ;;  %v1266_v17 = vpop.f32.mrb[1].mxu0  ;;  %v1652_v18 = vpop.f32.mrb[1].mxu1  ;;  %v6226_v13 = vld [vmem:[#allocation4 + $0x24c] ss:$16 sps:$4 sm:$0xff]  }
 0x1bc   :  { %v5404_v19 = vadd.f32 %v1266_v17, %v7242_v11  ;;  %v5468_v20 = vadd.f32 %v1652_v18, %v7246_v12  ;;  %v1268_v21 = vpop.f32.mrb[2].mxu0  ;;  %v1654_v22 = vpop.f32.mrb[2].mxu1 }
 0x1bd   :  { %v5405_v23 = vadd.f32 %v1268_v21, %v7234_v9  ;;  %v5469_v24 = vadd.f32 %v1654_v22, %v7238_v10  ;;  %v1270_v25 = vpop.f32.mrb[3].mxu0  ;;  %v1656_v26 = vpop.f32.mrb[3].mxu1  ;;  %v1809_v29 = vmax.f32 %v5403_v15, 0.0  ;;  %v1811_v30 = vmax.f32 %v5467_v16, 0.0 }
 0x1be   :  { %v5406_v27 = vadd.f32 %v1270_v25, %v7242_v11  ;;  %v5470_v28 = vadd.f32 %v1656_v26, %v7246_v12  ;;  %v1810_v33 = vmax.f32 %v5404_v19, 0.0  ;;  %v1812_v34 = vmax.f32 %v5468_v20, 0.0  ;;  %v6224_v25 = vld [vmem:[#allocation4 + $0x248] ss:$16 sps:$4 sm:$0xff]  }
 0x1bf   :  { %v1813_v31 = vmax.f32 %v5405_v23, 0.0  ;;  %v1815_v32 = vmax.f32 %v5469_v24, 0.0  ;;  %v6221_v24 = vld [vmem:[#allocation4 + $0x240] ss:$16 sps:$4 sm:$0xff]  }
 0x1c0   :  { %v1814_v35 = vmax.f32 %v5406_v27, 0.0  ;;  %v1816_v36 = vmax.f32 %v5470_v28, 0.0 }
 0x1c1   :  { %v2193_v37 = vpack.c.bf16 %v1813_v31, %v1809_v29  ;;  %v7256_v38 = vpack.c.bf16 %v1815_v32, %v1811_v30  ;;  %v6229_v30 = vld [vmem:[#allocation4 + $0x264] ss:$16 sps:$4 sm:$0xff]   ;;  %v6232_v31 = vld [vmem:[#allocation4 + $0x26c] ss:$16 sps:$4 sm:$0xff]  }
 0x1c2   :  { %v2194_v39 = vpack.c.bf16 %v1814_v35, %v1810_v33  ;;  %v7258_v40 = vpack.c.bf16 %v1816_v36, %v1812_v34  ;;  %v1274_v41 = vpop.f32.mrb[4].mxu0  ;;  %v1660_v42 = vpop.f32.mrb[4].mxu1 }
 0x1c3   :  { %v5407_v45 = vadd.f32 %v1274_v41, %v7234_v9  ;;  %v5471_v46 = vadd.f32 %v1660_v42, %v7238_v10  ;;  %v1276_v47 = vpop.f32.mrb[5].mxu0  ;;  %v1662_v48 = vpop.f32.mrb[5].mxu1 }
 0x1c4   :  { %v5408_v51 = vadd.f32 %v1276_v47, %v7242_v11  ;;  %v5472_v52 = vadd.f32 %v1662_v48, %v7246_v12  ;;  %v1278_v53 = vpop.f32.mrb[6].mxu0  ;;  %v1664_v54 = vpop.f32.mrb[6].mxu1  ;;  %3079 = vmatprep.mubr.bf16.mxu0 %v2194_v39  ;;  %3465 = vmatprep.mubr.bf16.mxu1 %v2194_v39 }
 0x1c5   :  { %v5409_v55 = vadd.f32 %v1278_v53, %v7234_v9  ;;  %v5473_v56 = vadd.f32 %v1664_v54, %v7238_v10  ;;  %v1280_v57 = vpop.f32.mrb[7].mxu0  ;;  %v1666_v58 = vpop.f32.mrb[7].mxu1  ;;  %3080 = vmatmul.mubr.bf16.vlgmr.msra.gmra.mrb[64].mxu0 %v2193_v37  ;;  %3466 = vmatmul.mubr.bf16.vlgmr.msra.gmra.mrb[64].mxu1 %v2193_v37  ;;  %v1817_v0 = vmax.f32 %v5407_v45, 0.0  ;;  %v1819_v1 = vmax.f32 %v5471_v46, 0.0  ;;  %v6230_v45 = vld [vmem:[#allocation4 + $0x268] ss:$16 sps:$4 sm:$0xff]  }
 0x1c6   :  { %v5410_v59 = vadd.f32 %v1280_v57, %v7242_v11  ;;  %v5474_v60 = vadd.f32 %v1666_v58, %v7246_v12  ;;  %3241 = vmatpush1.bf16.msra.mxu0 %v6209_v43  ;;  %3627 = vmatpush1.bf16.msra.mxu1 %v6212_v44  ;;  %v1818_v14 = vmax.f32 %v5408_v51, 0.0  ;;  %v1820_v15 = vmax.f32 %v5472_v52, 0.0  ;;  %v6227_v44 = vld [vmem:[#allocation4 + $0x260] ss:$16 sps:$4 sm:$0xff]   ;;  %v6235_v46 = vld [vmem:[#allocation4 + $0x284] ss:$16 sps:$4 sm:$0xff]  }
 0x1c7   :  { %v1821_v2 = vmax.f32 %v5409_v55, 0.0  ;;  %v1823_v6 = vmax.f32 %v5473_v56, 0.0  ;;  %3242 = vmatprep.subr.bf16.mxu0 %v6217_v49  ;;  %3628 = vmatprep.subr.bf16.mxu1 %v6220_v50  ;;  %v6238_v51 = vld [vmem:[#allocation4 + $0x28c] ss:$16 sps:$4 sm:$0xff]  }
 0x1c8   :  { %v1822_v16 = vmax.f32 %v5410_v59, 0.0  ;;  %v1824_v17 = vmax.f32 %v5474_v60, 0.0 }
 0x1c9   :  { %v2197_v18 = vpack.c.bf16 %v1821_v2, %v1817_v0  ;;  %v7268_v19 = vpack.c.bf16 %v1823_v6, %v1819_v1 }
 0x1ca   :  { %v2198_v20 = vpack.c.bf16 %v1822_v16, %v1818_v14  ;;  %v7270_v21 = vpack.c.bf16 %v1824_v17, %v1820_v15  ;;  %v1284_v22 = vpop.f32.mrb[8].mxu0  ;;  %v1670_v23 = vpop.f32.mrb[8].mxu1  ;;  %3243 = vmatpush1.bf16.msra.mxu0 %v6215_v61  ;;  %3629 = vmatpush1.bf16.msra.mxu1 %v6218_v62  ;;  %v6233_v62 = vld [vmem:[#allocation4 + $0x280] ss:$16 sps:$4 sm:$0xff]   ;;  %v6244_v14 = vld [vmem:[#allocation4 + $0x2ac] ss:$16 sps:$4 sm:$0xff]  }
 0x1cb   :  { %v5411_v26 = vadd.f32 %v1284_v22, %v7234_v9  ;;  %v5475_v27 = vadd.f32 %v1670_v23, %v7238_v10  ;;  %v1286_v28 = vpop.f32.mrb[9].mxu0  ;;  %v1672_v29 = vpop.f32.mrb[9].mxu1  ;;  %3244 = vmatprep.subr.bf16.mxu0 %v6223_v63  ;;  %3630 = vmatprep.subr.bf16.mxu1 %v6226_v13  ;;  %v6236_v63 = vld [vmem:[#allocation4 + $0x288] ss:$16 sps:$4 sm:$0xff]   ;;  %v6241_v13 = vld [vmem:[#allocation4 + $0x2a4] ss:$16 sps:$4 sm:$0xff]  }
 0x1cc   :  { %v5412_v32 = vadd.f32 %v1286_v28, %v7242_v11  ;;  %v5476_v33 = vadd.f32 %v1672_v29, %v7246_v12  ;;  %v1288_v34 = vpop.f32.mrb[10].mxu0  ;;  %v1674_v35 = vpop.f32.mrb[10].mxu1  ;;  %3089 = vmatprep.mubr.bf16.mxu0 %v2198_v20  ;;  %3475 = vmatprep.mubr.bf16.mxu1 %v2198_v20  ;;  %v6242_v28 = vld [vmem:[#allocation4 + $0x2a8] ss:$16 sps:$4 sm:$0xff]   ;;  %v6247_v29 = vld [vmem:[#allocation4 + $0x2c4] ss:$16 sps:$4 sm:$0xff]  }
 0x1cd   :  { %v5413_v36 = vadd.f32 %v1288_v34, %v7234_v9  ;;  %v5477_v37 = vadd.f32 %v1674_v35, %v7238_v10  ;;  %v1290_v39 = vpop.f32.mrb[11].mxu0  ;;  %v1676_v41 = vpop.f32.mrb[11].mxu1  ;;  %3090 = vmatmul.mubr.bf16.gmra.mrb[68].mxu0 %v2197_v18  ;;  %3476 = vmatmul.mubr.bf16.gmra.mrb[68].mxu1 %v2197_v18  ;;  %v1825_v47 = vmax.f32 %v5411_v26, 0.0  ;;  %v1827_v48 = vmax.f32 %v5475_v27, 0.0  ;;  %v6239_v27 = vld [vmem:[#allocation4 + $0x2a0] ss:$16 sps:$4 sm:$0xff]  }
 0x1ce   :  { %v5414_v42 = vadd.f32 %v1290_v39, %v7242_v11  ;;  %v5478_v43 = vadd.f32 %v1676_v41, %v7246_v12  ;;  %3245 = vmatpush1.bf16.msra.mxu0 %v6221_v24  ;;  %3631 = vmatpush1.bf16.msra.mxu1 %v6224_v25  ;;  %v1826_v52 = vmax.f32 %v5412_v32, 0.0  ;;  %v1828_v53 = vmax.f32 %v5476_v33, 0.0  ;;  %v6250_v34 = vld [vmem:[#allocation4 + $0x2cc] ss:$16 sps:$4 sm:$0xff]  }
 0x1cf   :  { %v1829_v49 = vmax.f32 %v5413_v36, 0.0  ;;  %v1831_v50 = vmax.f32 %v5477_v37, 0.0  ;;  %3246 = vmatprep.subr.bf16.mxu0 %v6229_v30  ;;  %3632 = vmatprep.subr.bf16.mxu1 %v6232_v31 }
 0x1d0   :  { %v1830_v54 = vmax.f32 %v5414_v42, 0.0  ;;  %v1832_v55 = vmax.f32 %v5478_v43, 0.0 }
 0x1d1   :  { %v2201_v56 = vpack.c.bf16 %v1829_v49, %v1825_v47  ;;  %v7280_v57 = vpack.c.bf16 %v1831_v50, %v1827_v48  ;;  %v6245_v47 = vld [vmem:[#allocation4 + $0x2c0] ss:$16 sps:$4 sm:$0xff]   ;;  %v6248_v48 = vld [vmem:[#allocation4 + $0x2c8] ss:$16 sps:$4 sm:$0xff]  }
 0x1d2   :  { %v2202_v58 = vpack.c.bf16 %v1830_v54, %v1826_v52  ;;  %v7282_v59 = vpack.c.bf16 %v1832_v55, %v1828_v53  ;;  %v1294_v60 = vpop.f32.mrb[12].mxu0  ;;  %v1680_v61 = vpop.f32.mrb[12].mxu1  ;;  %3247 = vmatpush1.bf16.msra.mxu0 %v6227_v44  ;;  %3633 = vmatpush1.bf16.msra.mxu1 %v6230_v45  ;;  %v6253_v53 = vld [vmem:[#allocation4 + $0x2e4] ss:$16 sps:$4 sm:$0xff]   ;;  %v6256_v54 = vld [vmem:[#allocation4 + $0x2ec] ss:$16 sps:$4 sm:$0xff]  }
 0x1d3   :  { %v5415_v0 = vadd.f32 %v1294_v60, %v7234_v9  ;;  %v5479_v1 = vadd.f32 %v1680_v61, %v7238_v10  ;;  %v1296_v2 = vpop.f32.mrb[13].mxu0  ;;  %v1682_v6 = vpop.f32.mrb[13].mxu1  ;;  %3248 = vmatprep.subr.bf16.mxu0 %v6235_v46  ;;  %3634 = vmatprep.subr.bf16.mxu1 %v6238_v51 }
 0x1d4   :  { %v5416_v15 = vadd.f32 %v1296_v2, %v7242_v11  ;;  %v5480_v16 = vadd.f32 %v1682_v6, %v7246_v12  ;;  %v1298_v17 = vpop.f32.mrb[14].mxu0  ;;  %v1684_v18 = vpop.f32.mrb[14].mxu1  ;;  %3099 = vmatprep.mubr.bf16.mxu0 %v2202_v58  ;;  %3485 = vmatprep.mubr.bf16.mxu1 %v2202_v58  ;;  %v6251_v6 = vld [vmem:[#allocation4 + $0x2e0] ss:$16 sps:$4 sm:$0xff]  }
 0x1d5   :  { %v5417_v20 = vadd.f32 %v1298_v17, %v7234_v9  ;;  %v5481_v22 = vadd.f32 %v1684_v18, %v7238_v10  ;;  %v1300_v23 = vpop.f32.mrb[15].mxu0  ;;  %v1686_v24 = vpop.f32.mrb[15].mxu1  ;;  %3100 = vmatmul.mubr.bf16.gmra.mrb[72].mxu0 %v2201_v56  ;;  %3486 = vmatmul.mubr.bf16.gmra.mrb[72].mxu1 %v2201_v56  ;;  %v1833_v30 = vmax.f32 %v5415_v0, 0.0  ;;  %v1835_v31 = vmax.f32 %v5479_v1, 0.0 }
 0x1d6   :  { %v5418_v25 = vadd.f32 %v1300_v23, %v7242_v11  ;;  %v5482_v26 = vadd.f32 %v1686_v24, %v7246_v12  ;;  %3249 = vmatpush1.bf16.msra.mxu0 %v6233_v62  ;;  %3635 = vmatpush1.bf16.msra.mxu1 %v6236_v63  ;;  %v1834_v35 = vmax.f32 %v5416_v15, 0.0  ;;  %v1836_v36 = vmax.f32 %v5480_v16, 0.0 }
 0x1d7   :  { %v1837_v32 = vmax.f32 %v5417_v20, 0.0  ;;  %v1839_v33 = vmax.f32 %v5481_v22, 0.0  ;;  %3250 = vmatprep.subr.bf16.mxu0 %v6241_v13  ;;  %3636 = vmatprep.subr.bf16.mxu1 %v6244_v14  ;;  %v6254_v13 = vld [vmem:[#allocation4 + $0x2e8] ss:$16 sps:$4 sm:$0xff]   ;;  %v6259_v14 = vld [vmem:[#allocation4 + $0x304] ss:$16 sps:$4 sm:$0xff]  }
 0x1d8   :  { %v1838_v37 = vmax.f32 %v5418_v25, 0.0  ;;  %v1840_v39 = vmax.f32 %v5482_v26, 0.0  ;;  %v6262_v20 = vld [vmem:[#allocation4 + $0x30c] ss:$16 sps:$4 sm:$0xff]  }
 0x1d9   :  { %v2205_v41 = vpack.c.bf16 %v1837_v32, %v1833_v30  ;;  %v7292_v42 = vpack.c.bf16 %v1839_v33, %v1835_v31  ;;  %v6257_v32 = vld [vmem:[#allocation4 + $0x300] ss:$16 sps:$4 sm:$0xff]   ;;  %v6260_v33 = vld [vmem:[#allocation4 + $0x308] ss:$16 sps:$4 sm:$0xff]  }
 0x1da   :  { %v2206_v43 = vpack.c.bf16 %v1838_v37, %v1834_v35  ;;  %v7294_v44 = vpack.c.bf16 %v1840_v39, %v1836_v36  ;;  %v1304_v45 = vpop.f32.mrb[16].mxu0  ;;  %v1690_v46 = vpop.f32.mrb[16].mxu1  ;;  %3251 = vmatpush1.bf16.msra.mxu0 %v6239_v27  ;;  %3637 = vmatpush1.bf16.msra.mxu1 %v6242_v28  ;;  %v6265_v39 = vld [vmem:[#allocation4 + $0x324] ss:$16 sps:$4 sm:$0xff]  }
 0x1db   :  { %v5419_v49 = vadd.f32 %v1304_v45, %v7234_v9  ;;  %v5483_v50 = vadd.f32 %v1690_v46, %v7238_v10  ;;  %v1306_v51 = vpop.f32.mrb[17].mxu0  ;;  %v1692_v52 = vpop.f32.mrb[17].mxu1  ;;  %3252 = vmatprep.subr.bf16.mxu0 %v6247_v29  ;;  %3638 = vmatprep.subr.bf16.mxu1 %v6250_v34 }
 0x1dc   :  { %v5420_v55 = vadd.f32 %v1306_v51, %v7242_v11  ;;  %v5484_v56 = vadd.f32 %v1692_v52, %v7246_v12  ;;  %v1308_v58 = vpop.f32.mrb[18].mxu0  ;;  %v1694_v60 = vpop.f32.mrb[18].mxu1  ;;  %3109 = vmatprep.mubr.bf16.mxu0 %v2206_v43  ;;  %3495 = vmatprep.mubr.bf16.mxu1 %v2206_v43 }
 0x1dd   :  { %v5421_v61 = vadd.f32 %v1308_v58, %v7234_v9  ;;  %v5485_v62 = vadd.f32 %v1694_v60, %v7238_v10  ;;  %v1310_v63 = vpop.f32.mrb[19].mxu0  ;;  %v1696_v0 = vpop.f32.mrb[19].mxu1  ;;  %3110 = vmatmul.mubr.bf16.gmra.mrb[76].mxu0 %v2205_v41  ;;  %3496 = vmatmul.mubr.bf16.gmra.mrb[76].mxu1 %v2205_v41  ;;  %v1841_v15 = vmax.f32 %v5419_v49, 0.0  ;;  %v1843_v16 = vmax.f32 %v5483_v50, 0.0  ;;  %v6268_v41 = vld [vmem:[#allocation4 + $0x32c] ss:$16 sps:$4 sm:$0xff]  }
 0x1de   :  { %v5422_v1 = vadd.f32 %v1310_v63, %v7242_v11  ;;  %v5486_v2 = vadd.f32 %v1696_v0, %v7246_v12  ;;  %3253 = vmatpush1.bf16.msra.mxu0 %v6245_v47  ;;  %3639 = vmatpush1.bf16.msra.mxu1 %v6248_v48  ;;  %v1842_v22 = vmax.f32 %v5420_v55, 0.0  ;;  %v1844_v23 = vmax.f32 %v5484_v56, 0.0  ;;  %v6266_v55 = vld [vmem:[#allocation4 + $0x328] ss:$16 sps:$4 sm:$0xff]   ;;  %v6271_v56 = vld [vmem:[#allocation4 + $0x344] ss:$16 sps:$4 sm:$0xff]  }
 0x1df   :  { %v1845_v17 = vmax.f32 %v5421_v61, 0.0  ;;  %v1847_v18 = vmax.f32 %v5485_v62, 0.0  ;;  %3254 = vmatprep.subr.bf16.mxu0 %v6253_v53  ;;  %3640 = vmatprep.subr.bf16.mxu1 %v6256_v54  ;;  %v6263_v54 = vld [vmem:[#allocation4 + $0x320] ss:$16 sps:$4 sm:$0xff]   ;;  %v6274_v63 = vld [vmem:[#allocation4 + $0x34c] ss:$16 sps:$4 sm:$0xff]  }
 0x1e0   :  { %v1846_v24 = vmax.f32 %v5422_v1, 0.0  ;;  %v1848_v25 = vmax.f32 %v5486_v2, 0.0 }
 0x1e1   :  { %v2209_v26 = vpack.c.bf16 %v1845_v17, %v1841_v15  ;;  %v7304_v27 = vpack.c.bf16 %v1847_v18, %v1843_v16 }
 0x1e2   :  { %v2210_v28 = vpack.c.bf16 %v1846_v24, %v1842_v22  ;;  %v7306_v29 = vpack.c.bf16 %v1848_v25, %v1844_v23  ;;  %v1314_v30 = vpop.f32.mrb[20].mxu0  ;;  %v1700_v31 = vpop.f32.mrb[20].mxu1  ;;  %3255 = vmatpush1.bf16.msra.mxu0 %v6251_v6  ;;  %3641 = vmatpush1.bf16.msra.mxu1 %v6254_v13  ;;  %v6272_v22 = vld [vmem:[#allocation4 + $0x348] ss:$16 sps:$4 sm:$0xff]  }
 0x1e3   :  { %v5423_v34 = vadd.f32 %v1314_v30, %v7234_v9  ;;  %v5487_v35 = vadd.f32 %v1700_v31, %v7238_v10  ;;  %v1316_v36 = vpop.f32.mrb[21].mxu0  ;;  %v1702_v37 = vpop.f32.mrb[21].mxu1  ;;  %3256 = vmatprep.subr.bf16.mxu0 %v6259_v14  ;;  %3642 = vmatprep.subr.bf16.mxu1 %v6262_v20  ;;  %v6269_v20 = vld [vmem:[#allocation4 + $0x340] ss:$16 sps:$4 sm:$0xff]   ;;  %v6280_v30 = vld [vmem:[#allocation4 + $0x36c] ss:$16 sps:$4 sm:$0xff]  }
 0x1e4   :  { %v5424_v43 = vadd.f32 %v1316_v36, %v7242_v11  ;;  %v5488_v45 = vadd.f32 %v1702_v37, %v7246_v12  ;;  %v1318_v46 = vpop.f32.mrb[22].mxu0  ;;  %v1704_v47 = vpop.f32.mrb[22].mxu1  ;;  %3119 = vmatprep.mubr.bf16.mxu0 %v2210_v28  ;;  %3505 = vmatprep.mubr.bf16.mxu1 %v2210_v28  ;;  %v6277_v28 = vld [vmem:[#allocation4 + $0x364] ss:$16 sps:$4 sm:$0xff]  }
 0x1e5   :  { %v5425_v48 = vadd.f32 %v1318_v46, %v7234_v9  ;;  %v5489_v49 = vadd.f32 %v1704_v47, %v7238_v10  ;;  %v1320_v50 = vpop.f32.mrb[23].mxu0  ;;  %v1706_v51 = vpop.f32.mrb[23].mxu1  ;;  %3120 = vmatmul.mubr.bf16.gmra.mrb[80].mxu0 %v2209_v26  ;;  %3506 = vmatmul.mubr.bf16.gmra.mrb[80].mxu1 %v2209_v26  ;;  %v1849_v58 = vmax.f32 %v5423_v34, 0.0  ;;  %v1851_v60 = vmax.f32 %v5487_v35, 0.0  ;;  %v6278_v46 = vld [vmem:[#allocation4 + $0x368] ss:$16 sps:$4 sm:$0xff]  }
 0x1e6   :  { %v5426_v52 = vadd.f32 %v1320_v50, %v7242_v11  ;;  %v5490_v53 = vadd.f32 %v1706_v51, %v7246_v12  ;;  %3257 = vmatpush1.bf16.msra.mxu0 %v6257_v32  ;;  %3643 = vmatpush1.bf16.msra.mxu1 %v6260_v33  ;;  %v1850_v0 = vmax.f32 %v5424_v43, 0.0  ;;  %v1852_v1 = vmax.f32 %v5488_v45, 0.0  ;;  %v6275_v45 = vld [vmem:[#allocation4 + $0x360] ss:$16 sps:$4 sm:$0xff]   ;;  %v6283_v47 = vld [vmem:[#allocation4 + $0x384] ss:$16 sps:$4 sm:$0xff]  }
 0x1e7   :  { %v1853_v61 = vmax.f32 %v5425_v48, 0.0  ;;  %v1855_v62 = vmax.f32 %v5489_v49, 0.0  ;;  %3258 = vmatprep.subr.bf16.mxu0 %v6265_v39  ;;  %3644 = vmatprep.subr.bf16.mxu1 %v6268_v41 }
 0x1e8   :  { %v1854_v2 = vmax.f32 %v5426_v52, 0.0  ;;  %v1856_v6 = vmax.f32 %v5490_v53, 0.0  ;;  %v6286_v52 = vld [vmem:[#allocation4 + $0x38c] ss:$16 sps:$4 sm:$0xff]  }
 0x1e9   :  { %v2213_v13 = vpack.c.bf16 %v1853_v61, %v1849_v58  ;;  %v7316_v14 = vpack.c.bf16 %v1855_v62, %v1851_v60 }
 0x1ea   :  { %v2214_v15 = vpack.c.bf16 %v1854_v2, %v1850_v0  ;;  %v7318_v16 = vpack.c.bf16 %v1856_v6, %v1852_v1  ;;  %v1324_v17 = vpop.f32.mrb[24].mxu0  ;;  %v1710_v18 = vpop.f32.mrb[24].mxu1  ;;  %3259 = vmatpush1.bf16.msra.mxu0 %v6263_v54  ;;  %3645 = vmatpush1.bf16.msra.mxu1 %v6266_v55  ;;  %v6281_v1 = vld [vmem:[#allocation4 + $0x380] ss:$16 sps:$4 sm:$0xff]   ;;  %v6284_v2 = vld [vmem:[#allocation4 + $0x388] ss:$16 sps:$4 sm:$0xff]  }
 0x1eb   :  { %v5427_v23 = vadd.f32 %v1324_v17, %v7234_v9  ;;  %v5491_v24 = vadd.f32 %v1710_v18, %v7238_v10  ;;  %v1326_v25 = vpop.f32.mrb[25].mxu0  ;;  %v1712_v26 = vpop.f32.mrb[25].mxu1  ;;  %3260 = vmatprep.subr.bf16.mxu0 %v6271_v56  ;;  %3646 = vmatprep.subr.bf16.mxu1 %v6274_v63  ;;  %v6289_v18 = vld [vmem:[#allocation4 + $0x3a4] ss:$16 sps:$4 sm:$0xff]  }
 0x1ec   :  { %v5428_v31 = vadd.f32 %v1326_v25, %v7242_v11  ;;  %v5492_v32 = vadd.f32 %v1712_v26, %v7246_v12  ;;  %v1328_v33 = vpop.f32.mrb[26].mxu0  ;;  %v1714_v34 = vpop.f32.mrb[26].mxu1  ;;  %3129 = vmatprep.mubr.bf16.mxu0 %v2214_v15  ;;  %3515 = vmatprep.mubr.bf16.mxu1 %v2214_v15 }
 0x1ed   :  { %v5429_v35 = vadd.f32 %v1328_v33, %v7234_v9  ;;  %v5493_v36 = vadd.f32 %v1714_v34, %v7238_v10  ;;  %v1330_v37 = vpop.f32.mrb[27].mxu0  ;;  %v1716_v39 = vpop.f32.mrb[27].mxu1  ;;  %3130 = vmatmul.mubr.bf16.gmra.mrb[84].mxu0 %v2213_v13  ;;  %3516 = vmatmul.mubr.bf16.gmra.mrb[84].mxu1 %v2213_v13  ;;  %v1857_v48 = vmax.f32 %v5427_v23, 0.0  ;;  %v1859_v49 = vmax.f32 %v5491_v24, 0.0  ;;  %v6287_v34 = vld [vmem:[#allocation4 + $0x3a0] ss:$16 sps:$4 sm:$0xff]  }
 0x1ee   :  { %v5430_v41 = vadd.f32 %v1330_v37, %v7242_v11  ;;  %v5494_v43 = vadd.f32 %v1716_v39, %v7246_v12  ;;  %3261 = vmatpush1.bf16.msra.mxu0 %v6269_v20  ;;  %3647 = vmatpush1.bf16.msra.mxu1 %v6272_v22  ;;  %v1858_v53 = vmax.f32 %v5428_v31, 0.0  ;;  %v1860_v54 = vmax.f32 %v5492_v32, 0.0  ;;  %v6292_v20 = vld [vmem:[#allocation4 + $0x3ac] ss:$16 sps:$4 sm:$0xff]  }
 0x1ef   :  { %v1861_v50 = vmax.f32 %v5429_v35, 0.0  ;;  %v1863_v51 = vmax.f32 %v5493_v36, 0.0  ;;  %3262 = vmatprep.subr.bf16.mxu0 %v6277_v28  ;;  %3648 = vmatprep.subr.bf16.mxu1 %v6280_v30  ;;  %v6290_v35 = vld [vmem:[#allocation4 + $0x3a8] ss:$16 sps:$4 sm:$0xff]   ;;  %v6295_v36 = vld [vmem:[#allocation4 + $0x3c4] ss:$16 sps:$4 sm:$0xff]  }
 0x1f0   :  { %v1862_v55 = vmax.f32 %v5430_v41, 0.0  ;;  %v1864_v56 = vmax.f32 %v5494_v43, 0.0 }
 0x1f1   :  { %v2217_v58 = vpack.c.bf16 %v1861_v50, %v1857_v48  ;;  %v7328_v60 = vpack.c.bf16 %v1863_v51, %v1859_v49 }
 0x1f2   :  { %v2218_v61 = vpack.c.bf16 %v1862_v55, %v1858_v53  ;;  %v7330_v62 = vpack.c.bf16 %v1864_v56, %v1860_v54  ;;  %v1334_v63 = vpop.f32.mrb[28].mxu0  ;;  %v1720_v0 = vpop.f32.mrb[28].mxu1  ;;  %3263 = vmatpush1.bf16.msra.mxu0 %v6275_v45  ;;  %3649 = vmatpush1.bf16.msra.mxu1 %v6278_v46  ;;  %v6298_v45 = vld [vmem:[#allocation4 + $0x3cc] ss:$16 sps:$4 sm:$0xff]   ;;  %v6293_v56 = vld [vmem:[#allocation4 + $0x3c0] ss:$16 sps:$4 sm:$0xff]  }
 0x1f3   :  { %v5431_v6 = vadd.f32 %v1334_v63, %v7234_v9  ;;  %v5495_v13 = vadd.f32 %v1720_v0, %v7238_v10  ;;  %v1336_v15 = vpop.f32.mrb[29].mxu0  ;;  %v1722_v17 = vpop.f32.mrb[29].mxu1  ;;  %3264 = vmatprep.subr.bf16.mxu0 %v6283_v47  ;;  %3650 = vmatprep.subr.bf16.mxu1 %v6286_v52 }
 0x1f4   :  { %v5432_v22 = vadd.f32 %v1336_v15, %v7242_v11  ;;  %v5496_v23 = vadd.f32 %v1722_v17, %v7246_v12  ;;  %v1338_v24 = vpop.f32.mrb[30].mxu0  ;;  %v1724_v25 = vpop.f32.mrb[30].mxu1  ;;  %3139 = vmatprep.mubr.bf16.mxu0 %v2218_v61  ;;  %3525 = vmatprep.mubr.bf16.mxu1 %v2218_v61 }
 0x1f5   :  { %v5433_v26 = vadd.f32 %v1338_v24, %v7234_v9  ;;  %v5497_v28 = vadd.f32 %v1724_v25, %v7238_v10  ;;  %v1340_v30 = vpop.f32.mrb[31].mxu0  ;;  %v1726_v31 = vpop.f32.mrb[31].mxu1  ;;  %3140 = vmatmul.mubr.bf16.gmra.mrb[88].mxu0 %v2217_v58  ;;  %3526 = vmatmul.mubr.bf16.gmra.mrb[88].mxu1 %v2217_v58  ;;  %v1865_v37 = vmax.f32 %v5431_v6, 0.0  ;;  %v1867_v39 = vmax.f32 %v5495_v13, 0.0  ;;  %v6296_v58 = vld [vmem:[#allocation4 + $0x3c8] ss:$16 sps:$4 sm:$0xff]  }
 0x1f6   :  { %v5434_v32 = vadd.f32 %v1340_v30, %v7242_v11  ;;  %v5498_v33 = vadd.f32 %v1726_v31, %v7246_v12  ;;  %3265 = vmatpush1.bf16.msra.mxu0 %v6281_v1  ;;  %3651 = vmatpush1.bf16.msra.mxu1 %v6284_v2  ;;  %v1866_v46 = vmax.f32 %v5432_v22, 0.0  ;;  %v1868_v47 = vmax.f32 %v5496_v23, 0.0  ;;  %v6301_v2 = vld [vmem:[#allocation4 + $0x3e4] ss:$16 sps:$4 sm:$0xff]   ;;  %v6304_v6 = vld [vmem:[#allocation4 + $0x3ec] ss:$16 sps:$4 sm:$0xff]  }
 0x1f7   :  { %v1869_v41 = vmax.f32 %v5433_v26, 0.0  ;;  %v1871_v43 = vmax.f32 %v5497_v28, 0.0  ;;  %3266 = vmatprep.subr.bf16.mxu0 %v6289_v18  ;;  %3652 = vmatprep.subr.bf16.mxu1 %v6292_v20  ;;  %v6299_v28 = vld [vmem:[#allocation4 + $0x3e0] ss:$16 sps:$4 sm:$0xff]   ;;  %v6302_v30 = vld [vmem:[#allocation4 + $0x3e8] ss:$16 sps:$4 sm:$0xff]  }
 0x1f8   :  { %v1870_v48 = vmax.f32 %v5434_v32, 0.0  ;;  %v1872_v49 = vmax.f32 %v5498_v33, 0.0 }
 0x1f9   :  { %v2221_v50 = vpack.c.bf16 %v1869_v41, %v1865_v37  ;;  %v7340_v51 = vpack.c.bf16 %v1871_v43, %v1867_v39 }
 0x1fa   :  { %v2222_v52 = vpack.c.bf16 %v1870_v48, %v1866_v46  ;;  %v7342_v53 = vpack.c.bf16 %v1872_v49, %v1868_v47  ;;  %v1344_v54 = vpop.f32.mrb[32].mxu0  ;;  %v1730_v55 = vpop.f32.mrb[32].mxu1  ;;  %3267 = vmatpush1.bf16.msra.mxu0 %v6287_v34  ;;  %3653 = vmatpush1.bf16.msra.mxu1 %v6290_v35 }
 0x1fb   :  { %v5435_v61 = vadd.f32 %v1344_v54, %v7234_v9  ;;  %v5499_v63 = vadd.f32 %v1730_v55, %v7238_v10  ;;  %v1346_v0 = vpop.f32.mrb[33].mxu0  ;;  %v1732_v1 = vpop.f32.mrb[33].mxu1  ;;  %3268 = vmatprep.subr.bf16.mxu0 %v6295_v36  ;;  %3654 = vmatprep.subr.bf16.mxu1 %v6298_v45 }
 0x1fc   :  { %v5436_v13 = vadd.f32 %v1346_v0, %v7242_v11  ;;  %v5500_v15 = vadd.f32 %v1732_v1, %v7246_v12  ;;  %v1348_v17 = vpop.f32.mrb[34].mxu0  ;;  %v1734_v18 = vpop.f32.mrb[34].mxu1  ;;  %3149 = vmatprep.mubr.bf16.mxu0 %v2222_v52  ;;  %3535 = vmatprep.mubr.bf16.mxu1 %v2222_v52 }
 0x1fd   :  { %v5437_v20 = vadd.f32 %v1348_v17, %v7234_v9  ;;  %v5501_v22 = vadd.f32 %v1734_v18, %v7238_v10  ;;  %v1350_v23 = vpop.f32.mrb[35].mxu0  ;;  %v1736_v24 = vpop.f32.mrb[35].mxu1  ;;  %3150 = vmatmul.mubr.bf16.gmra.mrb[92].mxu0 %v2221_v50  ;;  %3536 = vmatmul.mubr.bf16.gmra.mrb[92].mxu1 %v2221_v50  ;;  %v1873_v31 = vmax.f32 %v5435_v61, 0.0  ;;  %v1875_v32 = vmax.f32 %v5499_v63, 0.0 }
 0x1fe   :  { %v5438_v25 = vadd.f32 %v1350_v23, %v7242_v11  ;;  %v5502_v26 = vadd.f32 %v1736_v24, %v7246_v12  ;;  %3269 = vmatpush1.bf16.msra.mxu0 %v6293_v56  ;;  %3655 = vmatpush1.bf16.msra.mxu1 %v6296_v58  ;;  %v1874_v35 = vmax.f32 %v5436_v13, 0.0  ;;  %v1876_v36 = vmax.f32 %v5500_v15, 0.0 }
 0x1ff   :  { %v1877_v33 = vmax.f32 %v5437_v20, 0.0  ;;  %v1879_v34 = vmax.f32 %v5501_v22, 0.0  ;;  %3270 = vmatprep.subr.bf16.mxu0 %v6301_v2  ;;  %3656 = vmatprep.subr.bf16.mxu1 %v6304_v6 }
 0x200   :  { %v1878_v37 = vmax.f32 %v5438_v25, 0.0  ;;  %v1880_v39 = vmax.f32 %v5502_v26, 0.0 }
 0x201   :  { %v2225_v41 = vpack.c.bf16 %v1877_v33, %v1873_v31  ;;  %v7352_v43 = vpack.c.bf16 %v1879_v34, %v1875_v32 }
 0x202   :  { %v2226_v45 = vpack.c.bf16 %v1878_v37, %v1874_v35  ;;  %v7354_v46 = vpack.c.bf16 %v1880_v39, %v1876_v36  ;;  %v1354_v47 = vpop.f32.mrb[36].mxu0  ;;  %v1740_v48 = vpop.f32.mrb[36].mxu1  ;;  %3271 = vmatpush1.bf16.msra.mxu0 %v6299_v28  ;;  %3657 = vmatpush1.bf16.msra.mxu1 %v6302_v30 }
 0x203   :  { %v5439_v49 = vadd.f32 %v1354_v47, %v7234_v9  ;;  %v5503_v50 = vadd.f32 %v1740_v48, %v7238_v10  ;;  %v1356_v52 = vpop.f32.mrb[37].mxu0  ;;  %v1742_v54 = vpop.f32.mrb[37].mxu1 }
 0x204   :  { %v5440_v55 = vadd.f32 %v1356_v52, %v7242_v11  ;;  %v5504_v56 = vadd.f32 %v1742_v54, %v7246_v12  ;;  %v1358_v58 = vpop.f32.mrb[38].mxu0  ;;  %v1744_v61 = vpop.f32.mrb[38].mxu1  ;;  %3159 = vmatprep.mubr.bf16.mxu0 %v2226_v45  ;;  %3545 = vmatprep.mubr.bf16.mxu1 %v2226_v45 }
 0x205   :  { %v5441_v63 = vadd.f32 %v1358_v58, %v7234_v9  ;;  %v5505_v0 = vadd.f32 %v1744_v61, %v7238_v10  ;;  %v1360_v1 = vpop.f32.mrb[39].mxu0  ;;  %v1746_v2 = vpop.f32.mrb[39].mxu1  ;;  %3160 = vmatmul.mubr.bf16.gmra.mrb[96].mxu0 %v2225_v41  ;;  %3546 = vmatmul.mubr.bf16.gmra.mrb[96].mxu1 %v2225_v41  ;;  %v1881_v15 = vmax.f32 %v5439_v49, 0.0  ;;  %v1883_v17 = vmax.f32 %v5503_v50, 0.0 }
 0x206   :  { %v5442_v6 = vadd.f32 %v1360_v1, %v7242_v11  ;;  %v5506_v13 = vadd.f32 %v1746_v2, %v7246_v12  ;;  %v1882_v22 = vmax.f32 %v5440_v55, 0.0  ;;  %v1884_v23 = vmax.f32 %v5504_v56, 0.0 }
 0x207   :  { %v1885_v18 = vmax.f32 %v5441_v63, 0.0  ;;  %v1887_v20 = vmax.f32 %v5505_v0, 0.0 }
 0x208   :  { %v1886_v24 = vmax.f32 %v5442_v6, 0.0  ;;  %v1888_v25 = vmax.f32 %v5506_v13, 0.0 }
 0x209   :  { %v2229_v26 = vpack.c.bf16 %v1885_v18, %v1881_v15  ;;  %v7364_v28 = vpack.c.bf16 %v1887_v20, %v1883_v17 }
 0x20a   :  { %v2230_v30 = vpack.c.bf16 %v1886_v24, %v1882_v22  ;;  %v7366_v31 = vpack.c.bf16 %v1888_v25, %v1884_v23  ;;  %v1364_v32 = vpop.f32.mrb[40].mxu0  ;;  %v1750_v33 = vpop.f32.mrb[40].mxu1 }
 0x20b   :  { %v5443_v34 = vadd.f32 %v1364_v32, %v7234_v9  ;;  %v5507_v35 = vadd.f32 %v1750_v33, %v7238_v10  ;;  %v1366_v36 = vpop.f32.mrb[41].mxu0  ;;  %v1752_v37 = vpop.f32.mrb[41].mxu1 }
 0x20c   :  { %v5444_v39 = vadd.f32 %v1366_v36, %v7242_v11  ;;  %v5508_v41 = vadd.f32 %v1752_v37, %v7246_v12  ;;  %v1368_v45 = vpop.f32.mrb[42].mxu0  ;;  %v1754_v47 = vpop.f32.mrb[42].mxu1  ;;  %3169 = vmatprep.mubr.bf16.mxu0 %v2230_v30  ;;  %3555 = vmatprep.mubr.bf16.mxu1 %v2230_v30 }
 0x20d   :  { %v5445_v48 = vadd.f32 %v1368_v45, %v7234_v9  ;;  %v5509_v49 = vadd.f32 %v1754_v47, %v7238_v10  ;;  %v1370_v50 = vpop.f32.mrb[43].mxu0  ;;  %v1756_v52 = vpop.f32.mrb[43].mxu1  ;;  %3170 = vmatmul.mubr.bf16.gmra.mrb[100].mxu0 %v2229_v26  ;;  %3556 = vmatmul.mubr.bf16.gmra.mrb[100].mxu1 %v2229_v26  ;;  %v1889_v56 = vmax.f32 %v5443_v34, 0.0  ;;  %v1891_v58 = vmax.f32 %v5507_v35, 0.0 }
 0x20e   :  { %v5446_v54 = vadd.f32 %v1370_v50, %v7242_v11  ;;  %v5510_v55 = vadd.f32 %v1756_v52, %v7246_v12  ;;  %v1890_v0 = vmax.f32 %v5444_v39, 0.0  ;;  %v1892_v1 = vmax.f32 %v5508_v41, 0.0 }
 0x20f   :  { %v1893_v61 = vmax.f32 %v5445_v48, 0.0  ;;  %v1895_v63 = vmax.f32 %v5509_v49, 0.0 }
 0x210   :  { %v1894_v2 = vmax.f32 %v5446_v54, 0.0  ;;  %v1896_v6 = vmax.f32 %v5510_v55, 0.0 }
 0x211   :  { %v2233_v13 = vpack.c.bf16 %v1893_v61, %v1889_v56  ;;  %v7376_v15 = vpack.c.bf16 %v1895_v63, %v1891_v58 }
 0x212   :  { %v2234_v17 = vpack.c.bf16 %v1894_v2, %v1890_v0  ;;  %v7378_v18 = vpack.c.bf16 %v1896_v6, %v1892_v1  ;;  %v1374_v20 = vpop.f32.mrb[44].mxu0  ;;  %v1760_v22 = vpop.f32.mrb[44].mxu1 }
 0x213   :  { %v5447_v23 = vadd.f32 %v1374_v20, %v7234_v9  ;;  %v5511_v24 = vadd.f32 %v1760_v22, %v7238_v10  ;;  %v1376_v25 = vpop.f32.mrb[45].mxu0  ;;  %v1762_v26 = vpop.f32.mrb[45].mxu1 }
 0x214   :  { %v5448_v30 = vadd.f32 %v1376_v25, %v7242_v11  ;;  %v5512_v32 = vadd.f32 %v1762_v26, %v7246_v12  ;;  %v1378_v33 = vpop.f32.mrb[46].mxu0  ;;  %v1764_v34 = vpop.f32.mrb[46].mxu1  ;;  %3179 = vmatprep.mubr.bf16.mxu0 %v2234_v17  ;;  %3565 = vmatprep.mubr.bf16.mxu1 %v2234_v17 }
 0x215   :  { %v5449_v35 = vadd.f32 %v1378_v33, %v7234_v9  ;;  %v5513_v36 = vadd.f32 %v1764_v34, %v7238_v10  ;;  %v1380_v37 = vpop.f32.mrb[47].mxu0  ;;  %v1766_v39 = vpop.f32.mrb[47].mxu1  ;;  %3180 = vmatmul.mubr.bf16.gmra.mrb[104].mxu0 %v2233_v13  ;;  %3566 = vmatmul.mubr.bf16.gmra.mrb[104].mxu1 %v2233_v13  ;;  %v1897_v47 = vmax.f32 %v5447_v23, 0.0  ;;  %v1899_v48 = vmax.f32 %v5511_v24, 0.0 }
 0x216   :  { %v5450_v41 = vadd.f32 %v1380_v37, %v7242_v11  ;;  %v5514_v45 = vadd.f32 %v1766_v39, %v7246_v12  ;;  %v1898_v52 = vmax.f32 %v5448_v30, 0.0  ;;  %v1900_v54 = vmax.f32 %v5512_v32, 0.0 }
 0x217   :  { %v1901_v49 = vmax.f32 %v5449_v35, 0.0  ;;  %v1903_v50 = vmax.f32 %v5513_v36, 0.0  ;;  %v6305_v36 = vld [vmem:[#allocation6 + $0x40] sm:$0xff]  }
 0x218   :  { %v1902_v55 = vmax.f32 %v5450_v41, 0.0  ;;  %v1904_v56 = vmax.f32 %v5514_v45, 0.0  ;;  %5179 = vmatprep.subr.bf16.mxu0 %v6305_v36 }
 0x219   :  { %v2237_v58 = vpack.c.bf16 %v1901_v49, %v1897_v47  ;;  %v7388_v61 = vpack.c.bf16 %v1903_v50, %v1899_v48 }
 0x21a   :  { %v2238_v63 = vpack.c.bf16 %v1902_v55, %v1898_v52  ;;  %v7390_v0 = vpack.c.bf16 %v1904_v56, %v1900_v54  ;;  %v1384_v1 = vpop.f32.mrb[48].mxu0  ;;  %v1770_v2 = vpop.f32.mrb[48].mxu1 }
 0x21b   :  { %v5451_v6 = vadd.f32 %v1384_v1, %v7234_v9  ;;  %v5515_v13 = vadd.f32 %v1770_v2, %v7238_v10  ;;  %v1386_v17 = vpop.f32.mrb[49].mxu0  ;;  %v1772_v20 = vpop.f32.mrb[49].mxu1 }
 0x21c   :  { %v5452_v22 = vadd.f32 %v1386_v17, %v7242_v11  ;;  %v5516_v23 = vadd.f32 %v1772_v20, %v7246_v12  ;;  %v1388_v24 = vpop.f32.mrb[50].mxu0  ;;  %v1774_v25 = vpop.f32.mrb[50].mxu1  ;;  %3189 = vmatprep.mubr.bf16.mxu0 %v2238_v63  ;;  %3575 = vmatprep.mubr.bf16.mxu1 %v2238_v63 }
 0x21d   :  { %v5453_v26 = vadd.f32 %v1388_v24, %v7234_v9  ;;  %v5517_v30 = vadd.f32 %v1774_v25, %v7238_v10  ;;  %v1390_v32 = vpop.f32.mrb[51].mxu0  ;;  %v1776_v33 = vpop.f32.mrb[51].mxu1  ;;  %3190 = vmatmul.mubr.bf16.gmra.mrb[108].mxu0 %v2237_v58  ;;  %3576 = vmatmul.mubr.bf16.gmra.mrb[108].mxu1 %v2237_v58  ;;  %v1905_v37 = vmax.f32 %v5451_v6, 0.0  ;;  %v1907_v39 = vmax.f32 %v5515_v13, 0.0 }
 0x21e   :  { %v5454_v34 = vadd.f32 %v1390_v32, %v7242_v11  ;;  %v5518_v35 = vadd.f32 %v1776_v33, %v7246_v12  ;;  %v1906_v47 = vmax.f32 %v5452_v22, 0.0  ;;  %v1908_v48 = vmax.f32 %v5516_v23, 0.0  ;;  %v6307_v32 = vld [vmem:[#allocation6 + $0xc0] sm:$0xff]  }
 0x21f   :  { %v1909_v41 = vmax.f32 %v5453_v26, 0.0  ;;  %v1911_v45 = vmax.f32 %v5517_v30, 0.0  ;;  %5291 = vmatprep.subr.bf16.mxu1 %v6307_v32 }
 0x220   :  { %v1910_v49 = vmax.f32 %v5454_v34, 0.0  ;;  %v1912_v50 = vmax.f32 %v5518_v35, 0.0 }
 0x221   :  { %v2241_v52 = vpack.c.bf16 %v1909_v41, %v1905_v37  ;;  %v7400_v54 = vpack.c.bf16 %v1911_v45, %v1907_v39 }
 0x222   :  { %v2242_v55 = vpack.c.bf16 %v1910_v49, %v1906_v47  ;;  %v7402_v56 = vpack.c.bf16 %v1912_v50, %v1908_v48  ;;  %v1394_v58 = vpop.f32.mrb[52].mxu0  ;;  %v1780_v63 = vpop.f32.mrb[52].mxu1 }
 0x223   :  { %v5455_v1 = vadd.f32 %v1394_v58, %v7234_v9  ;;  %v5519_v2 = vadd.f32 %v1780_v63, %v7238_v10  ;;  %v1396_v6 = vpop.f32.mrb[53].mxu0  ;;  %v1782_v13 = vpop.f32.mrb[53].mxu1 }
 0x224   :  { %v5456_v17 = vadd.f32 %v1396_v6, %v7242_v11  ;;  %v5520_v20 = vadd.f32 %v1782_v13, %v7246_v12  ;;  %v1398_v22 = vpop.f32.mrb[54].mxu0  ;;  %v1784_v23 = vpop.f32.mrb[54].mxu1  ;;  %3199 = vmatprep.mubr.bf16.mxu0 %v2242_v55  ;;  %3585 = vmatprep.mubr.bf16.mxu1 %v2242_v55 }
 0x225   :  { %v5457_v24 = vadd.f32 %v1398_v22, %v7234_v9  ;;  %v5521_v25 = vadd.f32 %v1784_v23, %v7238_v10  ;;  %v1400_v26 = vpop.f32.mrb[55].mxu0  ;;  %v1786_v30 = vpop.f32.mrb[55].mxu1  ;;  %3200 = vmatmul.mubr.bf16.gmra.mrb[112].mxu0 %v2241_v52  ;;  %3586 = vmatmul.mubr.bf16.gmra.mrb[112].mxu1 %v2241_v52  ;;  %v1913_v35 = vmax.f32 %v5455_v1, 0.0  ;;  %v1915_v36 = vmax.f32 %v5519_v2, 0.0 }
 0x226   :  { %v5458_v33 = vadd.f32 %v1400_v26, %v7242_v11  ;;  %v5522_v34 = vadd.f32 %v1786_v30, %v7246_v12  ;;  %v1914_v41 = vmax.f32 %v5456_v17, 0.0  ;;  %v1916_v45 = vmax.f32 %v5520_v20, 0.0 }
 0x227   :  { %v1917_v37 = vmax.f32 %v5457_v24, 0.0  ;;  %v1919_v39 = vmax.f32 %v5521_v25, 0.0 }
 0x228   :  { %v1918_v47 = vmax.f32 %v5458_v33, 0.0  ;;  %v1920_v48 = vmax.f32 %v5522_v34, 0.0 }
 0x229   :  { %v2245_v49 = vpack.c.bf16 %v1917_v37, %v1913_v35  ;;  %v7412_v50 = vpack.c.bf16 %v1919_v39, %v1915_v36 }
 0x22a   :  { %v2246_v55 = vpack.c.bf16 %v1918_v47, %v1914_v41  ;;  %v7414_v58 = vpack.c.bf16 %v1920_v48, %v1916_v45  ;;  %v1404_v52 = vpop.f32.mrb[56].mxu0  ;;  %v1790_v63 = vpop.f32.mrb[56].mxu1 }
 0x22b   :  { %v5459_v6 = vadd.f32 %v1404_v52, %v7234_v9  ;;  %v5523_v1 = vadd.f32 %v1790_v63, %v7238_v10  ;;  %v1406_v2 = vpop.f32.mrb[57].mxu0  ;;  %v1792_v13 = vpop.f32.mrb[57].mxu1 }
 0x22c   :  { %v5460_v22 = vadd.f32 %v1406_v2, %v7242_v11  ;;  %v5524_v17 = vadd.f32 %v1792_v13, %v7246_v12  ;;  %v1408_v20 = vpop.f32.mrb[58].mxu0  ;;  %v1794_v23 = vpop.f32.mrb[58].mxu1  ;;  %3209 = vmatprep.mubr.bf16.mxu0 %v2246_v55  ;;  %3595 = vmatprep.mubr.bf16.mxu1 %v2246_v55 }
 0x22d   :  { %v5461_v24 = vadd.f32 %v1408_v20, %v7234_v9  ;;  %v5525_v25 = vadd.f32 %v1794_v23, %v7238_v10  ;;  %v1410_v26 = vpop.f32.mrb[59].mxu0  ;;  %v1796_v30 = vpop.f32.mrb[59].mxu1  ;;  %3210 = vmatmul.mubr.bf16.gmra.mrb[116].mxu0 %v2245_v49  ;;  %3596 = vmatmul.mubr.bf16.gmra.mrb[116].mxu1 %v2245_v49  ;;  %v1921_v34 = vmax.f32 %v5459_v6, 0.0  ;;  %v1923_v35 = vmax.f32 %v5523_v1, 0.0 }
 0x22e   :  { %v5462_v32 = vadd.f32 %v1410_v26, %v7242_v11  ;;  %v5526_v33 = vadd.f32 %v1796_v30, %v7246_v12  ;;  %v1922_v39 = vmax.f32 %v5460_v22, 0.0  ;;  %v1924_v41 = vmax.f32 %v5524_v17, 0.0 }
 0x22f   :  { %v1925_v36 = vmax.f32 %v5461_v24, 0.0  ;;  %v1927_v37 = vmax.f32 %v5525_v25, 0.0 }
 0x230   :  { %v1926_v45 = vmax.f32 %v5462_v32, 0.0  ;;  %v1928_v47 = vmax.f32 %v5526_v33, 0.0 }
 0x231   :  { %v2249_v48 = vpack.c.bf16 %v1925_v36, %v1921_v34  ;;  %v7424_v55 = vpack.c.bf16 %v1927_v37, %v1923_v35 }
 0x232   :  { %v2250_v52 = vpack.c.bf16 %v1926_v45, %v1922_v39  ;;  %v7426_v63 = vpack.c.bf16 %v1928_v47, %v1924_v41  ;;  %v1414_v2 = vpop.f32.mrb[60].mxu0  ;;  %v1800_v49 = vpop.f32.mrb[60].mxu1 }
 0x233   :  { %v5463_v13 = vadd.f32 %v1414_v2, %v7234_v9  ;;  %v5527_v20 = vadd.f32 %v1800_v49, %v7238_v10  ;;  %v1416_v6 = vpop.f32.mrb[61].mxu0  ;;  %v1802_v1 = vpop.f32.mrb[61].mxu1 }
 0x234   :  { %v5464_v23 = vadd.f32 %v1416_v6, %v7242_v11  ;;  %v5528_v22 = vadd.f32 %v1802_v1, %v7246_v12  ;;  %v1418_v17 = vpop.f32.mrb[62].mxu0  ;;  %v1804_v24 = vpop.f32.mrb[62].mxu1  ;;  %3219 = vmatprep.mubr.bf16.mxu0 %v2250_v52  ;;  %3605 = vmatprep.mubr.bf16.mxu1 %v2250_v52  ;;  %v6312_v6 = vld [vmem:[#allocation6 + $0x88] sm:$0xff]   ;;  %v6313_v1 = vld [vmem:[#allocation6 + $0x50] sm:$0xff]  }
 0x235   :  { %v5465_v25 = vadd.f32 %v1418_v17, %v7234_v9  ;;  %v5529_v26 = vadd.f32 %v1804_v24, %v7238_v10  ;;  %v1420_v30 = vpop.f32.mrb[63].mxu0  ;;  %v1806_v32 = vpop.f32.mrb[63].mxu1  ;;  %3220 = vmatmul.mubr.bf16.gmra.mrb[120].mxu0 %v2249_v48  ;;  %3606 = vmatmul.mubr.bf16.gmra.mrb[120].mxu1 %v2249_v48  ;;  %v1929_v35 = vmax.f32 %v5463_v13, 0.0  ;;  %v1931_v36 = vmax.f32 %v5527_v20, 0.0  ;;  %v6309_v48 = vld [vmem:[#allocation6 + $0x48] sm:$0xff]   ;;  %v6317_v17 = vld [vmem:[#allocation6 + $0x58] sm:$0xff]  }
 0x236   :  { %v5466_v33 = vadd.f32 %v1420_v30, %v7242_v11  ;;  %v5530_v34 = vadd.f32 %v1806_v32, %v7246_v12  ;;  %v1930_v41 = vmax.f32 %v5464_v23, 0.0  ;;  %v1932_v45 = vmax.f32 %v5528_v22, 0.0  ;;  %v6306_v11 = vld [vmem:[#allocation6] sm:$0xff]   ;;  %v6311_v13 = vld [vmem:[#allocation6 + $0xc8] sm:$0xff]   ;;  %v6314_v23 = vld [vmem:[#allocation6 + $0x10] sm:$0xff]  }
 0x237   :  { %v1933_v37 = vmax.f32 %v5465_v25, 0.0  ;;  %v1935_v39 = vmax.f32 %v5529_v26, 0.0  ;;  %v6308_v12 = vld [vmem:[#allocation6 + $0x80] sm:$0xff]   ;;  %v6310_v20 = vld [vmem:[#allocation6 + $0x8] sm:$0xff]   ;;  %v6316_v22 = vld [vmem:[#allocation6 + $0x90] sm:$0xff]  }
 0x238   :  { %v1934_v47 = vmax.f32 %v5466_v33, 0.0  ;;  %v1936_v52 = vmax.f32 %v5530_v34, 0.0  ;;  %v6320_v24 = vld [vmem:[#allocation6 + $0x98] sm:$0xff]   ;;  %v6321_v25 = vld [vmem:[#allocation6 + $0x60] sm:$0xff]   ;;  %v6325_v33 = vld [vmem:[#allocation6 + $0x68] sm:$0xff]  }
 0x239   :  { %v2253_v2 = vpack.c.bf16 %v1933_v37, %v1929_v35  ;;  %v7436_v9 = vpack.c.bf16 %v1935_v39, %v1931_v36  ;;  %v6323_v26 = vld [vmem:[#allocation6 + $0xe0] sm:$0xff]   ;;  %v6328_v34 = vld [vmem:[#allocation6 + $0xa8] sm:$0xff]   ;;  %v6329_v35 = vld [vmem:[#allocation6 + $0x70] sm:$0xff]  }
 0x23a   :  { %v2254_v10 = vpack.c.bf16 %v1934_v47, %v1930_v41  ;;  %v7438_v49 = vpack.c.bf16 %v1936_v52, %v1932_v45  ;;  %v6322_v30 = vld [vmem:[#allocation6 + $0x20] sm:$0xff]   ;;  %v6331_v36 = vld [vmem:[#allocation6 + $0xf0] sm:$0xff]   ;;  %v6333_v41 = vld [vmem:[#allocation6 + $0x78] sm:$0xff]  }
 0x23b   :  { %v6324_v32 = vld [vmem:[#allocation6 + $0xa0] sm:$0xff]   ;;  %v6330_v37 = vld [vmem:[#allocation6 + $0x30] sm:$0xff]   ;;  %v6336_v45 = vld [vmem:[#allocation6 + $0xb8] sm:$0xff]  }
 0x23c   :  { %3229 = vmatprep.mubr.bf16.mxu0 %v2254_v10  ;;  %3615 = vmatprep.mubr.bf16.mxu1 %v2254_v10  ;;  %v6332_v39 = vld [vmem:[#allocation6 + $0xb0] sm:$0xff]  }
 0x23d   :  { %3230 = vmatmul.mubr.bf16.gmra.mrb[124].mxu0 %v2253_v2  ;;  %3616 = vmatmul.mubr.bf16.gmra.mrb[124].mxu1 %v2253_v2 }
 0x23e   :  { %3272 = vmatprep.mubr.bf16.mxu0 %v7258_v40  ;;  %3658 = vmatprep.mubr.bf16.mxu1 %v7258_v40  ;;  %v6315_v40 = vld [vmem:[#allocation6 + $0xd0] sm:$0xff]  }
 0x245   :  { %3273 = vmatmul.mubr.bf16.vlgmr.msra.gmra.mrb[64].mxu0 %v7256_v38  ;;  %3659 = vmatmul.mubr.bf16.vlgmr.msra.gmra.mrb[64].mxu1 %v7256_v38  ;;  %v6319_v38 = vld [vmem:[#allocation6 + $0xd8] sm:$0xff]  }
 0x246   :  { %3282 = vmatprep.mubr.bf16.mxu0 %v7270_v21  ;;  %3668 = vmatprep.mubr.bf16.mxu1 %v7270_v21  ;;  %v6318_v21 = vld [vmem:[#allocation6 + $0x18] sm:$0xff]  }
 0x247   :  { %5180 = vmatpush3.bf16.msra.mxu0 %v6306_v11  ;;  %5292 = vmatpush3.bf16.msra.mxu1 %v6308_v12 }
 0x248   :  { %5181 = vmatprep.subr.bf16.mxu0 %v6309_v48  ;;  %5293 = vmatprep.subr.bf16.mxu1 %v6311_v13 }
 0x24b   :  { %5182 = vmatpush3.bf16.msra.mxu0 %v6310_v20  ;;  %5294 = vmatpush3.bf16.msra.mxu1 %v6312_v6 }
 0x24c   :  { %5183 = vmatprep.subr.bf16.mxu0 %v6313_v1  ;;  %5295 = vmatprep.subr.bf16.mxu1 %v6315_v40 }
 0x24d   :  { %3283 = vmatmul.mubr.bf16.gmra.mrb[68].mxu0 %v7268_v19  ;;  %3669 = vmatmul.mubr.bf16.gmra.mrb[68].mxu1 %v7268_v19  ;;  %v6327_v19 = vld [vmem:[#allocation6 + $0xe8] sm:$0xff]  }
 0x24e   :  { %3292 = vmatprep.mubr.bf16.mxu0 %v7282_v59  ;;  %3678 = vmatprep.mubr.bf16.mxu1 %v7282_v59  ;;  %v6326_v59 = vld [vmem:[#allocation6 + $0x28] sm:$0xff]  }
 0x24f   :  { %5184 = vmatpush3.bf16.msra.mxu0 %v6314_v23  ;;  %5296 = vmatpush3.bf16.msra.mxu1 %v6316_v22 }
 0x250   :  { %5185 = vmatprep.subr.bf16.mxu0 %v6317_v17  ;;  %5297 = vmatprep.subr.bf16.mxu1 %v6319_v38 }
 0x253   :  { %5186 = vmatpush3.bf16.msra.mxu0 %v6318_v21  ;;  %5298 = vmatpush3.bf16.msra.mxu1 %v6320_v24 }
 0x254   :  { %5187 = vmatprep.subr.bf16.mxu0 %v6321_v25  ;;  %5299 = vmatprep.subr.bf16.mxu1 %v6323_v26 }
 0x255   :  { %3293 = vmatmul.mubr.bf16.gmra.mrb[72].mxu0 %v7280_v57  ;;  %3679 = vmatmul.mubr.bf16.gmra.mrb[72].mxu1 %v7280_v57  ;;  %v6335_v57 = vld [vmem:[#allocation6 + $0xf8] sm:$0xff]  }
 0x256   :  { %3302 = vmatprep.mubr.bf16.mxu0 %v7294_v44  ;;  %3688 = vmatprep.mubr.bf16.mxu1 %v7294_v44  ;;  %v6334_v44 = vld [vmem:[#allocation6 + $0x38] sm:$0xff]  }
 0x257   :  { %5188 = vmatpush3.bf16.msra.mxu0 %v6322_v30  ;;  %5300 = vmatpush3.bf16.msra.mxu1 %v6324_v32 }
 0x258   :  { %5189 = vmatprep.subr.bf16.mxu0 %v6325_v33  ;;  %5301 = vmatprep.subr.bf16.mxu1 %v6327_v19 }
 0x25b   :  { %5190 = vmatpush3.bf16.msra.mxu0 %v6326_v59  ;;  %5302 = vmatpush3.bf16.msra.mxu1 %v6328_v34 }
 0x25c   :  { %5191 = vmatprep.subr.bf16.mxu0 %v6329_v35  ;;  %5303 = vmatprep.subr.bf16.mxu1 %v6331_v36 }
 0x25d   :  { %3303 = vmatmul.mubr.bf16.gmra.mrb[76].mxu0 %v7292_v42  ;;  %3689 = vmatmul.mubr.bf16.gmra.mrb[76].mxu1 %v7292_v42  ;;  %v2385_v42 = vld [vmem:[%s7788_s4] sm:$0xf] }
 0x25e   :  { %3312 = vmatprep.mubr.bf16.mxu0 %v7306_v29  ;;  %3698 = vmatprep.mubr.bf16.mxu1 %v7306_v29  ;;  %v7513_v29 = vrot.slane %v2385_v42, %v387_v5 }
 0x25f   :  { %5192 = vmatpush3.bf16.msra.mxu0 %v6330_v37  ;;  %5304 = vmatpush3.bf16.msra.mxu1 %v6332_v39 }
 0x260   :  { %5193 = vmatprep.subr.bf16.mxu0 %v6333_v41  ;;  %5305 = vmatprep.subr.bf16.mxu1 %v6335_v57 }
 0x263   :  { %5194 = vmatpush3.bf16.msra.mxu0 %v6334_v44  ;;  %5306 = vmatpush3.bf16.msra.mxu1 %v6336_v45 }
 0x265   :  { %3313 = vmatmul.mubr.bf16.gmra.mrb[80].mxu0 %v7304_v27  ;;  %3699 = vmatmul.mubr.bf16.gmra.mrb[80].mxu1 %v7304_v27  ;;  %v7509_v27 = vrot.slane %v2385_v42, %v379_v4 }
 0x266   :  { %3322 = vmatprep.mubr.bf16.mxu0 %v7318_v16  ;;  %3708 = vmatprep.mubr.bf16.mxu1 %v7318_v16  ;;  %v7521_v16 = vrot.slane %v2385_v42, %v391_v8 }
 0x26d   :  { %3323 = vmatmul.mubr.bf16.gmra.mrb[84].mxu0 %v7316_v14  ;;  %3709 = vmatmul.mubr.bf16.gmra.mrb[84].mxu1 %v7316_v14  ;;  %v7517_v14 = vrot.slane %v2385_v42, %v383_v7 }
 0x26e   :  { %3332 = vmatprep.mubr.bf16.mxu0 %v7330_v62  ;;  %3718 = vmatprep.mubr.bf16.mxu1 %v7330_v62 }
 0x275   :  { %3333 = vmatmul.mubr.bf16.gmra.mrb[88].mxu0 %v7328_v60  ;;  %3719 = vmatmul.mubr.bf16.gmra.mrb[88].mxu1 %v7328_v60 }
 0x276   :  { %3342 = vmatprep.mubr.bf16.mxu0 %v7342_v53  ;;  %3728 = vmatprep.mubr.bf16.mxu1 %v7342_v53 }
 0x27d   :  { %3343 = vmatmul.mubr.bf16.gmra.mrb[92].mxu0 %v7340_v51  ;;  %3729 = vmatmul.mubr.bf16.gmra.mrb[92].mxu1 %v7340_v51 }
 0x27e   :  { %3352 = vmatprep.mubr.bf16.mxu0 %v7354_v46  ;;  %3738 = vmatprep.mubr.bf16.mxu1 %v7354_v46 }
 0x285   :  { %3353 = vmatmul.mubr.bf16.gmra.mrb[96].mxu0 %v7352_v43  ;;  %3739 = vmatmul.mubr.bf16.gmra.mrb[96].mxu1 %v7352_v43 }
 0x286   :  { %3362 = vmatprep.mubr.bf16.mxu0 %v7366_v31  ;;  %3748 = vmatprep.mubr.bf16.mxu1 %v7366_v31 }
 0x28d   :  { %3363 = vmatmul.mubr.bf16.gmra.mrb[100].mxu0 %v7364_v28  ;;  %3749 = vmatmul.mubr.bf16.gmra.mrb[100].mxu1 %v7364_v28 }
 0x28e   :  { %3372 = vmatprep.mubr.bf16.mxu0 %v7378_v18  ;;  %3758 = vmatprep.mubr.bf16.mxu1 %v7378_v18 }
 0x295   :  { %3373 = vmatmul.mubr.bf16.gmra.mrb[104].mxu0 %v7376_v15  ;;  %3759 = vmatmul.mubr.bf16.gmra.mrb[104].mxu1 %v7376_v15 }
 0x296   :  { %3382 = vmatprep.mubr.bf16.mxu0 %v7390_v0  ;;  %3768 = vmatprep.mubr.bf16.mxu1 %v7390_v0 }
 0x29d   :  { %3383 = vmatmul.mubr.bf16.gmra.mrb[108].mxu0 %v7388_v61  ;;  %3769 = vmatmul.mubr.bf16.gmra.mrb[108].mxu1 %v7388_v61 }
 0x29e   :  { %3392 = vmatprep.mubr.bf16.mxu0 %v7402_v56  ;;  %3778 = vmatprep.mubr.bf16.mxu1 %v7402_v56 }
 0x2a5   :  { %3393 = vmatmul.mubr.bf16.gmra.mrb[112].mxu0 %v7400_v54  ;;  %3779 = vmatmul.mubr.bf16.gmra.mrb[112].mxu1 %v7400_v54 }
 0x2a6   :  { %3402 = vmatprep.mubr.bf16.mxu0 %v7414_v58  ;;  %3788 = vmatprep.mubr.bf16.mxu1 %v7414_v58 }
 0x2ad   :  { %3403 = vmatmul.mubr.bf16.gmra.mrb[116].mxu0 %v7412_v50  ;;  %3789 = vmatmul.mubr.bf16.gmra.mrb[116].mxu1 %v7412_v50 }
 0x2ae   :  { %3412 = vmatprep.mubr.bf16.mxu0 %v7426_v63  ;;  %3798 = vmatprep.mubr.bf16.mxu1 %v7426_v63 }
 0x2b5   :  { %3413 = vmatmul.mubr.bf16.gmra.mrb[120].mxu0 %v7424_v55  ;;  %3799 = vmatmul.mubr.bf16.gmra.mrb[120].mxu1 %v7424_v55 }
 0x2b6   :  { %3422 = vmatprep.mubr.bf16.mxu0 %v7438_v49  ;;  %3808 = vmatprep.mubr.bf16.mxu1 %v7438_v49 }
 0x2bd   :  { %3423 = vmatmul.mubr.bf16.gmra.mrb[124].mxu0 %v7436_v9  ;;  %3809 = vmatmul.mubr.bf16.gmra.mrb[124].mxu1 %v7436_v9 }
 0x318   :  { %v3274_v60 = vpop.f32.mrb[64].mxu0  ;;  %v3660_v62 = vpop.f32.mrb[64].mxu1 }
 0x319   :  { %v5531_v51 = vadd.f32 %v3274_v60, %v7509_v27  ;;  %v5595_v53 = vadd.f32 %v3660_v62, %v7513_v29  ;;  %v3276_v4 = vpop.f32.mrb[65].mxu0  ;;  %v3662_v43 = vpop.f32.mrb[65].mxu1 }
 0x31a   :  { %v5532_v46 = vadd.f32 %v3276_v4, %v7517_v14  ;;  %v5596_v5 = vadd.f32 %v3662_v43, %v7521_v16  ;;  %v3278_v28 = vpop.f32.mrb[66].mxu0  ;;  %v3664_v31 = vpop.f32.mrb[66].mxu1 }
 0x31b   :  { %v5533_v7 = vadd.f32 %v3278_v28, %v7509_v27  ;;  %v5597_v3 = vadd.f32 %v3664_v31, %v7513_v29  ;;  %v3280_v8 = vpop.f32.mrb[67].mxu0  ;;  %v3666_v15 = vpop.f32.mrb[67].mxu1  ;;  %v3819_v0 = vmax.f32 %v5531_v51, 0.0  ;;  %v3821_v54 = vmax.f32 %v5595_v53, 0.0 }
 0x31c   :  { %v5534_v18 = vadd.f32 %v3280_v8, %v7517_v14  ;;  %v5598_v61 = vadd.f32 %v3666_v15, %v7521_v16  ;;  %v3820_v58 = vmax.f32 %v5532_v46, 0.0  ;;  %v3822_v55 = vmax.f32 %v5596_v5, 0.0 }
 0x31d   :  { %v3823_v56 = vmax.f32 %v5533_v7, 0.0  ;;  %v3825_v50 = vmax.f32 %v5597_v3, 0.0 }
 0x31e   :  { %v3824_v63 = vmax.f32 %v5534_v18, 0.0  ;;  %v3826_v47 = vmax.f32 %v5598_v61, 0.0 }
 0x31f   :  { %v4203_v52 = vpack.c.bf16 %v3823_v56, %v3819_v0  ;;  %v4205_v2 = vpack.c.bf16 %v3825_v50, %v3821_v54 }
 0x320   :  { %v4204_v9 = vpack.c.bf16 %v3824_v63, %v3820_v58  ;;  %v4206_v10 = vpack.c.bf16 %v3826_v47, %v3822_v55  ;;  %v3284_v49 = vpop.f32.mrb[68].mxu0  ;;  %v3670_v11 = vpop.f32.mrb[68].mxu1 }
 0x321   :  { %v5535_v12 = vadd.f32 %v3284_v49, %v7509_v27  ;;  %v5599_v48 = vadd.f32 %v3670_v11, %v7513_v29  ;;  %v3286_v13 = vpop.f32.mrb[69].mxu0  ;;  %v3672_v20 = vpop.f32.mrb[69].mxu1 }
 0x322   :  { %v5536_v6 = vadd.f32 %v3286_v13, %v7517_v14  ;;  %v5600_v1 = vadd.f32 %v3672_v20, %v7521_v16  ;;  %v3288_v40 = vpop.f32.mrb[70].mxu0  ;;  %v3674_v23 = vpop.f32.mrb[70].mxu1  ;;  %4562 = vmatprep.mubr.bf16.mxu0 %v4204_v9  ;;  %4723 = vmatprep.mubr.bf16.mxu1 %v4206_v10 }
 0x323   :  { %v5537_v22 = vadd.f32 %v3288_v40, %v7509_v27  ;;  %v5601_v17 = vadd.f32 %v3674_v23, %v7513_v29  ;;  %v3290_v38 = vpop.f32.mrb[71].mxu0  ;;  %v3676_v21 = vpop.f32.mrb[71].mxu1  ;;  %4563 = vmatmul.mubr.bf16.vlgmr.msra.gmra.mrb[128].mxu0 %v4203_v52  ;;  %4724 = vmatmul.mubr.bf16.vlgmr.msra.gmra.mrb[128].mxu1 %v4205_v2  ;;  %v3827_v26 = vmax.f32 %v5535_v12, 0.0  ;;  %v3829_v30 = vmax.f32 %v5599_v48, 0.0 }
 0x324   :  { %v5538_v24 = vadd.f32 %v3290_v38, %v7517_v14  ;;  %v5602_v25 = vadd.f32 %v3676_v21, %v7521_v16  ;;  %v3828_v19 = vmax.f32 %v5536_v6, 0.0  ;;  %v3830_v59 = vmax.f32 %v5600_v1, 0.0 }
 0x325   :  { %v3831_v32 = vmax.f32 %v5537_v22, 0.0  ;;  %v3833_v33 = vmax.f32 %v5601_v17, 0.0 }
 0x326   :  { %v3832_v34 = vmax.f32 %v5538_v24, 0.0  ;;  %v3834_v35 = vmax.f32 %v5602_v25, 0.0 }
 0x327   :  { %v4207_v36 = vpack.c.bf16 %v3831_v32, %v3827_v26  ;;  %v4209_v37 = vpack.c.bf16 %v3833_v33, %v3829_v30 }
 0x328   :  { %v4208_v39 = vpack.c.bf16 %v3832_v34, %v3828_v19  ;;  %v4210_v41 = vpack.c.bf16 %v3834_v35, %v3830_v59  ;;  %v3294_v57 = vpop.f32.mrb[72].mxu0  ;;  %v3680_v44 = vpop.f32.mrb[72].mxu1 }
 0x329   :  { %v5539_v45 = vadd.f32 %v3294_v57, %v7509_v27  ;;  %v5603_v42 = vadd.f32 %v3680_v44, %v7513_v29  ;;  %v3296_v60 = vpop.f32.mrb[73].mxu0  ;;  %v3682_v62 = vpop.f32.mrb[73].mxu1 }
 0x32a   :  { %v5540_v51 = vadd.f32 %v3296_v60, %v7517_v14  ;;  %v5604_v53 = vadd.f32 %v3682_v62, %v7521_v16  ;;  %v3298_v4 = vpop.f32.mrb[74].mxu0  ;;  %v3684_v43 = vpop.f32.mrb[74].mxu1  ;;  %4570 = vmatprep.mubr.bf16.mxu0 %v4208_v39  ;;  %4731 = vmatprep.mubr.bf16.mxu1 %v4210_v41 }
 0x32b   :  { %v5541_v46 = vadd.f32 %v3298_v4, %v7509_v27  ;;  %v5605_v5 = vadd.f32 %v3684_v43, %v7513_v29  ;;  %v3300_v28 = vpop.f32.mrb[75].mxu0  ;;  %v3686_v31 = vpop.f32.mrb[75].mxu1  ;;  %4571 = vmatmul.mubr.bf16.gmra.mrb[132].mxu0 %v4207_v36  ;;  %4732 = vmatmul.mubr.bf16.gmra.mrb[132].mxu1 %v4209_v37  ;;  %v3835_v8 = vmax.f32 %v5539_v45, 0.0  ;;  %v3837_v15 = vmax.f32 %v5603_v42, 0.0 }
 0x32c   :  { %v5542_v7 = vadd.f32 %v3300_v28, %v7517_v14  ;;  %v5606_v3 = vadd.f32 %v3686_v31, %v7521_v16  ;;  %v3836_v0 = vmax.f32 %v5540_v51, 0.0  ;;  %v3838_v54 = vmax.f32 %v5604_v53, 0.0 }
 0x32d   :  { %v3839_v18 = vmax.f32 %v5541_v46, 0.0  ;;  %v3841_v61 = vmax.f32 %v5605_v5, 0.0 }
 0x32e   :  { %v3840_v56 = vmax.f32 %v5542_v7, 0.0  ;;  %v3842_v50 = vmax.f32 %v5606_v3, 0.0 }
 0x32f   :  { %v4211_v58 = vpack.c.bf16 %v3839_v18, %v3835_v8  ;;  %v4213_v55 = vpack.c.bf16 %v3841_v61, %v3837_v15 }
 0x330   :  { %v4212_v63 = vpack.c.bf16 %v3840_v56, %v3836_v0  ;;  %v4214_v47 = vpack.c.bf16 %v3842_v50, %v3838_v54  ;;  %v3304_v52 = vpop.f32.mrb[76].mxu0  ;;  %v3690_v2 = vpop.f32.mrb[76].mxu1 }
 0x331   :  { %v5543_v9 = vadd.f32 %v3304_v52, %v7509_v27  ;;  %v5607_v10 = vadd.f32 %v3690_v2, %v7513_v29  ;;  %v3306_v49 = vpop.f32.mrb[77].mxu0  ;;  %v3692_v11 = vpop.f32.mrb[77].mxu1 }
 0x332   :  { %v5544_v12 = vadd.f32 %v3306_v49, %v7517_v14  ;;  %v5608_v48 = vadd.f32 %v3692_v11, %v7521_v16  ;;  %v3308_v13 = vpop.f32.mrb[78].mxu0  ;;  %v3694_v20 = vpop.f32.mrb[78].mxu1  ;;  %4578 = vmatprep.mubr.bf16.mxu0 %v4212_v63  ;;  %4739 = vmatprep.mubr.bf16.mxu1 %v4214_v47 }
 0x333   :  { %v5545_v6 = vadd.f32 %v3308_v13, %v7509_v27  ;;  %v5609_v1 = vadd.f32 %v3694_v20, %v7513_v29  ;;  %v3310_v40 = vpop.f32.mrb[79].mxu0  ;;  %v3696_v23 = vpop.f32.mrb[79].mxu1  ;;  %4579 = vmatmul.mubr.bf16.gmra.mrb[136].mxu0 %v4211_v58  ;;  %4740 = vmatmul.mubr.bf16.gmra.mrb[136].mxu1 %v4213_v55  ;;  %v3843_v38 = vmax.f32 %v5543_v9, 0.0  ;;  %v3845_v21 = vmax.f32 %v5607_v10, 0.0 }
 0x334   :  { %v5546_v22 = vadd.f32 %v3310_v40, %v7517_v14  ;;  %v5610_v17 = vadd.f32 %v3696_v23, %v7521_v16  ;;  %v3844_v26 = vmax.f32 %v5544_v12, 0.0  ;;  %v3846_v30 = vmax.f32 %v5608_v48, 0.0 }
 0x335   :  { %v3847_v24 = vmax.f32 %v5545_v6, 0.0  ;;  %v3849_v25 = vmax.f32 %v5609_v1, 0.0 }
 0x336   :  { %v3848_v32 = vmax.f32 %v5546_v22, 0.0  ;;  %v3850_v33 = vmax.f32 %v5610_v17, 0.0 }
 0x337   :  { %v4215_v19 = vpack.c.bf16 %v3847_v24, %v3843_v38  ;;  %v4217_v59 = vpack.c.bf16 %v3849_v25, %v3845_v21 }
 0x338   :  { %v4216_v34 = vpack.c.bf16 %v3848_v32, %v3844_v26  ;;  %v4218_v35 = vpack.c.bf16 %v3850_v33, %v3846_v30  ;;  %v3314_v36 = vpop.f32.mrb[80].mxu0  ;;  %v3700_v37 = vpop.f32.mrb[80].mxu1 }
 0x339   :  { %v5547_v39 = vadd.f32 %v3314_v36, %v7509_v27  ;;  %v5611_v41 = vadd.f32 %v3700_v37, %v7513_v29  ;;  %v3316_v57 = vpop.f32.mrb[81].mxu0  ;;  %v3702_v44 = vpop.f32.mrb[81].mxu1 }
 0x33a   :  { %v5548_v45 = vadd.f32 %v3316_v57, %v7517_v14  ;;  %v5612_v42 = vadd.f32 %v3702_v44, %v7521_v16  ;;  %v3318_v60 = vpop.f32.mrb[82].mxu0  ;;  %v3704_v62 = vpop.f32.mrb[82].mxu1  ;;  %4586 = vmatprep.mubr.bf16.mxu0 %v4216_v34  ;;  %4747 = vmatprep.mubr.bf16.mxu1 %v4218_v35 }
 0x33b   :  { %v5549_v51 = vadd.f32 %v3318_v60, %v7509_v27  ;;  %v5613_v53 = vadd.f32 %v3704_v62, %v7513_v29  ;;  %v3320_v4 = vpop.f32.mrb[83].mxu0  ;;  %v3706_v43 = vpop.f32.mrb[83].mxu1  ;;  %4587 = vmatmul.mubr.bf16.gmra.mrb[140].mxu0 %v4215_v19  ;;  %4748 = vmatmul.mubr.bf16.gmra.mrb[140].mxu1 %v4217_v59  ;;  %v3851_v28 = vmax.f32 %v5547_v39, 0.0  ;;  %v3853_v31 = vmax.f32 %v5611_v41, 0.0 }
 0x33c   :  { %v5550_v46 = vadd.f32 %v3320_v4, %v7517_v14  ;;  %v5614_v5 = vadd.f32 %v3706_v43, %v7521_v16  ;;  %v3852_v8 = vmax.f32 %v5548_v45, 0.0  ;;  %v3854_v15 = vmax.f32 %v5612_v42, 0.0 }
 0x33d   :  { %v3855_v7 = vmax.f32 %v5549_v51, 0.0  ;;  %v3857_v3 = vmax.f32 %v5613_v53, 0.0 }
 0x33e   :  { %v3856_v18 = vmax.f32 %v5550_v46, 0.0  ;;  %v3858_v61 = vmax.f32 %v5614_v5, 0.0 }
 0x33f   :  { %v4219_v0 = vpack.c.bf16 %v3855_v7, %v3851_v28  ;;  %v4221_v54 = vpack.c.bf16 %v3857_v3, %v3853_v31 }
 0x340   :  { %v4220_v56 = vpack.c.bf16 %v3856_v18, %v3852_v8  ;;  %v4222_v50 = vpack.c.bf16 %v3858_v61, %v3854_v15  ;;  %v3324_v58 = vpop.f32.mrb[84].mxu0  ;;  %v3710_v55 = vpop.f32.mrb[84].mxu1 }
 0x341   :  { %v5551_v63 = vadd.f32 %v3324_v58, %v7509_v27  ;;  %v5615_v47 = vadd.f32 %v3710_v55, %v7513_v29  ;;  %v3326_v52 = vpop.f32.mrb[85].mxu0  ;;  %v3712_v2 = vpop.f32.mrb[85].mxu1 }
 0x342   :  { %v5552_v9 = vadd.f32 %v3326_v52, %v7517_v14  ;;  %v5616_v10 = vadd.f32 %v3712_v2, %v7521_v16  ;;  %v3328_v49 = vpop.f32.mrb[86].mxu0  ;;  %v3714_v11 = vpop.f32.mrb[86].mxu1  ;;  %4594 = vmatprep.mubr.bf16.mxu0 %v4220_v56  ;;  %4755 = vmatprep.mubr.bf16.mxu1 %v4222_v50 }
 0x343   :  { %v5553_v12 = vadd.f32 %v3328_v49, %v7509_v27  ;;  %v5617_v48 = vadd.f32 %v3714_v11, %v7513_v29  ;;  %v3330_v13 = vpop.f32.mrb[87].mxu0  ;;  %v3716_v20 = vpop.f32.mrb[87].mxu1  ;;  %4595 = vmatmul.mubr.bf16.gmra.mrb[144].mxu0 %v4219_v0  ;;  %4756 = vmatmul.mubr.bf16.gmra.mrb[144].mxu1 %v4221_v54  ;;  %v3859_v40 = vmax.f32 %v5551_v63, 0.0  ;;  %v3861_v23 = vmax.f32 %v5615_v47, 0.0 }
 0x344   :  { %v5554_v6 = vadd.f32 %v3330_v13, %v7517_v14  ;;  %v5618_v1 = vadd.f32 %v3716_v20, %v7521_v16  ;;  %v3860_v38 = vmax.f32 %v5552_v9, 0.0  ;;  %v3862_v21 = vmax.f32 %v5616_v10, 0.0 }
 0x345   :  { %v3863_v22 = vmax.f32 %v5553_v12, 0.0  ;;  %v3865_v17 = vmax.f32 %v5617_v48, 0.0 }
 0x346   :  { %v3864_v24 = vmax.f32 %v5554_v6, 0.0  ;;  %v3866_v25 = vmax.f32 %v5618_v1, 0.0 }
 0x347   :  { %v4223_v26 = vpack.c.bf16 %v3863_v22, %v3859_v40  ;;  %v4225_v30 = vpack.c.bf16 %v3865_v17, %v3861_v23 }
 0x348   :  { %v4224_v32 = vpack.c.bf16 %v3864_v24, %v3860_v38  ;;  %v4226_v33 = vpack.c.bf16 %v3866_v25, %v3862_v21  ;;  %v3334_v19 = vpop.f32.mrb[88].mxu0  ;;  %v3720_v59 = vpop.f32.mrb[88].mxu1 }
 0x349   :  { %v5555_v34 = vadd.f32 %v3334_v19, %v7509_v27  ;;  %v5619_v35 = vadd.f32 %v3720_v59, %v7513_v29  ;;  %v3336_v36 = vpop.f32.mrb[89].mxu0  ;;  %v3722_v37 = vpop.f32.mrb[89].mxu1 }
 0x34a   :  { %v5556_v39 = vadd.f32 %v3336_v36, %v7517_v14  ;;  %v5620_v41 = vadd.f32 %v3722_v37, %v7521_v16  ;;  %v3338_v57 = vpop.f32.mrb[90].mxu0  ;;  %v3724_v44 = vpop.f32.mrb[90].mxu1  ;;  %4602 = vmatprep.mubr.bf16.mxu0 %v4224_v32  ;;  %4763 = vmatprep.mubr.bf16.mxu1 %v4226_v33 }
 0x34b   :  { %v5557_v45 = vadd.f32 %v3338_v57, %v7509_v27  ;;  %v5621_v42 = vadd.f32 %v3724_v44, %v7513_v29  ;;  %v3340_v60 = vpop.f32.mrb[91].mxu0  ;;  %v3726_v62 = vpop.f32.mrb[91].mxu1  ;;  %4603 = vmatmul.mubr.bf16.gmra.mrb[148].mxu0 %v4223_v26  ;;  %4764 = vmatmul.mubr.bf16.gmra.mrb[148].mxu1 %v4225_v30  ;;  %v3867_v4 = vmax.f32 %v5555_v34, 0.0  ;;  %v3869_v43 = vmax.f32 %v5619_v35, 0.0 }
 0x34c   :  { %v5558_v51 = vadd.f32 %v3340_v60, %v7517_v14  ;;  %v5622_v53 = vadd.f32 %v3726_v62, %v7521_v16  ;;  %v3868_v28 = vmax.f32 %v5556_v39, 0.0  ;;  %v3870_v31 = vmax.f32 %v5620_v41, 0.0 }
 0x34d   :  { %v3871_v46 = vmax.f32 %v5557_v45, 0.0  ;;  %v3873_v5 = vmax.f32 %v5621_v42, 0.0 }
 0x34e   :  { %v3872_v7 = vmax.f32 %v5558_v51, 0.0  ;;  %v3874_v3 = vmax.f32 %v5622_v53, 0.0 }
 0x34f   :  { %v4227_v8 = vpack.c.bf16 %v3871_v46, %v3867_v4  ;;  %v4229_v15 = vpack.c.bf16 %v3873_v5, %v3869_v43 }
 0x350   :  { %v4228_v18 = vpack.c.bf16 %v3872_v7, %v3868_v28  ;;  %v4230_v61 = vpack.c.bf16 %v3874_v3, %v3870_v31  ;;  %v3344_v0 = vpop.f32.mrb[92].mxu0  ;;  %v3730_v54 = vpop.f32.mrb[92].mxu1 }
 0x351   :  { %v5559_v56 = vadd.f32 %v3344_v0, %v7509_v27  ;;  %v5623_v50 = vadd.f32 %v3730_v54, %v7513_v29  ;;  %v3346_v58 = vpop.f32.mrb[93].mxu0  ;;  %v3732_v55 = vpop.f32.mrb[93].mxu1 }
 0x352   :  { %v5560_v63 = vadd.f32 %v3346_v58, %v7517_v14  ;;  %v5624_v47 = vadd.f32 %v3732_v55, %v7521_v16  ;;  %v3348_v52 = vpop.f32.mrb[94].mxu0  ;;  %v3734_v2 = vpop.f32.mrb[94].mxu1  ;;  %4610 = vmatprep.mubr.bf16.mxu0 %v4228_v18  ;;  %4771 = vmatprep.mubr.bf16.mxu1 %v4230_v61 }
 0x353   :  { %v5561_v9 = vadd.f32 %v3348_v52, %v7509_v27  ;;  %v5625_v10 = vadd.f32 %v3734_v2, %v7513_v29  ;;  %v3350_v49 = vpop.f32.mrb[95].mxu0  ;;  %v3736_v11 = vpop.f32.mrb[95].mxu1  ;;  %4611 = vmatmul.mubr.bf16.gmra.mrb[152].mxu0 %v4227_v8  ;;  %4772 = vmatmul.mubr.bf16.gmra.mrb[152].mxu1 %v4229_v15  ;;  %v3875_v13 = vmax.f32 %v5559_v56, 0.0  ;;  %v3877_v20 = vmax.f32 %v5623_v50, 0.0 }
 0x354   :  { %v5562_v12 = vadd.f32 %v3350_v49, %v7517_v14  ;;  %v5626_v48 = vadd.f32 %v3736_v11, %v7521_v16  ;;  %v3876_v40 = vmax.f32 %v5560_v63, 0.0  ;;  %v3878_v23 = vmax.f32 %v5624_v47, 0.0 }
 0x355   :  { %v3879_v6 = vmax.f32 %v5561_v9, 0.0  ;;  %v3881_v1 = vmax.f32 %v5625_v10, 0.0 }
 0x356   :  { %v3880_v22 = vmax.f32 %v5562_v12, 0.0  ;;  %v3882_v17 = vmax.f32 %v5626_v48, 0.0 }
 0x357   :  { %v4231_v38 = vpack.c.bf16 %v3879_v6, %v3875_v13  ;;  %v4233_v21 = vpack.c.bf16 %v3881_v1, %v3877_v20 }
 0x358   :  { %v4232_v24 = vpack.c.bf16 %v3880_v22, %v3876_v40  ;;  %v4234_v25 = vpack.c.bf16 %v3882_v17, %v3878_v23  ;;  %v3354_v26 = vpop.f32.mrb[96].mxu0  ;;  %v3740_v30 = vpop.f32.mrb[96].mxu1 }
 0x359   :  { %v5563_v32 = vadd.f32 %v3354_v26, %v7509_v27  ;;  %v5627_v33 = vadd.f32 %v3740_v30, %v7513_v29  ;;  %v3356_v19 = vpop.f32.mrb[97].mxu0  ;;  %v3742_v59 = vpop.f32.mrb[97].mxu1 }
 0x35a   :  { %v5564_v34 = vadd.f32 %v3356_v19, %v7517_v14  ;;  %v5628_v35 = vadd.f32 %v3742_v59, %v7521_v16  ;;  %v3358_v36 = vpop.f32.mrb[98].mxu0  ;;  %v3744_v37 = vpop.f32.mrb[98].mxu1  ;;  %4618 = vmatprep.mubr.bf16.mxu0 %v4232_v24  ;;  %4779 = vmatprep.mubr.bf16.mxu1 %v4234_v25 }
 0x35b   :  { %v5565_v39 = vadd.f32 %v3358_v36, %v7509_v27  ;;  %v5629_v41 = vadd.f32 %v3744_v37, %v7513_v29  ;;  %v3360_v57 = vpop.f32.mrb[99].mxu0  ;;  %v3746_v44 = vpop.f32.mrb[99].mxu1  ;;  %4619 = vmatmul.mubr.bf16.gmra.mrb[156].mxu0 %v4231_v38  ;;  %4780 = vmatmul.mubr.bf16.gmra.mrb[156].mxu1 %v4233_v21  ;;  %v3883_v60 = vmax.f32 %v5563_v32, 0.0  ;;  %v3885_v62 = vmax.f32 %v5627_v33, 0.0 }
 0x35c   :  { %v5566_v45 = vadd.f32 %v3360_v57, %v7517_v14  ;;  %v5630_v42 = vadd.f32 %v3746_v44, %v7521_v16  ;;  %v3884_v4 = vmax.f32 %v5564_v34, 0.0  ;;  %v3886_v43 = vmax.f32 %v5628_v35, 0.0 }
 0x35d   :  { %v3887_v51 = vmax.f32 %v5565_v39, 0.0  ;;  %v3889_v53 = vmax.f32 %v5629_v41, 0.0 }
 0x35e   :  { %v3888_v46 = vmax.f32 %v5566_v45, 0.0  ;;  %v3890_v5 = vmax.f32 %v5630_v42, 0.0 }
 0x35f   :  { %v4235_v28 = vpack.c.bf16 %v3887_v51, %v3883_v60  ;;  %v4237_v31 = vpack.c.bf16 %v3889_v53, %v3885_v62 }
 0x360   :  { %v4236_v7 = vpack.c.bf16 %v3888_v46, %v3884_v4  ;;  %v4238_v3 = vpack.c.bf16 %v3890_v5, %v3886_v43  ;;  %v3364_v8 = vpop.f32.mrb[100].mxu0  ;;  %v3750_v15 = vpop.f32.mrb[100].mxu1 }
 0x361   :  { %v5567_v18 = vadd.f32 %v3364_v8, %v7509_v27  ;;  %v5631_v61 = vadd.f32 %v3750_v15, %v7513_v29  ;;  %v3366_v0 = vpop.f32.mrb[101].mxu0  ;;  %v3752_v54 = vpop.f32.mrb[101].mxu1 }
 0x362   :  { %v5568_v56 = vadd.f32 %v3366_v0, %v7517_v14  ;;  %v5632_v50 = vadd.f32 %v3752_v54, %v7521_v16  ;;  %v3368_v58 = vpop.f32.mrb[102].mxu0  ;;  %v3754_v55 = vpop.f32.mrb[102].mxu1  ;;  %4626 = vmatprep.mubr.bf16.mxu0 %v4236_v7  ;;  %4787 = vmatprep.mubr.bf16.mxu1 %v4238_v3 }
 0x363   :  { %v5569_v63 = vadd.f32 %v3368_v58, %v7509_v27  ;;  %v5633_v47 = vadd.f32 %v3754_v55, %v7513_v29  ;;  %v3370_v52 = vpop.f32.mrb[103].mxu0  ;;  %v3756_v2 = vpop.f32.mrb[103].mxu1  ;;  %4627 = vmatmul.mubr.bf16.gmra.mrb[160].mxu0 %v4235_v28  ;;  %4788 = vmatmul.mubr.bf16.gmra.mrb[160].mxu1 %v4237_v31  ;;  %v3891_v49 = vmax.f32 %v5567_v18, 0.0  ;;  %v3893_v11 = vmax.f32 %v5631_v61, 0.0 }
 0x364   :  { %v5570_v9 = vadd.f32 %v3370_v52, %v7517_v14  ;;  %v5634_v10 = vadd.f32 %v3756_v2, %v7521_v16  ;;  %v3892_v13 = vmax.f32 %v5568_v56, 0.0  ;;  %v3894_v20 = vmax.f32 %v5632_v50, 0.0 }
 0x365   :  { %v3895_v12 = vmax.f32 %v5569_v63, 0.0  ;;  %v3897_v48 = vmax.f32 %v5633_v47, 0.0 }
 0x366   :  { %v3896_v6 = vmax.f32 %v5570_v9, 0.0  ;;  %v3898_v1 = vmax.f32 %v5634_v10, 0.0 }
 0x367   :  { %v4239_v40 = vpack.c.bf16 %v3895_v12, %v3891_v49  ;;  %v4241_v23 = vpack.c.bf16 %v3897_v48, %v3893_v11 }
 0x368   :  { %v4240_v22 = vpack.c.bf16 %v3896_v6, %v3892_v13  ;;  %v4242_v17 = vpack.c.bf16 %v3898_v1, %v3894_v20  ;;  %v3374_v38 = vpop.f32.mrb[104].mxu0  ;;  %v3760_v21 = vpop.f32.mrb[104].mxu1 }
 0x369   :  { %v5571_v24 = vadd.f32 %v3374_v38, %v7509_v27  ;;  %v5635_v25 = vadd.f32 %v3760_v21, %v7513_v29  ;;  %v3376_v26 = vpop.f32.mrb[105].mxu0  ;;  %v3762_v30 = vpop.f32.mrb[105].mxu1 }
 0x36a   :  { %v5572_v32 = vadd.f32 %v3376_v26, %v7517_v14  ;;  %v5636_v33 = vadd.f32 %v3762_v30, %v7521_v16  ;;  %v3378_v19 = vpop.f32.mrb[106].mxu0  ;;  %v3764_v59 = vpop.f32.mrb[106].mxu1  ;;  %4634 = vmatprep.mubr.bf16.mxu0 %v4240_v22  ;;  %4795 = vmatprep.mubr.bf16.mxu1 %v4242_v17 }
 0x36b   :  { %v5573_v34 = vadd.f32 %v3378_v19, %v7509_v27  ;;  %v5637_v35 = vadd.f32 %v3764_v59, %v7513_v29  ;;  %v3380_v36 = vpop.f32.mrb[107].mxu0  ;;  %v3766_v37 = vpop.f32.mrb[107].mxu1  ;;  %4635 = vmatmul.mubr.bf16.gmra.mrb[164].mxu0 %v4239_v40  ;;  %4796 = vmatmul.mubr.bf16.gmra.mrb[164].mxu1 %v4241_v23  ;;  %v3899_v57 = vmax.f32 %v5571_v24, 0.0  ;;  %v3901_v44 = vmax.f32 %v5635_v25, 0.0 }
 0x36c   :  { %v5574_v39 = vadd.f32 %v3380_v36, %v7517_v14  ;;  %v5638_v41 = vadd.f32 %v3766_v37, %v7521_v16  ;;  %v3900_v60 = vmax.f32 %v5572_v32, 0.0  ;;  %v3902_v62 = vmax.f32 %v5636_v33, 0.0 }
 0x36d   :  { %v3903_v45 = vmax.f32 %v5573_v34, 0.0  ;;  %v3905_v42 = vmax.f32 %v5637_v35, 0.0 }
 0x36e   :  { %v3904_v51 = vmax.f32 %v5574_v39, 0.0  ;;  %v3906_v53 = vmax.f32 %v5638_v41, 0.0 }
 0x36f   :  { %v4243_v4 = vpack.c.bf16 %v3903_v45, %v3899_v57  ;;  %v4245_v43 = vpack.c.bf16 %v3905_v42, %v3901_v44 }
 0x370   :  { %v4244_v46 = vpack.c.bf16 %v3904_v51, %v3900_v60  ;;  %v4246_v5 = vpack.c.bf16 %v3906_v53, %v3902_v62  ;;  %v3384_v28 = vpop.f32.mrb[108].mxu0  ;;  %v3770_v31 = vpop.f32.mrb[108].mxu1 }
 0x371   :  { %v5575_v7 = vadd.f32 %v3384_v28, %v7509_v27  ;;  %v5639_v3 = vadd.f32 %v3770_v31, %v7513_v29  ;;  %v3386_v8 = vpop.f32.mrb[109].mxu0  ;;  %v3772_v15 = vpop.f32.mrb[109].mxu1 }
 0x372   :  { %v5576_v18 = vadd.f32 %v3386_v8, %v7517_v14  ;;  %v5640_v61 = vadd.f32 %v3772_v15, %v7521_v16  ;;  %v3388_v0 = vpop.f32.mrb[110].mxu0  ;;  %v3774_v54 = vpop.f32.mrb[110].mxu1  ;;  %4642 = vmatprep.mubr.bf16.mxu0 %v4244_v46  ;;  %4803 = vmatprep.mubr.bf16.mxu1 %v4246_v5 }
 0x373   :  { %v5577_v56 = vadd.f32 %v3388_v0, %v7509_v27  ;;  %v5641_v50 = vadd.f32 %v3774_v54, %v7513_v29  ;;  %v3390_v58 = vpop.f32.mrb[111].mxu0  ;;  %v3776_v55 = vpop.f32.mrb[111].mxu1  ;;  %4643 = vmatmul.mubr.bf16.gmra.mrb[168].mxu0 %v4243_v4  ;;  %4804 = vmatmul.mubr.bf16.gmra.mrb[168].mxu1 %v4245_v43  ;;  %v3907_v52 = vmax.f32 %v5575_v7, 0.0  ;;  %v3909_v2 = vmax.f32 %v5639_v3, 0.0 }
 0x374   :  { %v5578_v63 = vadd.f32 %v3390_v58, %v7517_v14  ;;  %v5642_v47 = vadd.f32 %v3776_v55, %v7521_v16  ;;  %v3908_v49 = vmax.f32 %v5576_v18, 0.0  ;;  %v3910_v11 = vmax.f32 %v5640_v61, 0.0 }
 0x375   :  { %v3911_v9 = vmax.f32 %v5577_v56, 0.0  ;;  %v3913_v10 = vmax.f32 %v5641_v50, 0.0 }
 0x376   :  { %v3912_v12 = vmax.f32 %v5578_v63, 0.0  ;;  %v3914_v48 = vmax.f32 %v5642_v47, 0.0 }
 0x377   :  { %v4247_v13 = vpack.c.bf16 %v3911_v9, %v3907_v52  ;;  %v4249_v20 = vpack.c.bf16 %v3913_v10, %v3909_v2 }
 0x378   :  { %v4248_v6 = vpack.c.bf16 %v3912_v12, %v3908_v49  ;;  %v4250_v1 = vpack.c.bf16 %v3914_v48, %v3910_v11  ;;  %v3394_v40 = vpop.f32.mrb[112].mxu0  ;;  %v3780_v23 = vpop.f32.mrb[112].mxu1 }
 0x379   :  { %v5579_v22 = vadd.f32 %v3394_v40, %v7509_v27  ;;  %v5643_v17 = vadd.f32 %v3780_v23, %v7513_v29  ;;  %v3396_v38 = vpop.f32.mrb[113].mxu0  ;;  %v3782_v21 = vpop.f32.mrb[113].mxu1 }
 0x37a   :  { %v5580_v24 = vadd.f32 %v3396_v38, %v7517_v14  ;;  %v5644_v25 = vadd.f32 %v3782_v21, %v7521_v16  ;;  %v3398_v26 = vpop.f32.mrb[114].mxu0  ;;  %v3784_v30 = vpop.f32.mrb[114].mxu1  ;;  %4650 = vmatprep.mubr.bf16.mxu0 %v4248_v6  ;;  %4811 = vmatprep.mubr.bf16.mxu1 %v4250_v1 }
 0x37b   :  { %v5581_v32 = vadd.f32 %v3398_v26, %v7509_v27  ;;  %v5645_v33 = vadd.f32 %v3784_v30, %v7513_v29  ;;  %v3400_v19 = vpop.f32.mrb[115].mxu0  ;;  %v3786_v59 = vpop.f32.mrb[115].mxu1  ;;  %4651 = vmatmul.mubr.bf16.gmra.mrb[172].mxu0 %v4247_v13  ;;  %4812 = vmatmul.mubr.bf16.gmra.mrb[172].mxu1 %v4249_v20  ;;  %v3915_v36 = vmax.f32 %v5579_v22, 0.0  ;;  %v3917_v37 = vmax.f32 %v5643_v17, 0.0 }
 0x37c   :  { %v5582_v34 = vadd.f32 %v3400_v19, %v7517_v14  ;;  %v5646_v35 = vadd.f32 %v3786_v59, %v7521_v16  ;;  %v3916_v57 = vmax.f32 %v5580_v24, 0.0  ;;  %v3918_v44 = vmax.f32 %v5644_v25, 0.0 }
 0x37d   :  { %v3919_v39 = vmax.f32 %v5581_v32, 0.0  ;;  %v3921_v41 = vmax.f32 %v5645_v33, 0.0 }
 0x37e   :  { %v3920_v45 = vmax.f32 %v5582_v34, 0.0  ;;  %v3922_v42 = vmax.f32 %v5646_v35, 0.0 }
 0x37f   :  { %v4251_v60 = vpack.c.bf16 %v3919_v39, %v3915_v36  ;;  %v4253_v62 = vpack.c.bf16 %v3921_v41, %v3917_v37 }
 0x380   :  { %v4252_v51 = vpack.c.bf16 %v3920_v45, %v3916_v57  ;;  %v4254_v53 = vpack.c.bf16 %v3922_v42, %v3918_v44  ;;  %v3404_v4 = vpop.f32.mrb[116].mxu0  ;;  %v3790_v43 = vpop.f32.mrb[116].mxu1 }
 0x381   :  { %v5583_v46 = vadd.f32 %v3404_v4, %v7509_v27  ;;  %v5647_v5 = vadd.f32 %v3790_v43, %v7513_v29  ;;  %v3406_v28 = vpop.f32.mrb[117].mxu0  ;;  %v3792_v31 = vpop.f32.mrb[117].mxu1 }
 0x382   :  { %v5584_v7 = vadd.f32 %v3406_v28, %v7517_v14  ;;  %v5648_v3 = vadd.f32 %v3792_v31, %v7521_v16  ;;  %v3408_v8 = vpop.f32.mrb[118].mxu0  ;;  %v3794_v15 = vpop.f32.mrb[118].mxu1  ;;  %4658 = vmatprep.mubr.bf16.mxu0 %v4252_v51  ;;  %4819 = vmatprep.mubr.bf16.mxu1 %v4254_v53 }
 0x383   :  { %v5585_v18 = vadd.f32 %v3408_v8, %v7509_v27  ;;  %v5649_v61 = vadd.f32 %v3794_v15, %v7513_v29  ;;  %v3410_v0 = vpop.f32.mrb[119].mxu0  ;;  %v3796_v54 = vpop.f32.mrb[119].mxu1  ;;  %4659 = vmatmul.mubr.bf16.gmra.mrb[176].mxu0 %v4251_v60  ;;  %4820 = vmatmul.mubr.bf16.gmra.mrb[176].mxu1 %v4253_v62  ;;  %v3923_v58 = vmax.f32 %v5583_v46, 0.0  ;;  %v3925_v55 = vmax.f32 %v5647_v5, 0.0 }
 0x384   :  { %v5586_v56 = vadd.f32 %v3410_v0, %v7517_v14  ;;  %v5650_v50 = vadd.f32 %v3796_v54, %v7521_v16  ;;  %v3924_v52 = vmax.f32 %v5584_v7, 0.0  ;;  %v3926_v2 = vmax.f32 %v5648_v3, 0.0 }
 0x385   :  { %v3927_v63 = vmax.f32 %v5585_v18, 0.0  ;;  %v3929_v47 = vmax.f32 %v5649_v61, 0.0 }
 0x386   :  { %v3928_v9 = vmax.f32 %v5586_v56, 0.0  ;;  %v3930_v10 = vmax.f32 %v5650_v50, 0.0 }
 0x387   :  { %v4255_v49 = vpack.c.bf16 %v3927_v63, %v3923_v58  ;;  %v4257_v11 = vpack.c.bf16 %v3929_v47, %v3925_v55 }
 0x388   :  { %v4256_v12 = vpack.c.bf16 %v3928_v9, %v3924_v52  ;;  %v4258_v48 = vpack.c.bf16 %v3930_v10, %v3926_v2  ;;  %v3414_v13 = vpop.f32.mrb[120].mxu0  ;;  %v3800_v20 = vpop.f32.mrb[120].mxu1 }
 0x389   :  { %v5587_v6 = vadd.f32 %v3414_v13, %v7509_v27  ;;  %v5651_v1 = vadd.f32 %v3800_v20, %v7513_v29  ;;  %v3416_v40 = vpop.f32.mrb[121].mxu0  ;;  %v3802_v23 = vpop.f32.mrb[121].mxu1 }
 0x38a   :  { %v5588_v22 = vadd.f32 %v3416_v40, %v7517_v14  ;;  %v5652_v17 = vadd.f32 %v3802_v23, %v7521_v16  ;;  %v3418_v38 = vpop.f32.mrb[122].mxu0  ;;  %v3804_v21 = vpop.f32.mrb[122].mxu1  ;;  %4666 = vmatprep.mubr.bf16.mxu0 %v4256_v12  ;;  %4827 = vmatprep.mubr.bf16.mxu1 %v4258_v48 }
 0x38b   :  { %v5589_v24 = vadd.f32 %v3418_v38, %v7509_v27  ;;  %v5653_v25 = vadd.f32 %v3804_v21, %v7513_v29  ;;  %v3420_v26 = vpop.f32.mrb[123].mxu0  ;;  %v3806_v30 = vpop.f32.mrb[123].mxu1  ;;  %4667 = vmatmul.mubr.bf16.gmra.mrb[180].mxu0 %v4255_v49  ;;  %4828 = vmatmul.mubr.bf16.gmra.mrb[180].mxu1 %v4257_v11  ;;  %v3931_v19 = vmax.f32 %v5587_v6, 0.0  ;;  %v3933_v59 = vmax.f32 %v5651_v1, 0.0 }
 0x38c   :  { %v5590_v32 = vadd.f32 %v3420_v26, %v7517_v14  ;;  %v5654_v33 = vadd.f32 %v3806_v30, %v7521_v16  ;;  %v3932_v36 = vmax.f32 %v5588_v22, 0.0  ;;  %v3934_v37 = vmax.f32 %v5652_v17, 0.0 }
 0x38d   :  { %v3935_v34 = vmax.f32 %v5589_v24, 0.0  ;;  %v3937_v35 = vmax.f32 %v5653_v25, 0.0 }
 0x38e   :  { %v3936_v39 = vmax.f32 %v5590_v32, 0.0  ;;  %v3938_v41 = vmax.f32 %v5654_v33, 0.0 }
 0x38f   :  { %v4259_v57 = vpack.c.bf16 %v3935_v34, %v3931_v19  ;;  %v4261_v44 = vpack.c.bf16 %v3937_v35, %v3933_v59 }
 0x390   :  { %v4260_v45 = vpack.c.bf16 %v3936_v39, %v3932_v36  ;;  %v4262_v42 = vpack.c.bf16 %v3938_v41, %v3934_v37  ;;  %v3424_v60 = vpop.f32.mrb[124].mxu0  ;;  %v3810_v62 = vpop.f32.mrb[124].mxu1 }
 0x391   :  { %v5591_v51 = vadd.f32 %v3424_v60, %v7509_v27  ;;  %v5655_v53 = vadd.f32 %v3810_v62, %v7513_v29  ;;  %v3426_v4 = vpop.f32.mrb[125].mxu0  ;;  %v3812_v43 = vpop.f32.mrb[125].mxu1 }
 0x392   :  { %v5592_v46 = vadd.f32 %v3426_v4, %v7517_v14  ;;  %v5656_v5 = vadd.f32 %v3812_v43, %v7521_v16  ;;  %v3428_v28 = vpop.f32.mrb[126].mxu0  ;;  %v3814_v31 = vpop.f32.mrb[126].mxu1  ;;  %4674 = vmatprep.mubr.bf16.mxu0 %v4260_v45  ;;  %4835 = vmatprep.mubr.bf16.mxu1 %v4262_v42 }
 0x393   :  { %v5593_v7 = vadd.f32 %v3428_v28, %v7509_v27  ;;  %v5657_v3 = vadd.f32 %v3814_v31, %v7513_v29  ;;  %v3430_v8 = vpop.f32.mrb[127].mxu0  ;;  %v3816_v15 = vpop.f32.mrb[127].mxu1  ;;  %4675 = vmatmul.mubr.bf16.gmra.mrb[184].mxu0 %v4259_v57  ;;  %4836 = vmatmul.mubr.bf16.gmra.mrb[184].mxu1 %v4261_v44  ;;  %v3939_v0 = vmax.f32 %v5591_v51, 0.0  ;;  %v3941_v54 = vmax.f32 %v5655_v53, 0.0 }
 0x394   :  { %v5594_v18 = vadd.f32 %v3430_v8, %v7517_v14  ;;  %v5658_v61 = vadd.f32 %v3816_v15, %v7521_v16  ;;  %v3940_v58 = vmax.f32 %v5592_v46, 0.0  ;;  %v3942_v55 = vmax.f32 %v5656_v5, 0.0  ;;  %v7654_v16 = vld [vmem:[%s7790_s6] ss:$0 sm:$0xff] }
 0x395   :  { %v3943_v56 = vmax.f32 %v5593_v7, 0.0  ;;  %v3945_v50 = vmax.f32 %v5657_v3, 0.0 }
 0x396   :  { %v3944_v63 = vmax.f32 %v5594_v18, 0.0  ;;  %v3946_v47 = vmax.f32 %v5658_v61, 0.0 }
 0x397   :  { %v4263_v52 = vpack.c.bf16 %v3943_v56, %v3939_v0  ;;  %v4265_v27 = vpack.c.bf16 %v3945_v50, %v3941_v54 }
 0x398   :  { %v4264_v2 = vpack.c.bf16 %v3944_v63, %v3940_v58  ;;  %v4266_v29 = vpack.c.bf16 %v3946_v47, %v3942_v55 }
 0x39a   :  { %4682 = vmatprep.mubr.bf16.mxu0 %v4264_v2  ;;  %4843 = vmatprep.mubr.bf16.mxu1 %v4266_v29 }
 0x39b   :  { %4683 = vmatmul.mubr.bf16.gmra.mrb[188].mxu0 %v4263_v52  ;;  %4844 = vmatmul.mubr.bf16.gmra.mrb[188].mxu1 %v4265_v27 }
 0x3f6   :  { %v5195_v9 = vpop.f32.mrb[128].mxu0  ;;  %v5307_v14 = vpop.f32.mrb[128].mxu1 }
 0x3f7   :  { %v5196_v10 = vpop.f32.mrb[129].mxu0  ;;  %v5308_v49 = vpop.f32.mrb[129].mxu1 }
 0x3f8   :  { %v5197_v11 = vadd.f32 %v5196_v10, %v5195_v9  ;;  %v5309_v12 = vadd.f32 %v5308_v49, %v5307_v14  ;;  %v5198_v48 = vpop.f32.mrb[130].mxu0  ;;  %v5310_v13 = vpop.f32.mrb[130].mxu1 }
 0x3f9   :  { %v5199_v20 = vpop.f32.mrb[131].mxu0  ;;  %v5311_v6 = vpop.f32.mrb[131].mxu1 }
 0x3fa   :  { %v4565_v1 = vadd.f32 %v5197_v11, %v7654_v16  ;;  %v5200_v40 = vadd.f32 %v5199_v20, %v5198_v48  ;;  %v5312_v23 = vadd.f32 %v5311_v6, %v5310_v13 }
 0x3fc   :  { %v4726_v22 = vadd.f32 %v5309_v12, %v4565_v1  ;;  %v4568_v17 = vadd.f32 %v5200_v40, %v7654_v16 }
 0x3fe   :  { %4852 = vst [vmem:[%s7791_s7] sm:$0xff] %v4726_v22  ;;  %v4729_v38 = vadd.f32 %v5312_v23, %v4568_v17  ;;  %v5201_v21 = vpop.f32.mrb[132].mxu0  ;;  %v5313_v24 = vpop.f32.mrb[132].mxu1 }
 0x3ff   :  { %v5202_v25 = vpop.f32.mrb[133].mxu0  ;;  %v5314_v26 = vpop.f32.mrb[133].mxu1 }
 0x400   :  { %4853 = vst [vmem:[%s7791_s7 + $0x8] sm:$0xff] %v4729_v38  ;;  %v5203_v30 = vadd.f32 %v5202_v25, %v5201_v21  ;;  %v5315_v32 = vadd.f32 %v5314_v26, %v5313_v24  ;;  %v5204_v33 = vpop.f32.mrb[134].mxu0  ;;  %v5316_v19 = vpop.f32.mrb[134].mxu1 }
 0x401   :  { %v5205_v59 = vpop.f32.mrb[135].mxu0  ;;  %v5317_v34 = vpop.f32.mrb[135].mxu1 }
 0x402   :  { %v4573_v35 = vadd.f32 %v5203_v30, %v7654_v16  ;;  %v5206_v36 = vadd.f32 %v5205_v59, %v5204_v33  ;;  %v5318_v37 = vadd.f32 %v5317_v34, %v5316_v19 }
 0x404   :  { %v4734_v39 = vadd.f32 %v5315_v32, %v4573_v35  ;;  %v4576_v41 = vadd.f32 %v5206_v36, %v7654_v16 }
 0x406   :  { %4854 = vst [vmem:[%s7791_s7 + $0x10] sm:$0xff] %v4734_v39  ;;  %v4737_v57 = vadd.f32 %v5318_v37, %v4576_v41  ;;  %v5207_v44 = vpop.f32.mrb[136].mxu0  ;;  %v5319_v45 = vpop.f32.mrb[136].mxu1 }
 0x407   :  { %v5208_v42 = vpop.f32.mrb[137].mxu0  ;;  %v5320_v60 = vpop.f32.mrb[137].mxu1 }
 0x408   :  { %4855 = vst [vmem:[%s7791_s7 + $0x18] sm:$0xff] %v4737_v57  ;;  %v5209_v62 = vadd.f32 %v5208_v42, %v5207_v44  ;;  %v5321_v51 = vadd.f32 %v5320_v60, %v5319_v45  ;;  %v5210_v53 = vpop.f32.mrb[138].mxu0  ;;  %v5322_v4 = vpop.f32.mrb[138].mxu1 }
 0x409   :  { %v5211_v43 = vpop.f32.mrb[139].mxu0  ;;  %v5323_v46 = vpop.f32.mrb[139].mxu1 }
 0x40a   :  { %v4581_v5 = vadd.f32 %v5209_v62, %v7654_v16  ;;  %v5212_v28 = vadd.f32 %v5211_v43, %v5210_v53  ;;  %v5324_v31 = vadd.f32 %v5323_v46, %v5322_v4 }
 0x40c   :  { %v4742_v7 = vadd.f32 %v5321_v51, %v4581_v5  ;;  %v4584_v3 = vadd.f32 %v5212_v28, %v7654_v16 }
 0x40e   :  { %4856 = vst [vmem:[%s7791_s7 + $0x20] sm:$0xff] %v4742_v7  ;;  %v4745_v8 = vadd.f32 %v5324_v31, %v4584_v3  ;;  %v5213_v15 = vpop.f32.mrb[140].mxu0  ;;  %v5325_v18 = vpop.f32.mrb[140].mxu1 }
 0x40f   :  { %v5214_v61 = vpop.f32.mrb[141].mxu0  ;;  %v5326_v0 = vpop.f32.mrb[141].mxu1 }
 0x410   :  { %4857 = vst [vmem:[%s7791_s7 + $0x28] sm:$0xff] %v4745_v8  ;;  %v5215_v54 = vadd.f32 %v5214_v61, %v5213_v15  ;;  %v5327_v56 = vadd.f32 %v5326_v0, %v5325_v18  ;;  %v5216_v50 = vpop.f32.mrb[142].mxu0  ;;  %v5328_v58 = vpop.f32.mrb[142].mxu1 }
 0x411   :  { %v5217_v55 = vpop.f32.mrb[143].mxu0  ;;  %v5329_v63 = vpop.f32.mrb[143].mxu1 }
 0x412   :  { %v4589_v47 = vadd.f32 %v5215_v54, %v7654_v16  ;;  %v5218_v52 = vadd.f32 %v5217_v55, %v5216_v50  ;;  %v5330_v27 = vadd.f32 %v5329_v63, %v5328_v58 }
 0x414   :  { %v4750_v2 = vadd.f32 %v5327_v56, %v4589_v47  ;;  %v4592_v29 = vadd.f32 %v5218_v52, %v7654_v16 }
 0x416   :  { %4858 = vst [vmem:[%s7791_s7 + $0x30] sm:$0xff] %v4750_v2  ;;  %v4753_v9 = vadd.f32 %v5330_v27, %v4592_v29  ;;  %v5219_v14 = vpop.f32.mrb[144].mxu0  ;;  %v5331_v10 = vpop.f32.mrb[144].mxu1 }
 0x417   :  { %v5220_v49 = vpop.f32.mrb[145].mxu0  ;;  %v5332_v11 = vpop.f32.mrb[145].mxu1 }
 0x418   :  { %4859 = vst [vmem:[%s7791_s7 + $0x38] sm:$0xff] %v4753_v9  ;;  %v5221_v12 = vadd.f32 %v5220_v49, %v5219_v14  ;;  %v5333_v48 = vadd.f32 %v5332_v11, %v5331_v10  ;;  %v5222_v13 = vpop.f32.mrb[146].mxu0  ;;  %v5334_v20 = vpop.f32.mrb[146].mxu1 }
 0x419   :  { %v5223_v6 = vpop.f32.mrb[147].mxu0  ;;  %v5335_v1 = vpop.f32.mrb[147].mxu1 }
 0x41a   :  { %v4597_v40 = vadd.f32 %v5221_v12, %v7654_v16  ;;  %v5224_v23 = vadd.f32 %v5223_v6, %v5222_v13  ;;  %v5336_v22 = vadd.f32 %v5335_v1, %v5334_v20 }
 0x41c   :  { %v4758_v17 = vadd.f32 %v5333_v48, %v4597_v40  ;;  %v4600_v38 = vadd.f32 %v5224_v23, %v7654_v16 }
 0x41e   :  { %4860 = vst [vmem:[%s7791_s7 + $0x40] sm:$0xff] %v4758_v17  ;;  %v4761_v21 = vadd.f32 %v5336_v22, %v4600_v38  ;;  %v5225_v24 = vpop.f32.mrb[148].mxu0  ;;  %v5337_v25 = vpop.f32.mrb[148].mxu1 }
 0x41f   :  { %v5226_v26 = vpop.f32.mrb[149].mxu0  ;;  %v5338_v30 = vpop.f32.mrb[149].mxu1 }
 0x420   :  { %4861 = vst [vmem:[%s7791_s7 + $0x48] sm:$0xff] %v4761_v21  ;;  %v5227_v32 = vadd.f32 %v5226_v26, %v5225_v24  ;;  %v5339_v33 = vadd.f32 %v5338_v30, %v5337_v25  ;;  %v5228_v19 = vpop.f32.mrb[150].mxu0  ;;  %v5340_v59 = vpop.f32.mrb[150].mxu1 }
 0x421   :  { %v5229_v34 = vpop.f32.mrb[151].mxu0  ;;  %v5341_v35 = vpop.f32.mrb[151].mxu1 }
 0x422   :  { %v4605_v36 = vadd.f32 %v5227_v32, %v7654_v16  ;;  %v5230_v37 = vadd.f32 %v5229_v34, %v5228_v19  ;;  %v5342_v39 = vadd.f32 %v5341_v35, %v5340_v59 }
 0x424   :  { %v4766_v41 = vadd.f32 %v5339_v33, %v4605_v36  ;;  %v4608_v57 = vadd.f32 %v5230_v37, %v7654_v16 }
 0x426   :  { %4862 = vst [vmem:[%s7791_s7 + $0x50] sm:$0xff] %v4766_v41  ;;  %v4769_v44 = vadd.f32 %v5342_v39, %v4608_v57  ;;  %v5231_v45 = vpop.f32.mrb[152].mxu0  ;;  %v5343_v42 = vpop.f32.mrb[152].mxu1 }
 0x427   :  { %v5232_v60 = vpop.f32.mrb[153].mxu0  ;;  %v5344_v62 = vpop.f32.mrb[153].mxu1 }
 0x428   :  { %4863 = vst [vmem:[%s7791_s7 + $0x58] sm:$0xff] %v4769_v44  ;;  %v5233_v51 = vadd.f32 %v5232_v60, %v5231_v45  ;;  %v5345_v53 = vadd.f32 %v5344_v62, %v5343_v42  ;;  %v5234_v4 = vpop.f32.mrb[154].mxu0  ;;  %v5346_v43 = vpop.f32.mrb[154].mxu1 }
 0x429   :  { %v5235_v46 = vpop.f32.mrb[155].mxu0  ;;  %v5347_v5 = vpop.f32.mrb[155].mxu1 }
 0x42a   :  { %v4613_v28 = vadd.f32 %v5233_v51, %v7654_v16  ;;  %v5236_v31 = vadd.f32 %v5235_v46, %v5234_v4  ;;  %v5348_v7 = vadd.f32 %v5347_v5, %v5346_v43 }
 0x42c   :  { %v4774_v3 = vadd.f32 %v5345_v53, %v4613_v28  ;;  %v4616_v8 = vadd.f32 %v5236_v31, %v7654_v16 }
 0x42e   :  { %4864 = vst [vmem:[%s7791_s7 + $0x60] sm:$0xff] %v4774_v3  ;;  %v4777_v15 = vadd.f32 %v5348_v7, %v4616_v8  ;;  %v5237_v18 = vpop.f32.mrb[156].mxu0  ;;  %v5349_v61 = vpop.f32.mrb[156].mxu1 }
 0x42f   :  { %v5238_v0 = vpop.f32.mrb[157].mxu0  ;;  %v5350_v54 = vpop.f32.mrb[157].mxu1 }
 0x430   :  { %4865 = vst [vmem:[%s7791_s7 + $0x68] sm:$0xff] %v4777_v15  ;;  %v5239_v56 = vadd.f32 %v5238_v0, %v5237_v18  ;;  %v5351_v50 = vadd.f32 %v5350_v54, %v5349_v61  ;;  %v5240_v58 = vpop.f32.mrb[158].mxu0  ;;  %v5352_v55 = vpop.f32.mrb[158].mxu1 }
 0x431   :  { %v5241_v63 = vpop.f32.mrb[159].mxu0  ;;  %v5353_v47 = vpop.f32.mrb[159].mxu1 }
 0x432   :  { %v4621_v52 = vadd.f32 %v5239_v56, %v7654_v16  ;;  %v5242_v27 = vadd.f32 %v5241_v63, %v5240_v58  ;;  %v5354_v2 = vadd.f32 %v5353_v47, %v5352_v55 }
 0x434   :  { %v4782_v29 = vadd.f32 %v5351_v50, %v4621_v52  ;;  %v4624_v9 = vadd.f32 %v5242_v27, %v7654_v16 }
 0x436   :  { %4866 = vst [vmem:[%s7791_s7 + $0x70] sm:$0xff] %v4782_v29  ;;  %v4785_v14 = vadd.f32 %v5354_v2, %v4624_v9  ;;  %v5243_v10 = vpop.f32.mrb[160].mxu0  ;;  %v5355_v49 = vpop.f32.mrb[160].mxu1 }
 0x437   :  { %v5244_v11 = vpop.f32.mrb[161].mxu0  ;;  %v5356_v12 = vpop.f32.mrb[161].mxu1 }
 0x438   :  { %4867 = vst [vmem:[%s7791_s7 + $0x78] sm:$0xff] %v4785_v14  ;;  %v5245_v48 = vadd.f32 %v5244_v11, %v5243_v10  ;;  %v5357_v13 = vadd.f32 %v5356_v12, %v5355_v49  ;;  %v5246_v20 = vpop.f32.mrb[162].mxu0  ;;  %v5358_v6 = vpop.f32.mrb[162].mxu1 }
 0x439   :  { %v5247_v1 = vpop.f32.mrb[163].mxu0  ;;  %v5359_v40 = vpop.f32.mrb[163].mxu1 }
 0x43a   :  { %v4629_v23 = vadd.f32 %v5245_v48, %v7654_v16  ;;  %v5248_v22 = vadd.f32 %v5247_v1, %v5246_v20  ;;  %v5360_v17 = vadd.f32 %v5359_v40, %v5358_v6 }
 0x43c   :  { %v4790_v38 = vadd.f32 %v5357_v13, %v4629_v23  ;;  %v4632_v21 = vadd.f32 %v5248_v22, %v7654_v16 }
 0x43e   :  { %4868 = vst [vmem:[%s7791_s7 + $0x80] sm:$0xff] %v4790_v38  ;;  %v4793_v24 = vadd.f32 %v5360_v17, %v4632_v21  ;;  %v5249_v25 = vpop.f32.mrb[164].mxu0  ;;  %v5361_v26 = vpop.f32.mrb[164].mxu1 }
 0x43f   :  { %v5250_v30 = vpop.f32.mrb[165].mxu0  ;;  %v5362_v32 = vpop.f32.mrb[165].mxu1 }
 0x440   :  { %4869 = vst [vmem:[%s7791_s7 + $0x88] sm:$0xff] %v4793_v24  ;;  %v5251_v33 = vadd.f32 %v5250_v30, %v5249_v25  ;;  %v5363_v19 = vadd.f32 %v5362_v32, %v5361_v26  ;;  %v5252_v59 = vpop.f32.mrb[166].mxu0  ;;  %v5364_v34 = vpop.f32.mrb[166].mxu1 }
 0x441   :  { %v5253_v35 = vpop.f32.mrb[167].mxu0  ;;  %v5365_v36 = vpop.f32.mrb[167].mxu1 }
 0x442   :  { %v4637_v37 = vadd.f32 %v5251_v33, %v7654_v16  ;;  %v5254_v39 = vadd.f32 %v5253_v35, %v5252_v59  ;;  %v5366_v41 = vadd.f32 %v5365_v36, %v5364_v34 }
 0x444   :  { %v4798_v57 = vadd.f32 %v5363_v19, %v4637_v37  ;;  %v4640_v44 = vadd.f32 %v5254_v39, %v7654_v16 }
 0x446   :  { %4870 = vst [vmem:[%s7791_s7 + $0x90] sm:$0xff] %v4798_v57  ;;  %v4801_v45 = vadd.f32 %v5366_v41, %v4640_v44  ;;  %v5255_v42 = vpop.f32.mrb[168].mxu0  ;;  %v5367_v60 = vpop.f32.mrb[168].mxu1 }
 0x447   :  { %v5256_v62 = vpop.f32.mrb[169].mxu0  ;;  %v5368_v51 = vpop.f32.mrb[169].mxu1 }
 0x448   :  { %4871 = vst [vmem:[%s7791_s7 + $0x98] sm:$0xff] %v4801_v45  ;;  %v5257_v53 = vadd.f32 %v5256_v62, %v5255_v42  ;;  %v5369_v4 = vadd.f32 %v5368_v51, %v5367_v60  ;;  %v5258_v43 = vpop.f32.mrb[170].mxu0  ;;  %v5370_v46 = vpop.f32.mrb[170].mxu1 }
 0x449   :  { %v5259_v5 = vpop.f32.mrb[171].mxu0  ;;  %v5371_v28 = vpop.f32.mrb[171].mxu1 }
 0x44a   :  { %v4645_v31 = vadd.f32 %v5257_v53, %v7654_v16  ;;  %v5260_v7 = vadd.f32 %v5259_v5, %v5258_v43  ;;  %v5372_v3 = vadd.f32 %v5371_v28, %v5370_v46 }
 0x44c   :  { %v4806_v8 = vadd.f32 %v5369_v4, %v4645_v31  ;;  %v4648_v15 = vadd.f32 %v5260_v7, %v7654_v16 }
 0x44e   :  { %4872 = vst [vmem:[%s7791_s7 + $0xa0] sm:$0xff] %v4806_v8  ;;  %v4809_v18 = vadd.f32 %v5372_v3, %v4648_v15  ;;  %v5261_v61 = vpop.f32.mrb[172].mxu0  ;;  %v5373_v0 = vpop.f32.mrb[172].mxu1 }
 0x44f   :  { %v5262_v54 = vpop.f32.mrb[173].mxu0  ;;  %v5374_v56 = vpop.f32.mrb[173].mxu1 }
 0x450   :  { %4873 = vst [vmem:[%s7791_s7 + $0xa8] sm:$0xff] %v4809_v18  ;;  %v5263_v50 = vadd.f32 %v5262_v54, %v5261_v61  ;;  %v5375_v58 = vadd.f32 %v5374_v56, %v5373_v0  ;;  %v5264_v55 = vpop.f32.mrb[174].mxu0  ;;  %v5376_v63 = vpop.f32.mrb[174].mxu1 }
 0x451   :  { %v5265_v47 = vpop.f32.mrb[175].mxu0  ;;  %v5377_v52 = vpop.f32.mrb[175].mxu1 }
 0x452   :  { %v4653_v27 = vadd.f32 %v5263_v50, %v7654_v16  ;;  %v5266_v2 = vadd.f32 %v5265_v47, %v5264_v55  ;;  %v5378_v29 = vadd.f32 %v5377_v52, %v5376_v63 }
 0x454   :  { %v4814_v9 = vadd.f32 %v5375_v58, %v4653_v27  ;;  %v4656_v14 = vadd.f32 %v5266_v2, %v7654_v16 }
 0x456   :  { %4874 = vst [vmem:[%s7791_s7 + $0xb0] sm:$0xff] %v4814_v9  ;;  %v4817_v10 = vadd.f32 %v5378_v29, %v4656_v14  ;;  %v5267_v49 = vpop.f32.mrb[176].mxu0  ;;  %v5379_v11 = vpop.f32.mrb[176].mxu1 }
 0x457   :  { %v5268_v12 = vpop.f32.mrb[177].mxu0  ;;  %v5380_v48 = vpop.f32.mrb[177].mxu1 }
 0x458   :  { %4875 = vst [vmem:[%s7791_s7 + $0xb8] sm:$0xff] %v4817_v10  ;;  %v5269_v13 = vadd.f32 %v5268_v12, %v5267_v49  ;;  %v5381_v20 = vadd.f32 %v5380_v48, %v5379_v11  ;;  %v5270_v6 = vpop.f32.mrb[178].mxu0  ;;  %v5382_v1 = vpop.f32.mrb[178].mxu1 }
 0x459   :  { %v5271_v40 = vpop.f32.mrb[179].mxu0  ;;  %v5383_v23 = vpop.f32.mrb[179].mxu1 }
 0x45a   :  { %v4661_v22 = vadd.f32 %v5269_v13, %v7654_v16  ;;  %v5272_v17 = vadd.f32 %v5271_v40, %v5270_v6  ;;  %v5384_v38 = vadd.f32 %v5383_v23, %v5382_v1 }
 0x45c   :  { %v4822_v21 = vadd.f32 %v5381_v20, %v4661_v22  ;;  %v4664_v24 = vadd.f32 %v5272_v17, %v7654_v16 }
 0x45e   :  { %4876 = vst [vmem:[%s7791_s7 + $0xc0] sm:$0xff] %v4822_v21  ;;  %v4825_v25 = vadd.f32 %v5384_v38, %v4664_v24  ;;  %v5273_v26 = vpop.f32.mrb[180].mxu0  ;;  %v5385_v30 = vpop.f32.mrb[180].mxu1 }
 0x45f   :  { %v5274_v32 = vpop.f32.mrb[181].mxu0  ;;  %v5386_v33 = vpop.f32.mrb[181].mxu1 }
 0x460   :  { %4877 = vst [vmem:[%s7791_s7 + $0xc8] sm:$0xff] %v4825_v25  ;;  %v5275_v19 = vadd.f32 %v5274_v32, %v5273_v26  ;;  %v5387_v59 = vadd.f32 %v5386_v33, %v5385_v30  ;;  %v5276_v34 = vpop.f32.mrb[182].mxu0  ;;  %v5388_v35 = vpop.f32.mrb[182].mxu1 }
 0x461   :  { %v5277_v36 = vpop.f32.mrb[183].mxu0  ;;  %v5389_v37 = vpop.f32.mrb[183].mxu1 }
 0x462   :  { %v4669_v39 = vadd.f32 %v5275_v19, %v7654_v16  ;;  %v5278_v41 = vadd.f32 %v5277_v36, %v5276_v34  ;;  %v5390_v57 = vadd.f32 %v5389_v37, %v5388_v35 }
 0x464   :  { %v4830_v44 = vadd.f32 %v5387_v59, %v4669_v39  ;;  %v4672_v45 = vadd.f32 %v5278_v41, %v7654_v16 }
 0x466   :  { %4878 = vst [vmem:[%s7791_s7 + $0xd0] sm:$0xff] %v4830_v44  ;;  %v4833_v42 = vadd.f32 %v5390_v57, %v4672_v45  ;;  %v5279_v60 = vpop.f32.mrb[184].mxu0  ;;  %v5391_v62 = vpop.f32.mrb[184].mxu1 }
 0x467   :  { %v5280_v51 = vpop.f32.mrb[185].mxu0  ;;  %v5392_v53 = vpop.f32.mrb[185].mxu1 }
 0x468   :  { %4879 = vst [vmem:[%s7791_s7 + $0xd8] sm:$0xff] %v4833_v42  ;;  %v5281_v4 = vadd.f32 %v5280_v51, %v5279_v60  ;;  %v5393_v43 = vadd.f32 %v5392_v53, %v5391_v62  ;;  %v5282_v46 = vpop.f32.mrb[186].mxu0  ;;  %v5394_v5 = vpop.f32.mrb[186].mxu1 }
 0x469   :  { %v5283_v28 = vpop.f32.mrb[187].mxu0  ;;  %v5395_v31 = vpop.f32.mrb[187].mxu1 }
 0x46a   :  { %v4677_v7 = vadd.f32 %v5281_v4, %v7654_v16  ;;  %v5284_v3 = vadd.f32 %v5283_v28, %v5282_v46  ;;  %v5396_v8 = vadd.f32 %v5395_v31, %v5394_v5 }
 0x46c   :  { %v4838_v15 = vadd.f32 %v5393_v43, %v4677_v7  ;;  %v4680_v18 = vadd.f32 %v5284_v3, %v7654_v16 }
 0x46e   :  { %4880 = vst [vmem:[%s7791_s7 + $0xe0] sm:$0xff] %v4838_v15  ;;  %v4841_v61 = vadd.f32 %v5396_v8, %v4680_v18  ;;  %v5285_v0 = vpop.f32.mrb[188].mxu0  ;;  %v5397_v54 = vpop.f32.mrb[188].mxu1 }
 0x46f   :  { %v5286_v56 = vpop.f32.mrb[189].mxu0  ;;  %v5398_v50 = vpop.f32.mrb[189].mxu1 }
 0x470   :  { %4881 = vst [vmem:[%s7791_s7 + $0xe8] sm:$0xff] %v4841_v61  ;;  %v5287_v58 = vadd.f32 %v5286_v56, %v5285_v0  ;;  %v5399_v55 = vadd.f32 %v5398_v50, %v5397_v54  ;;  %v5288_v63 = vpop.f32.mrb[190].mxu0  ;;  %v5400_v47 = vpop.f32.mrb[190].mxu1 }
 0x471   :  { %v5289_v52 = vpop.f32.mrb[191].mxu0  ;;  %v5401_v27 = vpop.f32.mrb[191].mxu1 }
 0x472   :  { %v4685_v2 = vadd.f32 %v5287_v58, %v7654_v16  ;;  %v5290_v29 = vadd.f32 %v5289_v52, %v5288_v63  ;;  %v5402_v9 = vadd.f32 %v5401_v27, %v5400_v47 }
 0x474   :  { %v4846_v14 = vadd.f32 %v5399_v55, %v4685_v2  ;;  %v4688_v10 = vadd.f32 %v5290_v29, %v7654_v16 }
 0x476   :  { %4882 = vst [vmem:[%s7791_s7 + $0xf0] sm:$0xff] %v4846_v14  ;;  %v4849_v49 = vadd.f32 %v5402_v9, %v4688_v10 }
 0x478   :  { %4883 = vst [vmem:[%s7791_s7 + $0xf8] sm:$0xff] %v4849_v49 }
 0x479   :  { %4888 = vsyncpa [#allocation5], 1 }
 0x47a   :  { %4889 = vsyncpa [#allocation7], 1 }

</bundles_post_ra>
